<compile_context>
chip_gen: v7x
topology: tpu7x:2x2x1
jax: 0.10.0
libtpu: 0.0.40
codegen_flags: <defaults>
</compile_context>

<pallas_src>
import math
import functools

import jax
import jax.numpy as jnp
from jax.experimental import pallas as pl
from jax.experimental.pallas import tpu as pltpu


def _encoder_layer_kernel(
    x_q_ref, x_kv_ref,
    wq_ref, bq_ref, wk_ref, bk_ref, wv_ref, bv_ref, wo_ref, bo_ref,
    w1_ref, b1_ref, w2_ref, b2_ref,
    o_ref,
    q_scr, acc_scr, m_scr, l_scr, ffn_scr,
    *, num_heads, d_head, d_ff_chunk,
):
    eps = 1e-5
    f32 = jnp.float32
    cdt = wq_ref.dtype                      # MXU input dtype (bf16)

    ki = pl.program_id(2)
    n_kv = pl.num_programs(2)

    def layer_norm(a):                      # affine folded into the weights
        mu = jnp.mean(a, axis=-1, keepdims=True)
        var = jnp.mean((a - mu) ** 2, axis=-1, keepdims=True)
        return (a - mu) * jax.lax.rsqrt(var + eps)

    # ---- per (batch, query-tile) init: project Q once, reset softmax state.
    @pl.when(ki == 0)
    def _():
        xn_q = layer_norm(x_q_ref[0]).astype(cdt)          # (tq, D)
        q = jnp.dot(xn_q, wq_ref[...], preferred_element_type=f32) + bq_ref[...]
        q = q * (1.0 / math.sqrt(d_head))                  # fold scale into q once
        q_c = q.astype(cdt)
        for h in range(num_heads):                         # one-time per q-tile
            q_scr[h] = q_c[:, h * d_head:(h + 1) * d_head]
        m_scr[...] = jnp.full_like(m_scr, -jnp.inf)
        l_scr[...] = jnp.zeros_like(l_scr)
        acc_scr[...] = jnp.zeros_like(acc_scr)

    # ---- K/V projection for this KV tile (LN1 affine folded into Wk/Wv).
    xn_kv = layer_norm(x_kv_ref[0]).astype(cdt)            # (tkv, D)
    k = (jnp.dot(xn_kv, wk_ref[...], preferred_element_type=f32)
         + bk_ref[...]).astype(cdt)
    v = (jnp.dot(xn_kv, wv_ref[...], preferred_element_type=f32)
         + bv_ref[...]).astype(cdt)

    # ---- online-softmax update, per head; all state lives in scratch refs so
    # each head's temporaries die at its store (bounded live ranges).
    for h in range(num_heads):
        lo = h * d_head
        ks = k[:, lo:lo + d_head]                          # (tkv, d_head)
        vs = v[:, lo:lo + d_head]
        s = jax.lax.dot_general(                           # q @ k^T, no .T materialized
            q_scr[h], ks, (((1,), (1,)), ((), ())), preferred_element_type=f32)
        m_prev = m_scr[h]                                  # (tq, 1)
        m_new = jnp.maximum(m_prev, jnp.max(s, axis=-1, keepdims=True))
        alpha = jnp.exp(m_prev - m_new)
        p = jnp.exp(s - m_new)                             # (tq, tkv) f32
        l_scr[h] = alpha * l_scr[h] + jnp.sum(p, axis=-1, keepdims=True)
        acc_scr[h] = alpha * acc_scr[h] + jnp.dot(
            p.astype(cdt), vs, preferred_element_type=f32)
        m_scr[h] = m_new

    # ---- epilogue on the last KV tile: normalize, full-width Wo, residual,
    # LN2, FFN, residual, store.
    @pl.when(ki == n_kv - 1)
    def _():
        # f32 softmax normalization after the PV matmul (exact reciprocal).
        ctx = jnp.concatenate(
            [acc_scr[h] * pl.reciprocal(l_scr[h], approx=False)
             for h in range(num_heads)], axis=-1)          # (tq, D)
        attn_out = jnp.dot(ctx.astype(cdt), wo_ref[...],
                           preferred_element_type=f32) + bo_ref[...]
        res1 = x_q_ref[0] + attn_out                       # dropout1 = identity

        x2n = layer_norm(res1).astype(cdt)                 # LN2 affine folded into W1/b1
        d_ff = w1_ref.shape[1]
        ffn_scr[...] = jnp.zeros_like(ffn_scr)
        for c0 in range(0, d_ff, d_ff_chunk):              # (tq, d_ff) never materialized
            c1 = c0 + d_ff_chunk
            h1 = jnp.dot(x2n, w1_ref[:, c0:c1],
                         preferred_element_type=f32) + b1_ref[:, c0:c1]
            h1 = jnp.maximum(h1, 0.0)
            ffn_scr[...] += jnp.dot(h1.astype(cdt), w2_ref[c0:c1, :],
                                    preferred_element_type=f32)
        # dropout2 = identity; b2 added once.
        o_ref[0] = (res1 + ffn_scr[...] + b2_ref[...]).astype(o_ref.dtype)


def _constant_spec(shape, single_buffer):
    """BlockSpec for a weight/bias whose block index never changes."""
    index_map = lambda b, qi, ki: (0,) * len(shape)
    if single_buffer:
        # Constant index_map -> one resident copy is enough; halves the weight
        # VMEM footprint (matters on v7x's 64 MiB).
        return pl.BlockSpec(shape, index_map, pipeline_mode=pl.Buffered(1))
    return pl.BlockSpec(shape, index_map)


def _build_encoder_call(B, S, D, d_ff, num_heads, tq, tkv, d_ff_chunk,
                        compute_dtype, single_buffer):
    d_head = D // num_heads
    n_q = S // tq
    n_kv = S // tkv

    kernel = functools.partial(
        _encoder_layer_kernel,
        num_heads=num_heads, d_head=d_head, d_ff_chunk=d_ff_chunk)

    def wspec(shape):
        return _constant_spec(shape, single_buffer)

    in_specs = [
        pl.BlockSpec((1, tq, D), lambda b, qi, ki: (b, qi, 0)),    # x, query tile
        pl.BlockSpec((1, tkv, D), lambda b, qi, ki: (b, ki, 0)),   # x, KV tile
        wspec((D, D)), wspec((1, D)),        # wq, bq
        wspec((D, D)), wspec((1, D)),        # wk, bk
        wspec((D, D)), wspec((1, D)),        # wv, bv
        wspec((D, D)), wspec((1, D)),        # wo, bo
        wspec((D, d_ff)), wspec((1, d_ff)),  # w1, b1
        wspec((d_ff, D)), wspec((1, D)),     # w2, b2
    ]
    out_spec = pl.BlockSpec((1, tq, D), lambda b, qi, ki: (b, qi, 0))

    scratch_shapes = [
        pltpu.VMEM((num_heads, tq, d_head), compute_dtype),  # scaled Q, per head
        pltpu.VMEM((num_heads, tq, d_head), jnp.float32),    # softmax-weighted V acc
        pltpu.VMEM((num_heads, tq, 1), jnp.float32),         # running max
        pltpu.VMEM((num_heads, tq, 1), jnp.float32),         # running sum
        pltpu.VMEM((tq, D), jnp.float32),                    # FFN accumulator
    ]

    # ---- advisory VMEM budget, capped by the physical capacity of this part.
    wbytes = (4 * D * D + 2 * D * d_ff) * 2                  # bf16 weights
    bbytes = (5 * D + d_ff) * 4                              # f32 biases
    wfactor = 1 if single_buffer else 2
    act_bytes = 2 * (2 * tq * D + tkv * D) * 4               # x_q / o / x_kv, dbl-buffered
    scratch_bytes = (num_heads * tq * d_head * (2 + 4)
                     + 2 * num_heads * tq * 128 * 4          # m/l lane padding
                     + tq * D * 4)
    interm = (6 * tq * D + 4 * tkv * D + 2 * tq * tkv + tq * d_ff_chunk) * 4
    need = wfactor * (wbytes + bbytes) + act_bytes + scratch_bytes + interm + (4 << 20)
    try:
        cap = int(pltpu.get_tpu_info().vmem_capacity_bytes)  # 128 MiB v5e/v6e, 64 MiB v7x
    except Exception:
        cap = 64 << 20
    vmem_limit = int(min(max(need, 32 << 20), cap - (8 << 20)))

    return pl.pallas_call(
        kernel,
        out_shape=jax.ShapeDtypeStruct((B, S, D), jnp.float32),
        grid_spec=pltpu.PrefetchScalarGridSpec(
            num_scalar_prefetch=0,
            grid=(B, n_q, n_kv),
            in_specs=in_specs,
            out_specs=out_spec,
            scratch_shapes=scratch_shapes,
        ),
        compiler_params=pltpu.CompilerParams(
            dimension_semantics=("parallel", "parallel", "arbitrary"),
            vmem_limit_bytes=vmem_limit,
        ),
    )


def transformer_encoder_layer(x, kparams, *, num_heads, q_tile=None,
                              kv_tile=None, d_ff_chunk=512):
    """x: (B, S, D) f32.  kparams: folded/bf16 params from prepare_kernel_params."""
    B, S, D = x.shape
    assert D % num_heads == 0
    d_ff = kparams["w1"].shape[1]

    tq = q_tile if q_tile is not None else min(S, 256)
    tkv = kv_tile if kv_tile is not None else min(S, 512)
    assert S % tq == 0 and S % tkv == 0
    assert tq == S or tq % 8 == 0
    assert tkv == S or tkv % 8 == 0
    d_ff_chunk = min(d_ff_chunk, d_ff)
    assert d_ff % d_ff_chunk == 0

    args = (x, x,
            kparams["wq"], kparams["bq"], kparams["wk"], kparams["bk"],
            kparams["wv"], kparams["bv"], kparams["wo"], kparams["bo"],
            kparams["w1"], kparams["b1"], kparams["w2"], kparams["b2"])

    last_err = None
    for single_buffer in (True, False):
        try:
            call = _build_encoder_call(
                B, S, D, d_ff, num_heads, tq, tkv, d_ff_chunk,
                kparams["wq"].dtype, single_buffer)
            return jax.block_until_ready(call(*args))
        except Exception as err:    # pl.Buffered(1) unsupported -> retry double-buffered
            last_err = err
    raise last_err


def init_params(key, d_model, num_heads, d_ff):
    """f32 parameters with torch-Linear-style init (also used by the reference)."""
    ks = jax.random.split(key, 10)
    s_d = 1.0 / math.sqrt(d_model)
    s_f = 1.0 / math.sqrt(d_ff)

    def lin(k, fan_in, fan_out, s):
        kw, kb = jax.random.split(k)
        w = jax.random.uniform(kw, (fan_in, fan_out), jnp.float32, -s, s)
        b = jax.random.uniform(kb, (1, fan_out), jnp.float32, -s, s)
        return w, b

    wq, bq = lin(ks[0], d_model, d_model, s_d)
    wk, bk = lin(ks[1], d_model, d_model, s_d)
    wv, bv = lin(ks[2], d_model, d_model, s_d)
    wo, bo = lin(ks[3], d_model, d_model, s_d)
    w1, b1 = lin(ks[4], d_model, d_ff, s_d)
    w2, b2 = lin(ks[5], d_ff, d_model, s_f)

    # Non-trivial LayerNorm affine so the host-side folding is actually exercised.
    return {
        "ln1_g": 1.0 + 0.1 * jax.random.normal(ks[6], (d_model,), jnp.float32),
        "ln1_b": 0.1 * jax.random.normal(ks[7], (d_model,), jnp.float32),
        "ln2_g": 1.0 + 0.1 * jax.random.normal(ks[8], (d_model,), jnp.float32),
        "ln2_b": 0.1 * jax.random.normal(ks[9], (d_model,), jnp.float32),
        "wq": wq, "bq": bq, "wk": wk, "bk": bk, "wv": wv, "bv": bv,
        "wo": wo, "bo": bo, "w1": w1, "b1": b1, "w2": w2, "b2": b2,
    }


def prepare_kernel_params(p, compute_dtype=jnp.bfloat16):
    """Fold LN affine into the adjacent linears (f32), cast MXU weights to bf16.

    y = ((xn*g + b) @ W + c) == xn @ (g[:,None]*W) + (b @ W + c)
    """
    def fold(w, bias, g, beta):
        return w * g.reshape(-1, 1), bias + beta.reshape(1, -1) @ w

    wq, bq = fold(p["wq"], p["bq"], p["ln1_g"], p["ln1_b"])
    wk, bk = fold(p["wk"], p["bk"], p["ln1_g"], p["ln1_b"])
    wv, bv = fold(p["wv"], p["bv"], p["ln1_g"], p["ln1_b"])
    w1, b1 = fold(p["w1"], p["b1"], p["ln2_g"], p["ln2_b"])
    cd = compute_dtype
    return {
        "wq": wq.astype(cd), "bq": bq, "wk": wk.astype(cd), "bk": bk,
        "wv": wv.astype(cd), "bv": bv,
        "wo": p["wo"].astype(cd), "bo": p["bo"],
        "w1": w1.astype(cd), "b1": b1,
        "w2": p["w2"].astype(cd), "b2": p["b2"],
    }


def reference_encoder_layer(x, params, *, num_heads):
    """Pure-JAX f32 reference with the torch module's (eval-mode) semantics."""
    p = params
    B, S, D = x.shape
    d_head = D // num_heads
    eps = 1e-5

    def ln(a, g, b):
        m = jnp.mean(a, axis=-1, keepdims=True)
        v = jnp.mean((a - m) ** 2, axis=-1, keepdims=True)
        return (a - m) / jnp.sqrt(v + eps) * g + b

    xn = ln(x, p["ln1_g"], p["ln1_b"])
    q = xn @ p["wq"] + p["bq"]
    k = xn @ p["wk"] + p["bk"]
    v = xn @ p["wv"] + p["bv"]
    q = q.reshape(B, S, num_heads, d_head).transpose(0, 2, 1, 3)
    k = k.reshape(B, S, num_heads, d_head).transpose(0, 2, 1, 3)
    v = v.reshape(B, S, num_heads, d_head).transpose(0, 2, 1, 3)
    scores = jnp.einsum("bhqd,bhkd->bhqk", q, k) / math.sqrt(d_head)
    attn = jax.nn.softmax(scores, axis=-1)
    ctx = jnp.einsum("bhqk,bhkd->bhqd", attn, v)
    ctx = ctx.transpose(0, 2, 1, 3).reshape(B, S, D)
    attn_out = ctx @ p["wo"] + p["bo"]
    res1 = x + attn_out
    x2 = ln(res1, p["ln2_g"], p["ln2_b"])
    ffn = jnp.maximum(x2 @ p["w1"] + p["b1"], 0.0) @ p["w2"] + p["b2"]
    return res1 + ffn


if __name__ == "__main__":
    # Small shapes, chosen so the tiled paths are actually exercised:
    # 2 query tiles x 2 KV tiles (S=16, tile=8) and 2 d_ff chunks (128 / 64).
    B, S, D = 2, 16, 32
    num_heads = 4
    d_ff = 128

    key = jax.random.PRNGKey(0)
    kx, kp = jax.random.split(key)
    x = jax.random.normal(kx, (B, S, D), jnp.float32)
    params = init_params(kp, D, num_heads, d_ff)
    kparams = prepare_kernel_params(params)

    out = transformer_encoder_layer(
        x, kparams, num_heads=num_heads, q_tile=8, kv_tile=8, d_ff_chunk=64)
    out = jax.block_until_ready(out)

    ref = reference_encoder_layer(x, params, num_heads=num_heads)
    assert out.shape == (B, S, D)
    max_err = float(jnp.max(jnp.abs(out - ref)))
    # bf16 MXU inputs (activations + folded weights) vs. f32 reference.
    assert max_err < 5e-2, f"mismatch vs reference: max abs err {max_err}"

    print("KERNEL_OK")
</pallas_src>

<mosaic_0001>
module attributes {stable_mosaic.version = 11 : i64} {
  func.func @_encoder_layer_kernel(%arg0: i32, %arg1: i32, %arg2: i32, %arg3: memref<1x8x32xf32, #tpu.memory_space<vmem>>, %arg4: memref<1x8x32xf32, #tpu.memory_space<vmem>>, %arg5: memref<32x32xbf16, #tpu.memory_space<vmem>>, %arg6: memref<1x32xf32, #tpu.memory_space<vmem>>, %arg7: memref<32x32xbf16, #tpu.memory_space<vmem>>, %arg8: memref<1x32xf32, #tpu.memory_space<vmem>>, %arg9: memref<32x32xbf16, #tpu.memory_space<vmem>>, %arg10: memref<1x32xf32, #tpu.memory_space<vmem>>, %arg11: memref<32x32xbf16, #tpu.memory_space<vmem>>, %arg12: memref<1x32xf32, #tpu.memory_space<vmem>>, %arg13: memref<32x128xbf16, #tpu.memory_space<vmem>>, %arg14: memref<1x128xf32, #tpu.memory_space<vmem>>, %arg15: memref<128x32xbf16, #tpu.memory_space<vmem>>, %arg16: memref<1x32xf32, #tpu.memory_space<vmem>>, %arg17: memref<1x8x32xf32, #tpu.memory_space<vmem>>, %arg18: memref<4x8x8xbf16, #tpu.memory_space<vmem>>, %arg19: memref<4x8x8xf32, #tpu.memory_space<vmem>>, %arg20: memref<4x8x1xf32, #tpu.memory_space<vmem>>, %arg21: memref<4x8x1xf32, #tpu.memory_space<vmem>>, %arg22: memref<8x32xf32, #tpu.memory_space<vmem>>) attributes {dimension_semantics = [#tpu.dimension_semantics<parallel>, #tpu.dimension_semantics<parallel>, #tpu.dimension_semantics<arbitrary>], iteration_bounds = array<i64: 2, 2, 2>, scalar_prefetch = 0 : i64, scratch_operands = 5 : i64, tpu.core_type = #tpu.core_type<tc>, window_params = [{transform_indices = @transform_0, window_bounds = array<i64: 1, 8, 32>}, {transform_indices = @transform_1, window_bounds = array<i64: 1, 8, 32>}, {pipeline_mode = #tpu.pipeline_mode<synchronous>, transform_indices = @transform_2, window_bounds = array<i64: 32, 32>}, {pipeline_mode = #tpu.pipeline_mode<synchronous>, transform_indices = @transform_3, window_bounds = array<i64: 1, 32>}, {pipeline_mode = #tpu.pipeline_mode<synchronous>, transform_indices = @transform_4, window_bounds = array<i64: 32, 32>}, {pipeline_mode = #tpu.pipeline_mode<synchronous>, transform_indices = @transform_5, window_bounds = array<i64: 1, 32>}, {pipeline_mode = #tpu.pipeline_mode<synchronous>, transform_indices = @transform_6, window_bounds = array<i64: 32, 32>}, {pipeline_mode = #tpu.pipeline_mode<synchronous>, transform_indices = @transform_7, window_bounds = array<i64: 1, 32>}, {pipeline_mode = #tpu.pipeline_mode<synchronous>, transform_indices = @transform_8, window_bounds = array<i64: 32, 32>}, {pipeline_mode = #tpu.pipeline_mode<synchronous>, transform_indices = @transform_9, window_bounds = array<i64: 1, 32>}, {pipeline_mode = #tpu.pipeline_mode<synchronous>, transform_indices = @transform_10, window_bounds = array<i64: 32, 128>}, {pipeline_mode = #tpu.pipeline_mode<synchronous>, transform_indices = @transform_11, window_bounds = array<i64: 1, 128>}, {pipeline_mode = #tpu.pipeline_mode<synchronous>, transform_indices = @transform_12, window_bounds = array<i64: 128, 32>}, {pipeline_mode = #tpu.pipeline_mode<synchronous>, transform_indices = @transform_13, window_bounds = array<i64: 1, 32>}, {transform_indices = @transform_14, window_bounds = array<i64: 1, 8, 32>}]} {
    %c0_i32 = arith.constant 0 : i32
    %0 = arith.cmpi eq, %arg2, %c0_i32 : i32
    %1 = arith.extui %0 : i1 to i32
    %c0_i32_0 = arith.constant 0 : i32
    %2 = arith.cmpi ne, %1, %c0_i32_0 : i32
    scf.if %2 {
      %c0_115 = arith.constant 0 : index
      %c0_116 = arith.constant 0 : index
      %c0_117 = arith.constant 0 : index
      %187 = vector.load %arg3[%c0_115, %c0_116, %c0_117] : memref<1x8x32xf32, #tpu.memory_space<vmem>>, vector<1x8x32xf32>
      %188 = vector.shape_cast %187 : vector<1x8x32xf32> to vector<8x32xf32>
      %cst_118 = arith.constant dense<0.000000e+00> : vector<8xf32>
      %189 = vector.multi_reduction <add>, %188, %cst_118 [1] : vector<8x32xf32> to vector<8xf32>
      %190 = vector.shape_cast %189 : vector<8xf32> to vector<8x1xf32>
      %cst_119 = arith.constant 3.200000e+01 : f32
      %191 = vector.broadcast %cst_119 : f32 to vector<8x1xf32>
      %192 = arith.divf %190, %191 : vector<8x1xf32>
      %193 = vector.broadcast %192 : vector<8x1xf32> to vector<8x32xf32>
      %194 = arith.subf %188, %193 : vector<8x32xf32>
      %195 = arith.mulf %194, %194 : vector<8x32xf32>
      %cst_120 = arith.constant dense<0.000000e+00> : vector<8xf32>
      %196 = vector.multi_reduction <add>, %195, %cst_120 [1] : vector<8x32xf32> to vector<8xf32>
      %197 = vector.shape_cast %196 : vector<8xf32> to vector<8x1xf32>
      %cst_121 = arith.constant 3.200000e+01 : f32
      %198 = vector.broadcast %cst_121 : f32 to vector<8x1xf32>
      %199 = arith.divf %197, %198 : vector<8x1xf32>
      %200 = vector.broadcast %192 : vector<8x1xf32> to vector<8x32xf32>
      %201 = arith.subf %188, %200 : vector<8x32xf32>
      %cst_122 = arith.constant 9.99999974E-6 : f32
      %202 = vector.broadcast %cst_122 : f32 to vector<8x1xf32>
      %203 = arith.addf %199, %202 : vector<8x1xf32>
      %204 = math.rsqrt %203 : vector<8x1xf32>
      %205 = vector.broadcast %204 : vector<8x1xf32> to vector<8x32xf32>
      %206 = arith.mulf %201, %205 : vector<8x32xf32>
      %207 = arith.truncf %206 : vector<8x32xf32> to vector<8x32xbf16>
      %c0_123 = arith.constant 0 : index
      %c0_124 = arith.constant 0 : index
      %208 = vector.load %arg5[%c0_123, %c0_124] : memref<32x32xbf16, #tpu.memory_space<vmem>>, vector<32x32xbf16>
      %cst_125 = arith.constant dense<0.000000e+00> : vector<8x32xf32>
      %209 = tpu.matmul %207, %208, %cst_125 {dimension_numbers = #tpu.dot_dimension_numbers<[1], [0], [0], [1], [0, 0, 1, 1], [], []>} : vector<8x32xbf16>, vector<32x32xbf16>, vector<8x32xf32> -> vector<8x32xf32>
      %c0_126 = arith.constant 0 : index
      %c0_127 = arith.constant 0 : index
      %210 = vector.load %arg6[%c0_126, %c0_127] : memref<1x32xf32, #tpu.memory_space<vmem>>, vector<1x32xf32>
      %211 = vector.broadcast %210 : vector<1x32xf32> to vector<8x32xf32>
      %212 = arith.addf %209, %211 : vector<8x32xf32>
      %cst_128 = arith.constant 0.353553385 : f32
      %213 = vector.broadcast %cst_128 : f32 to vector<8x32xf32>
      %214 = arith.mulf %212, %213 : vector<8x32xf32>
      %215 = arith.truncf %214 : vector<8x32xf32> to vector<8x32xbf16>
      %216 = vector.extract_strided_slice %215 {offsets = [0, 0], sizes = [8, 8], strides = [1, 1]} : vector<8x32xbf16> to vector<8x8xbf16>
      %c0_129 = arith.constant 0 : index
      %c0_130 = arith.constant 0 : index
      %c0_131 = arith.constant 0 : index
      %217 = vector.load %arg18[%c0_129, %c0_130, %c0_131] : memref<4x8x8xbf16, #tpu.memory_space<vmem>>, vector<1x8x8xbf16>
      %218 = vector.shape_cast %217 : vector<1x8x8xbf16> to vector<8x8xbf16>
      %219 = vector.shape_cast %216 : vector<8x8xbf16> to vector<1x8x8xbf16>
      tpu.vector_store %arg18[%c0_129, %c0_130, %c0_131], %219 {strides = array<i32>} : memref<4x8x8xbf16, #tpu.memory_space<vmem>>, vector<1x8x8xbf16>,
      %220 = vector.extract_strided_slice %215 {offsets = [0, 8], sizes = [8, 8], strides = [1, 1]} : vector<8x32xbf16> to vector<8x8xbf16>
      %c1_132 = arith.constant 1 : index
      %c0_133 = arith.constant 0 : index
      %c0_134 = arith.constant 0 : index
      %221 = vector.load %arg18[%c1_132, %c0_133, %c0_134] : memref<4x8x8xbf16, #tpu.memory_space<vmem>>, vector<1x8x8xbf16>
      %222 = vector.shape_cast %221 : vector<1x8x8xbf16> to vector<8x8xbf16>
      %223 = vector.shape_cast %220 : vector<8x8xbf16> to vector<1x8x8xbf16>
      tpu.vector_store %arg18[%c1_132, %c0_133, %c0_134], %223 {strides = array<i32>} : memref<4x8x8xbf16, #tpu.memory_space<vmem>>, vector<1x8x8xbf16>,
      %224 = vector.extract_strided_slice %215 {offsets = [0, 16], sizes = [8, 8], strides = [1, 1]} : vector<8x32xbf16> to vector<8x8xbf16>
      %c2_135 = arith.constant 2 : index
      %c0_136 = arith.constant 0 : index
      %c0_137 = arith.constant 0 : index
      %225 = vector.load %arg18[%c2_135, %c0_136, %c0_137] : memref<4x8x8xbf16, #tpu.memory_space<vmem>>, vector<1x8x8xbf16>
      %226 = vector.shape_cast %225 : vector<1x8x8xbf16> to vector<8x8xbf16>
      %227 = vector.shape_cast %224 : vector<8x8xbf16> to vector<1x8x8xbf16>
      tpu.vector_store %arg18[%c2_135, %c0_136, %c0_137], %227 {strides = array<i32>} : memref<4x8x8xbf16, #tpu.memory_space<vmem>>, vector<1x8x8xbf16>,
      %228 = vector.extract_strided_slice %215 {offsets = [0, 24], sizes = [8, 8], strides = [1, 1]} : vector<8x32xbf16> to vector<8x8xbf16>
      %c3_138 = arith.constant 3 : index
      %c0_139 = arith.constant 0 : index
      %c0_140 = arith.constant 0 : index
      %229 = vector.load %arg18[%c3_138, %c0_139, %c0_140] : memref<4x8x8xbf16, #tpu.memory_space<vmem>>, vector<1x8x8xbf16>
      %230 = vector.shape_cast %229 : vector<1x8x8xbf16> to vector<8x8xbf16>
      %231 = vector.shape_cast %228 : vector<8x8xbf16> to vector<1x8x8xbf16>
      tpu.vector_store %arg18[%c3_138, %c0_139, %c0_140], %231 {strides = array<i32>} : memref<4x8x8xbf16, #tpu.memory_space<vmem>>, vector<1x8x8xbf16>,
      %cst_141 = arith.constant 0xFF800000 : f32
      %232 = vector.broadcast %cst_141 : f32 to vector<4x8x1xf32>
      %c0_142 = arith.constant 0 : index
      %c0_143 = arith.constant 0 : index
      %c0_144 = arith.constant 0 : index
      %233 = vector.load %arg20[%c0_142, %c0_143, %c0_144] : memref<4x8x1xf32, #tpu.memory_space<vmem>>, vector<4x8x1xf32>
      tpu.vector_store %arg20[%c0_142, %c0_143, %c0_144], %232 {strides = array<i32>} : memref<4x8x1xf32, #tpu.memory_space<vmem>>, vector<4x8x1xf32>,
      %cst_145 = arith.constant 0.000000e+00 : f32
      %234 = vector.broadcast %cst_145 : f32 to vector<4x8x1xf32>
      %c0_146 = arith.constant 0 : index
      %c0_147 = arith.constant 0 : index
      %c0_148 = arith.constant 0 : index
      %235 = vector.load %arg21[%c0_146, %c0_147, %c0_148] : memref<4x8x1xf32, #tpu.memory_space<vmem>>, vector<4x8x1xf32>
      tpu.vector_store %arg21[%c0_146, %c0_147, %c0_148], %234 {strides = array<i32>} : memref<4x8x1xf32, #tpu.memory_space<vmem>>, vector<4x8x1xf32>,
      %cst_149 = arith.constant 0.000000e+00 : f32
      %236 = vector.broadcast %cst_149 : f32 to vector<4x8x8xf32>
      %c0_150 = arith.constant 0 : index
      %c0_151 = arith.constant 0 : index
      %c0_152 = arith.constant 0 : index
      %237 = vector.load %arg19[%c0_150, %c0_151, %c0_152] : memref<4x8x8xf32, #tpu.memory_space<vmem>>, vector<4x8x8xf32>
      tpu.vector_store %arg19[%c0_150, %c0_151, %c0_152], %236 {strides = array<i32>} : memref<4x8x8xf32, #tpu.memory_space<vmem>>, vector<4x8x8xf32>,
    } else {
    }
    %c0 = arith.constant 0 : index
    %c0_1 = arith.constant 0 : index
    %c0_2 = arith.constant 0 : index
    %3 = vector.load %arg4[%c0, %c0_1, %c0_2] : memref<1x8x32xf32, #tpu.memory_space<vmem>>, vector<1x8x32xf32>
    %4 = vector.shape_cast %3 : vector<1x8x32xf32> to vector<8x32xf32>
    %cst = arith.constant dense<0.000000e+00> : vector<8xf32>
    %5 = vector.multi_reduction <add>, %4, %cst [1] : vector<8x32xf32> to vector<8xf32>
    %6 = vector.shape_cast %5 : vector<8xf32> to vector<8x1xf32>
    %cst_3 = arith.constant 3.200000e+01 : f32
    %7 = vector.broadcast %cst_3 : f32 to vector<8x1xf32>
    %8 = arith.divf %6, %7 : vector<8x1xf32>
    %9 = vector.broadcast %8 : vector<8x1xf32> to vector<8x32xf32>
    %10 = arith.subf %4, %9 : vector<8x32xf32>
    %11 = arith.mulf %10, %10 : vector<8x32xf32>
    %cst_4 = arith.constant dense<0.000000e+00> : vector<8xf32>
    %12 = vector.multi_reduction <add>, %11, %cst_4 [1] : vector<8x32xf32> to vector<8xf32>
    %13 = vector.shape_cast %12 : vector<8xf32> to vector<8x1xf32>
    %cst_5 = arith.constant 3.200000e+01 : f32
    %14 = vector.broadcast %cst_5 : f32 to vector<8x1xf32>
    %15 = arith.divf %13, %14 : vector<8x1xf32>
    %16 = vector.broadcast %8 : vector<8x1xf32> to vector<8x32xf32>
    %17 = arith.subf %4, %16 : vector<8x32xf32>
    %cst_6 = arith.constant 9.99999974E-6 : f32
    %18 = vector.broadcast %cst_6 : f32 to vector<8x1xf32>
    %19 = arith.addf %15, %18 : vector<8x1xf32>
    %20 = math.rsqrt %19 : vector<8x1xf32>
    %21 = vector.broadcast %20 : vector<8x1xf32> to vector<8x32xf32>
    %22 = arith.mulf %17, %21 : vector<8x32xf32>
    %23 = arith.truncf %22 : vector<8x32xf32> to vector<8x32xbf16>
    %c0_7 = arith.constant 0 : index
    %c0_8 = arith.constant 0 : index
    %24 = vector.load %arg7[%c0_7, %c0_8] : memref<32x32xbf16, #tpu.memory_space<vmem>>, vector<32x32xbf16>
    %cst_9 = arith.constant dense<0.000000e+00> : vector<8x32xf32>
    %25 = tpu.matmul %23, %24, %cst_9 {dimension_numbers = #tpu.dot_dimension_numbers<[1], [0], [0], [1], [0, 0, 1, 1], [], []>} : vector<8x32xbf16>, vector<32x32xbf16>, vector<8x32xf32> -> vector<8x32xf32>
    %c0_10 = arith.constant 0 : index
    %c0_11 = arith.constant 0 : index
    %26 = vector.load %arg8[%c0_10, %c0_11] : memref<1x32xf32, #tpu.memory_space<vmem>>, vector<1x32xf32>
    %27 = vector.broadcast %26 : vector<1x32xf32> to vector<8x32xf32>
    %28 = arith.addf %25, %27 : vector<8x32xf32>
    %29 = arith.truncf %28 : vector<8x32xf32> to vector<8x32xbf16>
    %c0_12 = arith.constant 0 : index
    %c0_13 = arith.constant 0 : index
    %30 = vector.load %arg9[%c0_12, %c0_13] : memref<32x32xbf16, #tpu.memory_space<vmem>>, vector<32x32xbf16>
    %cst_14 = arith.constant dense<0.000000e+00> : vector<8x32xf32>
    %31 = tpu.matmul %23, %30, %cst_14 {dimension_numbers = #tpu.dot_dimension_numbers<[1], [0], [0], [1], [0, 0, 1, 1], [], []>} : vector<8x32xbf16>, vector<32x32xbf16>, vector<8x32xf32> -> vector<8x32xf32>
    %c0_15 = arith.constant 0 : index
    %c0_16 = arith.constant 0 : index
    %32 = vector.load %arg10[%c0_15, %c0_16] : memref<1x32xf32, #tpu.memory_space<vmem>>, vector<1x32xf32>
    %33 = vector.broadcast %32 : vector<1x32xf32> to vector<8x32xf32>
    %34 = arith.addf %31, %33 : vector<8x32xf32>
    %35 = arith.truncf %34 : vector<8x32xf32> to vector<8x32xbf16>
    %36 = vector.extract_strided_slice %29 {offsets = [0, 0], sizes = [8, 8], strides = [1, 1]} : vector<8x32xbf16> to vector<8x8xbf16>
    %37 = vector.extract_strided_slice %35 {offsets = [0, 0], sizes = [8, 8], strides = [1, 1]} : vector<8x32xbf16> to vector<8x8xbf16>
    %c0_17 = arith.constant 0 : index
    %c0_18 = arith.constant 0 : index
    %c0_19 = arith.constant 0 : index
    %38 = vector.load %arg18[%c0_17, %c0_18, %c0_19] : memref<4x8x8xbf16, #tpu.memory_space<vmem>>, vector<1x8x8xbf16>
    %39 = vector.shape_cast %38 : vector<1x8x8xbf16> to vector<8x8xbf16>
    %cst_20 = arith.constant dense<0.000000e+00> : vector<8x8xf32>
    %40 = tpu.matmul %39, %36, %cst_20 {dimension_numbers = #tpu.dot_dimension_numbers<[1], [1], [0], [0], [0, 0, 1, 0], [], []>} : vector<8x8xbf16>, vector<8x8xbf16>, vector<8x8xf32> -> vector<8x8xf32>
    %c0_21 = arith.constant 0 : index
    %c0_22 = arith.constant 0 : index
    %c0_23 = arith.constant 0 : index
    %41 = vector.load %arg20[%c0_21, %c0_22, %c0_23] : memref<4x8x1xf32, #tpu.memory_space<vmem>>, vector<1x8x1xf32>
    %42 = vector.shape_cast %41 : vector<1x8x1xf32> to vector<8x1xf32>
    %cst_24 = arith.constant dense<0xFF800000> : vector<8xf32>
    %43 = vector.multi_reduction <maximumf>, %40, %cst_24 [1] : vector<8x8xf32> to vector<8xf32>
    %44 = vector.shape_cast %43 : vector<8xf32> to vector<8x1xf32>
    %45 = arith.maximumf %42, %44 : vector<8x1xf32>
    %46 = arith.subf %42, %45 : vector<8x1xf32>
    %47 = math.exp %46 : vector<8x1xf32>
    %48 = vector.broadcast %45 : vector<8x1xf32> to vector<8x8xf32>
    %49 = arith.subf %40, %48 : vector<8x8xf32>
    %50 = math.exp %49 : vector<8x8xf32>
    %c0_25 = arith.constant 0 : index
    %c0_26 = arith.constant 0 : index
    %c0_27 = arith.constant 0 : index
    %51 = vector.load %arg21[%c0_25, %c0_26, %c0_27] : memref<4x8x1xf32, #tpu.memory_space<vmem>>, vector<1x8x1xf32>
    %52 = vector.shape_cast %51 : vector<1x8x1xf32> to vector<8x1xf32>
    %53 = arith.mulf %47, %52 : vector<8x1xf32>
    %cst_28 = arith.constant dense<0.000000e+00> : vector<8xf32>
    %54 = vector.multi_reduction <add>, %50, %cst_28 [1] : vector<8x8xf32> to vector<8xf32>
    %55 = vector.shape_cast %54 : vector<8xf32> to vector<8x1xf32>
    %56 = arith.addf %53, %55 : vector<8x1xf32>
    %c0_29 = arith.constant 0 : index
    %c0_30 = arith.constant 0 : index
    %c0_31 = arith.constant 0 : index
    %57 = vector.load %arg21[%c0_29, %c0_30, %c0_31] : memref<4x8x1xf32, #tpu.memory_space<vmem>>, vector<1x8x1xf32>
    %58 = vector.shape_cast %57 : vector<1x8x1xf32> to vector<8x1xf32>
    %59 = vector.shape_cast %56 : vector<8x1xf32> to vector<1x8x1xf32>
    tpu.vector_store %arg21[%c0_29, %c0_30, %c0_31], %59 {strides = array<i32>} : memref<4x8x1xf32, #tpu.memory_space<vmem>>, vector<1x8x1xf32>,
    %c0_32 = arith.constant 0 : index
    %c0_33 = arith.constant 0 : index
    %c0_34 = arith.constant 0 : index
    %60 = vector.load %arg19[%c0_32, %c0_33, %c0_34] : memref<4x8x8xf32, #tpu.memory_space<vmem>>, vector<1x8x8xf32>
    %61 = vector.shape_cast %60 : vector<1x8x8xf32> to vector<8x8xf32>
    %62 = vector.broadcast %47 : vector<8x1xf32> to vector<8x8xf32>
    %63 = arith.mulf %62, %61 : vector<8x8xf32>
    %64 = arith.truncf %50 : vector<8x8xf32> to vector<8x8xbf16>
    %cst_35 = arith.constant dense<0.000000e+00> : vector<8x8xf32>
    %65 = tpu.matmul %64, %37, %cst_35 {dimension_numbers = #tpu.dot_dimension_numbers<[1], [0], [0], [1], [0, 0, 1, 1], [], []>} : vector<8x8xbf16>, vector<8x8xbf16>, vector<8x8xf32> -> vector<8x8xf32>
    %66 = arith.addf %63, %65 : vector<8x8xf32>
    %c0_36 = arith.constant 0 : index
    %c0_37 = arith.constant 0 : index
    %c0_38 = arith.constant 0 : index
    %67 = vector.load %arg19[%c0_36, %c0_37, %c0_38] : memref<4x8x8xf32, #tpu.memory_space<vmem>>, vector<1x8x8xf32>
    %68 = vector.shape_cast %67 : vector<1x8x8xf32> to vector<8x8xf32>
    %69 = vector.shape_cast %66 : vector<8x8xf32> to vector<1x8x8xf32>
    tpu.vector_store %arg19[%c0_36, %c0_37, %c0_38], %69 {strides = array<i32>} : memref<4x8x8xf32, #tpu.memory_space<vmem>>, vector<1x8x8xf32>,
    %c0_39 = arith.constant 0 : index
    %c0_40 = arith.constant 0 : index
    %c0_41 = arith.constant 0 : index
    %70 = vector.load %arg20[%c0_39, %c0_40, %c0_41] : memref<4x8x1xf32, #tpu.memory_space<vmem>>, vector<1x8x1xf32>
    %71 = vector.shape_cast %70 : vector<1x8x1xf32> to vector<8x1xf32>
    %72 = vector.shape_cast %45 : vector<8x1xf32> to vector<1x8x1xf32>
    tpu.vector_store %arg20[%c0_39, %c0_40, %c0_41], %72 {strides = array<i32>} : memref<4x8x1xf32, #tpu.memory_space<vmem>>, vector<1x8x1xf32>,
    %73 = vector.extract_strided_slice %29 {offsets = [0, 8], sizes = [8, 8], strides = [1, 1]} : vector<8x32xbf16> to vector<8x8xbf16>
    %74 = vector.extract_strided_slice %35 {offsets = [0, 8], sizes = [8, 8], strides = [1, 1]} : vector<8x32xbf16> to vector<8x8xbf16>
    %c1 = arith.constant 1 : index
    %c0_42 = arith.constant 0 : index
    %c0_43 = arith.constant 0 : index
    %75 = vector.load %arg18[%c1, %c0_42, %c0_43] : memref<4x8x8xbf16, #tpu.memory_space<vmem>>, vector<1x8x8xbf16>
    %76 = vector.shape_cast %75 : vector<1x8x8xbf16> to vector<8x8xbf16>
    %cst_44 = arith.constant dense<0.000000e+00> : vector<8x8xf32>
    %77 = tpu.matmul %76, %73, %cst_44 {dimension_numbers = #tpu.dot_dimension_numbers<[1], [1], [0], [0], [0, 0, 1, 0], [], []>} : vector<8x8xbf16>, vector<8x8xbf16>, vector<8x8xf32> -> vector<8x8xf32>
    %c1_45 = arith.constant 1 : index
    %c0_46 = arith.constant 0 : index
    %c0_47 = arith.constant 0 : index
    %78 = vector.load %arg20[%c1_45, %c0_46, %c0_47] : memref<4x8x1xf32, #tpu.memory_space<vmem>>, vector<1x8x1xf32>
    %79 = vector.shape_cast %78 : vector<1x8x1xf32> to vector<8x1xf32>
    %cst_48 = arith.constant dense<0xFF800000> : vector<8xf32>
    %80 = vector.multi_reduction <maximumf>, %77, %cst_48 [1] : vector<8x8xf32> to vector<8xf32>
    %81 = vector.shape_cast %80 : vector<8xf32> to vector<8x1xf32>
    %82 = arith.maximumf %79, %81 : vector<8x1xf32>
    %83 = arith.subf %79, %82 : vector<8x1xf32>
    %84 = math.exp %83 : vector<8x1xf32>
    %85 = vector.broadcast %82 : vector<8x1xf32> to vector<8x8xf32>
    %86 = arith.subf %77, %85 : vector<8x8xf32>
    %87 = math.exp %86 : vector<8x8xf32>
    %c1_49 = arith.constant 1 : index
    %c0_50 = arith.constant 0 : index
    %c0_51 = arith.constant 0 : index
    %88 = vector.load %arg21[%c1_49, %c0_50, %c0_51] : memref<4x8x1xf32, #tpu.memory_space<vmem>>, vector<1x8x1xf32>
    %89 = vector.shape_cast %88 : vector<1x8x1xf32> to vector<8x1xf32>
    %90 = arith.mulf %84, %89 : vector<8x1xf32>
    %cst_52 = arith.constant dense<0.000000e+00> : vector<8xf32>
    %91 = vector.multi_reduction <add>, %87, %cst_52 [1] : vector<8x8xf32> to vector<8xf32>
    %92 = vector.shape_cast %91 : vector<8xf32> to vector<8x1xf32>
    %93 = arith.addf %90, %92 : vector<8x1xf32>
    %c1_53 = arith.constant 1 : index
    %c0_54 = arith.constant 0 : index
    %c0_55 = arith.constant 0 : index
    %94 = vector.load %arg21[%c1_53, %c0_54, %c0_55] : memref<4x8x1xf32, #tpu.memory_space<vmem>>, vector<1x8x1xf32>
    %95 = vector.shape_cast %94 : vector<1x8x1xf32> to vector<8x1xf32>
    %96 = vector.shape_cast %93 : vector<8x1xf32> to vector<1x8x1xf32>
    tpu.vector_store %arg21[%c1_53, %c0_54, %c0_55], %96 {strides = array<i32>} : memref<4x8x1xf32, #tpu.memory_space<vmem>>, vector<1x8x1xf32>,
    %c1_56 = arith.constant 1 : index
    %c0_57 = arith.constant 0 : index
    %c0_58 = arith.constant 0 : index
    %97 = vector.load %arg19[%c1_56, %c0_57, %c0_58] : memref<4x8x8xf32, #tpu.memory_space<vmem>>, vector<1x8x8xf32>
    %98 = vector.shape_cast %97 : vector<1x8x8xf32> to vector<8x8xf32>
    %99 = vector.broadcast %84 : vector<8x1xf32> to vector<8x8xf32>
    %100 = arith.mulf %99, %98 : vector<8x8xf32>
    %101 = arith.truncf %87 : vector<8x8xf32> to vector<8x8xbf16>
    %cst_59 = arith.constant dense<0.000000e+00> : vector<8x8xf32>
    %102 = tpu.matmul %101, %74, %cst_59 {dimension_numbers = #tpu.dot_dimension_numbers<[1], [0], [0], [1], [0, 0, 1, 1], [], []>} : vector<8x8xbf16>, vector<8x8xbf16>, vector<8x8xf32> -> vector<8x8xf32>
    %103 = arith.addf %100, %102 : vector<8x8xf32>
    %c1_60 = arith.constant 1 : index
    %c0_61 = arith.constant 0 : index
    %c0_62 = arith.constant 0 : index
    %104 = vector.load %arg19[%c1_60, %c0_61, %c0_62] : memref<4x8x8xf32, #tpu.memory_space<vmem>>, vector<1x8x8xf32>
    %105 = vector.shape_cast %104 : vector<1x8x8xf32> to vector<8x8xf32>
    %106 = vector.shape_cast %103 : vector<8x8xf32> to vector<1x8x8xf32>
    tpu.vector_store %arg19[%c1_60, %c0_61, %c0_62], %106 {strides = array<i32>} : memref<4x8x8xf32, #tpu.memory_space<vmem>>, vector<1x8x8xf32>,
    %c1_63 = arith.constant 1 : index
    %c0_64 = arith.constant 0 : index
    %c0_65 = arith.constant 0 : index
    %107 = vector.load %arg20[%c1_63, %c0_64, %c0_65] : memref<4x8x1xf32, #tpu.memory_space<vmem>>, vector<1x8x1xf32>
    %108 = vector.shape_cast %107 : vector<1x8x1xf32> to vector<8x1xf32>
    %109 = vector.shape_cast %82 : vector<8x1xf32> to vector<1x8x1xf32>
    tpu.vector_store %arg20[%c1_63, %c0_64, %c0_65], %109 {strides = array<i32>} : memref<4x8x1xf32, #tpu.memory_space<vmem>>, vector<1x8x1xf32>,
    %110 = vector.extract_strided_slice %29 {offsets = [0, 16], sizes = [8, 8], strides = [1, 1]} : vector<8x32xbf16> to vector<8x8xbf16>
    %111 = vector.extract_strided_slice %35 {offsets = [0, 16], sizes = [8, 8], strides = [1, 1]} : vector<8x32xbf16> to vector<8x8xbf16>
    %c2 = arith.constant 2 : index
    %c0_66 = arith.constant 0 : index
    %c0_67 = arith.constant 0 : index
    %112 = vector.load %arg18[%c2, %c0_66, %c0_67] : memref<4x8x8xbf16, #tpu.memory_space<vmem>>, vector<1x8x8xbf16>
    %113 = vector.shape_cast %112 : vector<1x8x8xbf16> to vector<8x8xbf16>
    %cst_68 = arith.constant dense<0.000000e+00> : vector<8x8xf32>
    %114 = tpu.matmul %113, %110, %cst_68 {dimension_numbers = #tpu.dot_dimension_numbers<[1], [1], [0], [0], [0, 0, 1, 0], [], []>} : vector<8x8xbf16>, vector<8x8xbf16>, vector<8x8xf32> -> vector<8x8xf32>
    %c2_69 = arith.constant 2 : index
    %c0_70 = arith.constant 0 : index
    %c0_71 = arith.constant 0 : index
    %115 = vector.load %arg20[%c2_69, %c0_70, %c0_71] : memref<4x8x1xf32, #tpu.memory_space<vmem>>, vector<1x8x1xf32>
    %116 = vector.shape_cast %115 : vector<1x8x1xf32> to vector<8x1xf32>
    %cst_72 = arith.constant dense<0xFF800000> : vector<8xf32>
    %117 = vector.multi_reduction <maximumf>, %114, %cst_72 [1] : vector<8x8xf32> to vector<8xf32>
    %118 = vector.shape_cast %117 : vector<8xf32> to vector<8x1xf32>
    %119 = arith.maximumf %116, %118 : vector<8x1xf32>
    %120 = arith.subf %116, %119 : vector<8x1xf32>
    %121 = math.exp %120 : vector<8x1xf32>
    %122 = vector.broadcast %119 : vector<8x1xf32> to vector<8x8xf32>
    %123 = arith.subf %114, %122 : vector<8x8xf32>
    %124 = math.exp %123 : vector<8x8xf32>
    %c2_73 = arith.constant 2 : index
    %c0_74 = arith.constant 0 : index
    %c0_75 = arith.constant 0 : index
    %125 = vector.load %arg21[%c2_73, %c0_74, %c0_75] : memref<4x8x1xf32, #tpu.memory_space<vmem>>, vector<1x8x1xf32>
    %126 = vector.shape_cast %125 : vector<1x8x1xf32> to vector<8x1xf32>
    %127 = arith.mulf %121, %126 : vector<8x1xf32>
    %cst_76 = arith.constant dense<0.000000e+00> : vector<8xf32>
    %128 = vector.multi_reduction <add>, %124, %cst_76 [1] : vector<8x8xf32> to vector<8xf32>
    %129 = vector.shape_cast %128 : vector<8xf32> to vector<8x1xf32>
    %130 = arith.addf %127, %129 : vector<8x1xf32>
    %c2_77 = arith.constant 2 : index
    %c0_78 = arith.constant 0 : index
    %c0_79 = arith.constant 0 : index
    %131 = vector.load %arg21[%c2_77, %c0_78, %c0_79] : memref<4x8x1xf32, #tpu.memory_space<vmem>>, vector<1x8x1xf32>
    %132 = vector.shape_cast %131 : vector<1x8x1xf32> to vector<8x1xf32>
    %133 = vector.shape_cast %130 : vector<8x1xf32> to vector<1x8x1xf32>
    tpu.vector_store %arg21[%c2_77, %c0_78, %c0_79], %133 {strides = array<i32>} : memref<4x8x1xf32, #tpu.memory_space<vmem>>, vector<1x8x1xf32>,
    %c2_80 = arith.constant 2 : index
    %c0_81 = arith.constant 0 : index
    %c0_82 = arith.constant 0 : index
    %134 = vector.load %arg19[%c2_80, %c0_81, %c0_82] : memref<4x8x8xf32, #tpu.memory_space<vmem>>, vector<1x8x8xf32>
    %135 = vector.shape_cast %134 : vector<1x8x8xf32> to vector<8x8xf32>
    %136 = vector.broadcast %121 : vector<8x1xf32> to vector<8x8xf32>
    %137 = arith.mulf %136, %135 : vector<8x8xf32>
    %138 = arith.truncf %124 : vector<8x8xf32> to vector<8x8xbf16>
    %cst_83 = arith.constant dense<0.000000e+00> : vector<8x8xf32>
    %139 = tpu.matmul %138, %111, %cst_83 {dimension_numbers = #tpu.dot_dimension_numbers<[1], [0], [0], [1], [0, 0, 1, 1], [], []>} : vector<8x8xbf16>, vector<8x8xbf16>, vector<8x8xf32> -> vector<8x8xf32>
    %140 = arith.addf %137, %139 : vector<8x8xf32>
    %c2_84 = arith.constant 2 : index
    %c0_85 = arith.constant 0 : index
    %c0_86 = arith.constant 0 : index
    %141 = vector.load %arg19[%c2_84, %c0_85, %c0_86] : memref<4x8x8xf32, #tpu.memory_space<vmem>>, vector<1x8x8xf32>
    %142 = vector.shape_cast %141 : vector<1x8x8xf32> to vector<8x8xf32>
    %143 = vector.shape_cast %140 : vector<8x8xf32> to vector<1x8x8xf32>
    tpu.vector_store %arg19[%c2_84, %c0_85, %c0_86], %143 {strides = array<i32>} : memref<4x8x8xf32, #tpu.memory_space<vmem>>, vector<1x8x8xf32>,
    %c2_87 = arith.constant 2 : index
    %c0_88 = arith.constant 0 : index
    %c0_89 = arith.constant 0 : index
    %144 = vector.load %arg20[%c2_87, %c0_88, %c0_89] : memref<4x8x1xf32, #tpu.memory_space<vmem>>, vector<1x8x1xf32>
    %145 = vector.shape_cast %144 : vector<1x8x1xf32> to vector<8x1xf32>
    %146 = vector.shape_cast %119 : vector<8x1xf32> to vector<1x8x1xf32>
    tpu.vector_store %arg20[%c2_87, %c0_88, %c0_89], %146 {strides = array<i32>} : memref<4x8x1xf32, #tpu.memory_space<vmem>>, vector<1x8x1xf32>,
    %147 = vector.extract_strided_slice %29 {offsets = [0, 24], sizes = [8, 8], strides = [1, 1]} : vector<8x32xbf16> to vector<8x8xbf16>
    %148 = vector.extract_strided_slice %35 {offsets = [0, 24], sizes = [8, 8], strides = [1, 1]} : vector<8x32xbf16> to vector<8x8xbf16>
    %c3 = arith.constant 3 : index
    %c0_90 = arith.constant 0 : index
    %c0_91 = arith.constant 0 : index
    %149 = vector.load %arg18[%c3, %c0_90, %c0_91] : memref<4x8x8xbf16, #tpu.memory_space<vmem>>, vector<1x8x8xbf16>
    %150 = vector.shape_cast %149 : vector<1x8x8xbf16> to vector<8x8xbf16>
    %cst_92 = arith.constant dense<0.000000e+00> : vector<8x8xf32>
    %151 = tpu.matmul %150, %147, %cst_92 {dimension_numbers = #tpu.dot_dimension_numbers<[1], [1], [0], [0], [0, 0, 1, 0], [], []>} : vector<8x8xbf16>, vector<8x8xbf16>, vector<8x8xf32> -> vector<8x8xf32>
    %c3_93 = arith.constant 3 : index
    %c0_94 = arith.constant 0 : index
    %c0_95 = arith.constant 0 : index
    %152 = vector.load %arg20[%c3_93, %c0_94, %c0_95] : memref<4x8x1xf32, #tpu.memory_space<vmem>>, vector<1x8x1xf32>
    %153 = vector.shape_cast %152 : vector<1x8x1xf32> to vector<8x1xf32>
    %cst_96 = arith.constant dense<0xFF800000> : vector<8xf32>
    %154 = vector.multi_reduction <maximumf>, %151, %cst_96 [1] : vector<8x8xf32> to vector<8xf32>
    %155 = vector.shape_cast %154 : vector<8xf32> to vector<8x1xf32>
    %156 = arith.maximumf %153, %155 : vector<8x1xf32>
    %157 = arith.subf %153, %156 : vector<8x1xf32>
    %158 = math.exp %157 : vector<8x1xf32>
    %159 = vector.broadcast %156 : vector<8x1xf32> to vector<8x8xf32>
    %160 = arith.subf %151, %159 : vector<8x8xf32>
    %161 = math.exp %160 : vector<8x8xf32>
    %c3_97 = arith.constant 3 : index
    %c0_98 = arith.constant 0 : index
    %c0_99 = arith.constant 0 : index
    %162 = vector.load %arg21[%c3_97, %c0_98, %c0_99] : memref<4x8x1xf32, #tpu.memory_space<vmem>>, vector<1x8x1xf32>
    %163 = vector.shape_cast %162 : vector<1x8x1xf32> to vector<8x1xf32>
    %164 = arith.mulf %158, %163 : vector<8x1xf32>
    %cst_100 = arith.constant dense<0.000000e+00> : vector<8xf32>
    %165 = vector.multi_reduction <add>, %161, %cst_100 [1] : vector<8x8xf32> to vector<8xf32>
    %166 = vector.shape_cast %165 : vector<8xf32> to vector<8x1xf32>
    %167 = arith.addf %164, %166 : vector<8x1xf32>
    %c3_101 = arith.constant 3 : index
    %c0_102 = arith.constant 0 : index
    %c0_103 = arith.constant 0 : index
    %168 = vector.load %arg21[%c3_101, %c0_102, %c0_103] : memref<4x8x1xf32, #tpu.memory_space<vmem>>, vector<1x8x1xf32>
    %169 = vector.shape_cast %168 : vector<1x8x1xf32> to vector<8x1xf32>
    %170 = vector.shape_cast %167 : vector<8x1xf32> to vector<1x8x1xf32>
    tpu.vector_store %arg21[%c3_101, %c0_102, %c0_103], %170 {strides = array<i32>} : memref<4x8x1xf32, #tpu.memory_space<vmem>>, vector<1x8x1xf32>,
    %c3_104 = arith.constant 3 : index
    %c0_105 = arith.constant 0 : index
    %c0_106 = arith.constant 0 : index
    %171 = vector.load %arg19[%c3_104, %c0_105, %c0_106] : memref<4x8x8xf32, #tpu.memory_space<vmem>>, vector<1x8x8xf32>
    %172 = vector.shape_cast %171 : vector<1x8x8xf32> to vector<8x8xf32>
    %173 = vector.broadcast %158 : vector<8x1xf32> to vector<8x8xf32>
    %174 = arith.mulf %173, %172 : vector<8x8xf32>
    %175 = arith.truncf %161 : vector<8x8xf32> to vector<8x8xbf16>
    %cst_107 = arith.constant dense<0.000000e+00> : vector<8x8xf32>
    %176 = tpu.matmul %175, %148, %cst_107 {dimension_numbers = #tpu.dot_dimension_numbers<[1], [0], [0], [1], [0, 0, 1, 1], [], []>} : vector<8x8xbf16>, vector<8x8xbf16>, vector<8x8xf32> -> vector<8x8xf32>
    %177 = arith.addf %174, %176 : vector<8x8xf32>
    %c3_108 = arith.constant 3 : index
    %c0_109 = arith.constant 0 : index
    %c0_110 = arith.constant 0 : index
    %178 = vector.load %arg19[%c3_108, %c0_109, %c0_110] : memref<4x8x8xf32, #tpu.memory_space<vmem>>, vector<1x8x8xf32>
    %179 = vector.shape_cast %178 : vector<1x8x8xf32> to vector<8x8xf32>
    %180 = vector.shape_cast %177 : vector<8x8xf32> to vector<1x8x8xf32>
    tpu.vector_store %arg19[%c3_108, %c0_109, %c0_110], %180 {strides = array<i32>} : memref<4x8x8xf32, #tpu.memory_space<vmem>>, vector<1x8x8xf32>,
    %c3_111 = arith.constant 3 : index
    %c0_112 = arith.constant 0 : index
    %c0_113 = arith.constant 0 : index
    %181 = vector.load %arg20[%c3_111, %c0_112, %c0_113] : memref<4x8x1xf32, #tpu.memory_space<vmem>>, vector<1x8x1xf32>
    %182 = vector.shape_cast %181 : vector<1x8x1xf32> to vector<8x1xf32>
    %183 = vector.shape_cast %156 : vector<8x1xf32> to vector<1x8x1xf32>
    tpu.vector_store %arg20[%c3_111, %c0_112, %c0_113], %183 {strides = array<i32>} : memref<4x8x1xf32, #tpu.memory_space<vmem>>, vector<1x8x1xf32>,
    %c1_i32 = arith.constant 1 : i32
    %184 = arith.cmpi eq, %arg2, %c1_i32 : i32
    %185 = arith.extui %184 : i1 to i32
    %c0_i32_114 = arith.constant 0 : i32
    %186 = arith.cmpi ne, %185, %c0_i32_114 : i32
    scf.if %186 {
      %c0_115 = arith.constant 0 : index
      %c0_116 = arith.constant 0 : index
      %c0_117 = arith.constant 0 : index
      %187 = vector.load %arg19[%c0_115, %c0_116, %c0_117] : memref<4x8x8xf32, #tpu.memory_space<vmem>>, vector<1x8x8xf32>
      %188 = vector.shape_cast %187 : vector<1x8x8xf32> to vector<8x8xf32>
      %c0_118 = arith.constant 0 : index
      %c0_119 = arith.constant 0 : index
      %c0_120 = arith.constant 0 : index
      %189 = vector.load %arg21[%c0_118, %c0_119, %c0_120] : memref<4x8x1xf32, #tpu.memory_space<vmem>>, vector<1x8x1xf32>
      %190 = vector.shape_cast %189 : vector<1x8x1xf32> to vector<8x1xf32>
      %191 = tpu.reciprocal %190 : vector<8x1xf32> -> vector<8x1xf32>
      %192 = vector.broadcast %191 : vector<8x1xf32> to vector<8x8xf32>
      %193 = arith.mulf %188, %192 : vector<8x8xf32>
      %c1_121 = arith.constant 1 : index
      %c0_122 = arith.constant 0 : index
      %c0_123 = arith.constant 0 : index
      %194 = vector.load %arg19[%c1_121, %c0_122, %c0_123] : memref<4x8x8xf32, #tpu.memory_space<vmem>>, vector<1x8x8xf32>
      %195 = vector.shape_cast %194 : vector<1x8x8xf32> to vector<8x8xf32>
      %c1_124 = arith.constant 1 : index
      %c0_125 = arith.constant 0 : index
      %c0_126 = arith.constant 0 : index
      %196 = vector.load %arg21[%c1_124, %c0_125, %c0_126] : memref<4x8x1xf32, #tpu.memory_space<vmem>>, vector<1x8x1xf32>
      %197 = vector.shape_cast %196 : vector<1x8x1xf32> to vector<8x1xf32>
      %198 = tpu.reciprocal %197 : vector<8x1xf32> -> vector<8x1xf32>
      %199 = vector.broadcast %198 : vector<8x1xf32> to vector<8x8xf32>
      %200 = arith.mulf %195, %199 : vector<8x8xf32>
      %c2_127 = arith.constant 2 : index
      %c0_128 = arith.constant 0 : index
      %c0_129 = arith.constant 0 : index
      %201 = vector.load %arg19[%c2_127, %c0_128, %c0_129] : memref<4x8x8xf32, #tpu.memory_space<vmem>>, vector<1x8x8xf32>
      %202 = vector.shape_cast %201 : vector<1x8x8xf32> to vector<8x8xf32>
      %c2_130 = arith.constant 2 : index
      %c0_131 = arith.constant 0 : index
      %c0_132 = arith.constant 0 : index
      %203 = vector.load %arg21[%c2_130, %c0_131, %c0_132] : memref<4x8x1xf32, #tpu.memory_space<vmem>>, vector<1x8x1xf32>
      %204 = vector.shape_cast %203 : vector<1x8x1xf32> to vector<8x1xf32>
      %205 = tpu.reciprocal %204 : vector<8x1xf32> -> vector<8x1xf32>
      %206 = vector.broadcast %205 : vector<8x1xf32> to vector<8x8xf32>
      %207 = arith.mulf %202, %206 : vector<8x8xf32>
      %c3_133 = arith.constant 3 : index
      %c0_134 = arith.constant 0 : index
      %c0_135 = arith.constant 0 : index
      %208 = vector.load %arg19[%c3_133, %c0_134, %c0_135] : memref<4x8x8xf32, #tpu.memory_space<vmem>>, vector<1x8x8xf32>
      %209 = vector.shape_cast %208 : vector<1x8x8xf32> to vector<8x8xf32>
      %c3_136 = arith.constant 3 : index
      %c0_137 = arith.constant 0 : index
      %c0_138 = arith.constant 0 : index
      %210 = vector.load %arg21[%c3_136, %c0_137, %c0_138] : memref<4x8x1xf32, #tpu.memory_space<vmem>>, vector<1x8x1xf32>
      %211 = vector.shape_cast %210 : vector<1x8x1xf32> to vector<8x1xf32>
      %212 = tpu.reciprocal %211 : vector<8x1xf32> -> vector<8x1xf32>
      %213 = vector.broadcast %212 : vector<8x1xf32> to vector<8x8xf32>
      %214 = arith.mulf %209, %213 : vector<8x8xf32>
      %215 = tpu.concatenate %193, %200, %207, %214 in 1 : vector<8x8xf32>, vector<8x8xf32>, vector<8x8xf32>, vector<8x8xf32> -> vector<8x32xf32>
      %216 = arith.truncf %215 : vector<8x32xf32> to vector<8x32xbf16>
      %c0_139 = arith.constant 0 : index
      %c0_140 = arith.constant 0 : index
      %217 = vector.load %arg11[%c0_139, %c0_140] : memref<32x32xbf16, #tpu.memory_space<vmem>>, vector<32x32xbf16>
      %cst_141 = arith.constant dense<0.000000e+00> : vector<8x32xf32>
      %218 = tpu.matmul %216, %217, %cst_141 {dimension_numbers = #tpu.dot_dimension_numbers<[1], [0], [0], [1], [0, 0, 1, 1], [], []>} : vector<8x32xbf16>, vector<32x32xbf16>, vector<8x32xf32> -> vector<8x32xf32>
      %c0_142 = arith.constant 0 : index
      %c0_143 = arith.constant 0 : index
      %219 = vector.load %arg12[%c0_142, %c0_143] : memref<1x32xf32, #tpu.memory_space<vmem>>, vector<1x32xf32>
      %220 = vector.broadcast %219 : vector<1x32xf32> to vector<8x32xf32>
      %221 = arith.addf %218, %220 : vector<8x32xf32>
      %c0_144 = arith.constant 0 : index
      %c0_145 = arith.constant 0 : index
      %c0_146 = arith.constant 0 : index
      %222 = vector.load %arg3[%c0_144, %c0_145, %c0_146] : memref<1x8x32xf32, #tpu.memory_space<vmem>>, vector<1x8x32xf32>
      %223 = vector.shape_cast %222 : vector<1x8x32xf32> to vector<8x32xf32>
      %224 = arith.addf %223, %221 : vector<8x32xf32>
      %cst_147 = arith.constant dense<0.000000e+00> : vector<8xf32>
      %225 = vector.multi_reduction <add>, %224, %cst_147 [1] : vector<8x32xf32> to vector<8xf32>
      %226 = vector.shape_cast %225 : vector<8xf32> to vector<8x1xf32>
      %cst_148 = arith.constant 3.200000e+01 : f32
      %227 = vector.broadcast %cst_148 : f32 to vector<8x1xf32>
      %228 = arith.divf %226, %227 : vector<8x1xf32>
      %229 = vector.broadcast %228 : vector<8x1xf32> to vector<8x32xf32>
      %230 = arith.subf %224, %229 : vector<8x32xf32>
      %231 = arith.mulf %230, %230 : vector<8x32xf32>
      %cst_149 = arith.constant dense<0.000000e+00> : vector<8xf32>
      %232 = vector.multi_reduction <add>, %231, %cst_149 [1] : vector<8x32xf32> to vector<8xf32>
      %233 = vector.shape_cast %232 : vector<8xf32> to vector<8x1xf32>
      %cst_150 = arith.constant 3.200000e+01 : f32
      %234 = vector.broadcast %cst_150 : f32 to vector<8x1xf32>
      %235 = arith.divf %233, %234 : vector<8x1xf32>
      %236 = vector.broadcast %228 : vector<8x1xf32> to vector<8x32xf32>
      %237 = arith.subf %224, %236 : vector<8x32xf32>
      %cst_151 = arith.constant 9.99999974E-6 : f32
      %238 = vector.broadcast %cst_151 : f32 to vector<8x1xf32>
      %239 = arith.addf %235, %238 : vector<8x1xf32>
      %240 = math.rsqrt %239 : vector<8x1xf32>
      %241 = vector.broadcast %240 : vector<8x1xf32> to vector<8x32xf32>
      %242 = arith.mulf %237, %241 : vector<8x32xf32>
      %243 = arith.truncf %242 : vector<8x32xf32> to vector<8x32xbf16>
      %cst_152 = arith.constant 0.000000e+00 : f32
      %244 = vector.broadcast %cst_152 : f32 to vector<8x32xf32>
      %c0_153 = arith.constant 0 : index
      %c0_154 = arith.constant 0 : index
      %245 = vector.load %arg22[%c0_153, %c0_154] : memref<8x32xf32, #tpu.memory_space<vmem>>, vector<8x32xf32>
      tpu.vector_store %arg22[%c0_153, %c0_154], %244 {strides = array<i32>} : memref<8x32xf32, #tpu.memory_space<vmem>>, vector<8x32xf32>,
      %c0_155 = arith.constant 0 : index
      %c0_156 = arith.constant 0 : index
      %246 = vector.load %arg13[%c0_155, %c0_156] : memref<32x128xbf16, #tpu.memory_space<vmem>>, vector<32x64xbf16>
      %cst_157 = arith.constant dense<0.000000e+00> : vector<8x64xf32>
      %247 = tpu.matmul %243, %246, %cst_157 {dimension_numbers = #tpu.dot_dimension_numbers<[1], [0], [0], [1], [0, 0, 1, 1], [], []>} : vector<8x32xbf16>, vector<32x64xbf16>, vector<8x64xf32> -> vector<8x64xf32>
      %c0_158 = arith.constant 0 : index
      %c0_159 = arith.constant 0 : index
      %248 = vector.load %arg14[%c0_158, %c0_159] : memref<1x128xf32, #tpu.memory_space<vmem>>, vector<1x64xf32>
      %249 = vector.broadcast %248 : vector<1x64xf32> to vector<8x64xf32>
      %250 = arith.addf %247, %249 : vector<8x64xf32>
      %cst_160 = arith.constant 0.000000e+00 : f32
      %251 = vector.broadcast %cst_160 : f32 to vector<8x64xf32>
      %252 = arith.maximumf %250, %251 : vector<8x64xf32>
      %c0_161 = arith.constant 0 : index
      %c0_162 = arith.constant 0 : index
      %253 = vector.load %arg22[%c0_161, %c0_162] : memref<8x32xf32, #tpu.memory_space<vmem>>, vector<8x32xf32>
      %254 = arith.truncf %252 : vector<8x64xf32> to vector<8x64xbf16>
      %c0_163 = arith.constant 0 : index
      %c0_164 = arith.constant 0 : index
      %255 = vector.load %arg15[%c0_163, %c0_164] : memref<128x32xbf16, #tpu.memory_space<vmem>>, vector<64x32xbf16>
      %cst_165 = arith.constant dense<0.000000e+00> : vector<8x32xf32>
      %256 = tpu.matmul %254, %255, %cst_165 {dimension_numbers = #tpu.dot_dimension_numbers<[1], [0], [0], [1], [0, 0, 1, 1], [], []>} : vector<8x64xbf16>, vector<64x32xbf16>, vector<8x32xf32> -> vector<8x32xf32>
      %257 = arith.addf %253, %256 : vector<8x32xf32>
      %c0_166 = arith.constant 0 : index
      %c0_167 = arith.constant 0 : index
      %258 = vector.load %arg22[%c0_166, %c0_167] : memref<8x32xf32, #tpu.memory_space<vmem>>, vector<8x32xf32>
      tpu.vector_store %arg22[%c0_166, %c0_167], %257 {strides = array<i32>} : memref<8x32xf32, #tpu.memory_space<vmem>>, vector<8x32xf32>,
      %c0_168 = arith.constant 0 : index
      %c64 = arith.constant 64 : index
      %259 = vector.load %arg13[%c0_168, %c64] : memref<32x128xbf16, #tpu.memory_space<vmem>>, vector<32x64xbf16>
      %cst_169 = arith.constant dense<0.000000e+00> : vector<8x64xf32>
      %260 = tpu.matmul %243, %259, %cst_169 {dimension_numbers = #tpu.dot_dimension_numbers<[1], [0], [0], [1], [0, 0, 1, 1], [], []>} : vector<8x32xbf16>, vector<32x64xbf16>, vector<8x64xf32> -> vector<8x64xf32>
      %c0_170 = arith.constant 0 : index
      %c64_171 = arith.constant 64 : index
      %261 = vector.load %arg14[%c0_170, %c64_171] : memref<1x128xf32, #tpu.memory_space<vmem>>, vector<1x64xf32>
      %262 = vector.broadcast %261 : vector<1x64xf32> to vector<8x64xf32>
      %263 = arith.addf %260, %262 : vector<8x64xf32>
      %cst_172 = arith.constant 0.000000e+00 : f32
      %264 = vector.broadcast %cst_172 : f32 to vector<8x64xf32>
      %265 = arith.maximumf %263, %264 : vector<8x64xf32>
      %c0_173 = arith.constant 0 : index
      %c0_174 = arith.constant 0 : index
      %266 = vector.load %arg22[%c0_173, %c0_174] : memref<8x32xf32, #tpu.memory_space<vmem>>, vector<8x32xf32>
      %267 = arith.truncf %265 : vector<8x64xf32> to vector<8x64xbf16>
      %c64_175 = arith.constant 64 : index
      %c0_176 = arith.constant 0 : index
      %268 = vector.load %arg15[%c64_175, %c0_176] : memref<128x32xbf16, #tpu.memory_space<vmem>>, vector<64x32xbf16>
      %cst_177 = arith.constant dense<0.000000e+00> : vector<8x32xf32>
      %269 = tpu.matmul %267, %268, %cst_177 {dimension_numbers = #tpu.dot_dimension_numbers<[1], [0], [0], [1], [0, 0, 1, 1], [], []>} : vector<8x64xbf16>, vector<64x32xbf16>, vector<8x32xf32> -> vector<8x32xf32>
      %270 = arith.addf %266, %269 : vector<8x32xf32>
      %c0_178 = arith.constant 0 : index
      %c0_179 = arith.constant 0 : index
      %271 = vector.load %arg22[%c0_178, %c0_179] : memref<8x32xf32, #tpu.memory_space<vmem>>, vector<8x32xf32>
      tpu.vector_store %arg22[%c0_178, %c0_179], %270 {strides = array<i32>} : memref<8x32xf32, #tpu.memory_space<vmem>>, vector<8x32xf32>,
      %c0_180 = arith.constant 0 : index
      %c0_181 = arith.constant 0 : index
      %272 = vector.load %arg22[%c0_180, %c0_181] : memref<8x32xf32, #tpu.memory_space<vmem>>, vector<8x32xf32>
      %273 = arith.addf %224, %272 : vector<8x32xf32>
      %c0_182 = arith.constant 0 : index
      %c0_183 = arith.constant 0 : index
      %274 = vector.load %arg16[%c0_182, %c0_183] : memref<1x32xf32, #tpu.memory_space<vmem>>, vector<1x32xf32>
      %275 = vector.broadcast %274 : vector<1x32xf32> to vector<8x32xf32>
      %276 = arith.addf %273, %275 : vector<8x32xf32>
      %c0_184 = arith.constant 0 : index
      %c0_185 = arith.constant 0 : index
      %c0_186 = arith.constant 0 : index
      %277 = vector.load %arg17[%c0_184, %c0_185, %c0_186] : memref<1x8x32xf32, #tpu.memory_space<vmem>>, vector<1x8x32xf32>
      %278 = vector.shape_cast %277 : vector<1x8x32xf32> to vector<8x32xf32>
      %279 = vector.shape_cast %276 : vector<8x32xf32> to vector<1x8x32xf32>
      tpu.vector_store %arg17[%c0_184, %c0_185, %c0_186], %279 {strides = array<i32>} : memref<1x8x32xf32, #tpu.memory_space<vmem>>, vector<1x8x32xf32>,
    } else {
    }
    return
  }
  func.func @transform_0(%arg0: i32, %arg1: i32, %arg2: i32) -> (i32, i32, i32) {
    %c0_i32 = arith.constant 0 : i32
    %c0_i32_0 = arith.constant 0 : i32
    return %arg0, %arg1, %c0_i32 : i32, i32, i32
  }
  func.func @transform_1(%arg0: i32, %arg1: i32, %arg2: i32) -> (i32, i32, i32) {
    %c0_i32 = arith.constant 0 : i32
    %c0_i32_0 = arith.constant 0 : i32
    return %arg0, %arg2, %c0_i32 : i32, i32, i32
  }
  func.func @transform_2(%arg0: i32, %arg1: i32, %arg2: i32) -> (i32, i32) {
    %c0_i32 = arith.constant 0 : i32
    %c0_i32_0 = arith.constant 0 : i32
    %c0_i32_1 = arith.constant 0 : i32
    return %c0_i32, %c0_i32_0 : i32, i32
  }
  func.func @transform_3(%arg0: i32, %arg1: i32, %arg2: i32) -> (i32, i32) {
    %c0_i32 = arith.constant 0 : i32
    %c0_i32_0 = arith.constant 0 : i32
    %c0_i32_1 = arith.constant 0 : i32
    return %c0_i32, %c0_i32_0 : i32, i32
  }
  func.func @transform_4(%arg0: i32, %arg1: i32, %arg2: i32) -> (i32, i32) {
    %c0_i32 = arith.constant 0 : i32
    %c0_i32_0 = arith.constant 0 : i32
    %c0_i32_1 = arith.constant 0 : i32
    return %c0_i32, %c0_i32_0 : i32, i32
  }
  func.func @transform_5(%arg0: i32, %arg1: i32, %arg2: i32) -> (i32, i32) {
    %c0_i32 = arith.constant 0 : i32
    %c0_i32_0 = arith.constant 0 : i32
    %c0_i32_1 = arith.constant 0 : i32
    return %c0_i32, %c0_i32_0 : i32, i32
  }
  func.func @transform_6(%arg0: i32, %arg1: i32, %arg2: i32) -> (i32, i32) {
    %c0_i32 = arith.constant 0 : i32
    %c0_i32_0 = arith.constant 0 : i32
    %c0_i32_1 = arith.constant 0 : i32
    return %c0_i32, %c0_i32_0 : i32, i32
  }
  func.func @transform_7(%arg0: i32, %arg1: i32, %arg2: i32) -> (i32, i32) {
    %c0_i32 = arith.constant 0 : i32
    %c0_i32_0 = arith.constant 0 : i32
    %c0_i32_1 = arith.constant 0 : i32
    return %c0_i32, %c0_i32_0 : i32, i32
  }
  func.func @transform_8(%arg0: i32, %arg1: i32, %arg2: i32) -> (i32, i32) {
    %c0_i32 = arith.constant 0 : i32
    %c0_i32_0 = arith.constant 0 : i32
    %c0_i32_1 = arith.constant 0 : i32
    return %c0_i32, %c0_i32_0 : i32, i32
  }
  func.func @transform_9(%arg0: i32, %arg1: i32, %arg2: i32) -> (i32, i32) {
    %c0_i32 = arith.constant 0 : i32
    %c0_i32_0 = arith.constant 0 : i32
    %c0_i32_1 = arith.constant 0 : i32
    return %c0_i32, %c0_i32_0 : i32, i32
  }
  func.func @transform_10(%arg0: i32, %arg1: i32, %arg2: i32) -> (i32, i32) {
    %c0_i32 = arith.constant 0 : i32
    %c0_i32_0 = arith.constant 0 : i32
    %c0_i32_1 = arith.constant 0 : i32
    return %c0_i32, %c0_i32_0 : i32, i32
  }
  func.func @transform_11(%arg0: i32, %arg1: i32, %arg2: i32) -> (i32, i32) {
    %c0_i32 = arith.constant 0 : i32
    %c0_i32_0 = arith.constant 0 : i32
    %c0_i32_1 = arith.constant 0 : i32
    return %c0_i32, %c0_i32_0 : i32, i32
  }
  func.func @transform_12(%arg0: i32, %arg1: i32, %arg2: i32) -> (i32, i32) {
    %c0_i32 = arith.constant 0 : i32
    %c0_i32_0 = arith.constant 0 : i32
    %c0_i32_1 = arith.constant 0 : i32
    return %c0_i32, %c0_i32_0 : i32, i32
  }
  func.func @transform_13(%arg0: i32, %arg1: i32, %arg2: i32) -> (i32, i32) {
    %c0_i32 = arith.constant 0 : i32
    %c0_i32_0 = arith.constant 0 : i32
    %c0_i32_1 = arith.constant 0 : i32
    return %c0_i32, %c0_i32_0 : i32, i32
  }
  func.func @transform_14(%arg0: i32, %arg1: i32, %arg2: i32) -> (i32, i32, i32) {
    %c0_i32 = arith.constant 0 : i32
    %c0_i32_0 = arith.constant 0 : i32
    return %arg0, %arg1, %c0_i32 : i32, i32, i32
  }
}

module attributes {stable_mosaic.version = 11 : i64} {
  func.func @_encoder_layer_kernel(%arg0: i32, %arg1: i32, %arg2: i32, %arg3: memref<1x8x32xf32, #tpu.memory_space<vmem>>, %arg4: memref<1x8x32xf32, #tpu.memory_space<vmem>>, %arg5: memref<32x32xbf16, #tpu.memory_space<vmem>>, %arg6: memref<1x32xf32, #tpu.memory_space<vmem>>, %arg7: memref<32x32xbf16, #tpu.memory_space<vmem>>, %arg8: memref<1x32xf32, #tpu.memory_space<vmem>>, %arg9: memref<32x32xbf16, #tpu.memory_space<vmem>>, %arg10: memref<1x32xf32, #tpu.memory_space<vmem>>, %arg11: memref<32x32xbf16, #tpu.memory_space<vmem>>, %arg12: memref<1x32xf32, #tpu.memory_space<vmem>>, %arg13: memref<32x128xbf16, #tpu.memory_space<vmem>>, %arg14: memref<1x128xf32, #tpu.memory_space<vmem>>, %arg15: memref<128x32xbf16, #tpu.memory_space<vmem>>, %arg16: memref<1x32xf32, #tpu.memory_space<vmem>>, %arg17: memref<1x8x32xf32, #tpu.memory_space<vmem>>, %arg18: memref<4x8x8xbf16, #tpu.memory_space<vmem>>, %arg19: memref<4x8x8xf32, #tpu.memory_space<vmem>>, %arg20: memref<4x8x1xf32, #tpu.memory_space<vmem>>, %arg21: memref<4x8x1xf32, #tpu.memory_space<vmem>>, %arg22: memref<8x32xf32, #tpu.memory_space<vmem>>) attributes {dimension_semantics = [#tpu.dimension_semantics<parallel>, #tpu.dimension_semantics<parallel>, #tpu.dimension_semantics<arbitrary>], iteration_bounds = array<i64: 2, 2, 2>, scalar_prefetch = 0 : i64, scratch_operands = 5 : i64, tpu.core_type = #tpu.core_type<tc>, window_params = [{transform_indices = @transform_0, window_bounds = array<i64: 1, 8, 32>}, {transform_indices = @transform_1, window_bounds = array<i64: 1, 8, 32>}, {pipeline_mode = #tpu.pipeline_mode<synchronous>, transform_indices = @transform_2, window_bounds = array<i64: 32, 32>}, {pipeline_mode = #tpu.pipeline_mode<synchronous>, transform_indices = @transform_3, window_bounds = array<i64: 1, 32>}, {pipeline_mode = #tpu.pipeline_mode<synchronous>, transform_indices = @transform_4, window_bounds = array<i64: 32, 32>}, {pipeline_mode = #tpu.pipeline_mode<synchronous>, transform_indices = @transform_5, window_bounds = array<i64: 1, 32>}, {pipeline_mode = #tpu.pipeline_mode<synchronous>, transform_indices = @transform_6, window_bounds = array<i64: 32, 32>}, {pipeline_mode = #tpu.pipeline_mode<synchronous>, transform_indices = @transform_7, window_bounds = array<i64: 1, 32>}, {pipeline_mode = #tpu.pipeline_mode<synchronous>, transform_indices = @transform_8, window_bounds = array<i64: 32, 32>}, {pipeline_mode = #tpu.pipeline_mode<synchronous>, transform_indices = @transform_9, window_bounds = array<i64: 1, 32>}, {pipeline_mode = #tpu.pipeline_mode<synchronous>, transform_indices = @transform_10, window_bounds = array<i64: 32, 128>}, {pipeline_mode = #tpu.pipeline_mode<synchronous>, transform_indices = @transform_11, window_bounds = array<i64: 1, 128>}, {pipeline_mode = #tpu.pipeline_mode<synchronous>, transform_indices = @transform_12, window_bounds = array<i64: 128, 32>}, {pipeline_mode = #tpu.pipeline_mode<synchronous>, transform_indices = @transform_13, window_bounds = array<i64: 1, 32>}, {transform_indices = @transform_14, window_bounds = array<i64: 1, 8, 32>}]} {
    %c0_i32 = arith.constant 0 : i32
    %0 = arith.cmpi eq, %arg2, %c0_i32 : i32
    %1 = arith.extui %0 : i1 to i32
    %c0_i32_0 = arith.constant 0 : i32
    %2 = arith.cmpi ne, %1, %c0_i32_0 : i32
    scf.if %2 {
      %c0_115 = arith.constant 0 : index
      %c0_116 = arith.constant 0 : index
      %c0_117 = arith.constant 0 : index
      %187 = vector.load %arg3[%c0_115, %c0_116, %c0_117] : memref<1x8x32xf32, #tpu.memory_space<vmem>>, vector<1x8x32xf32>
      %188 = vector.shape_cast %187 : vector<1x8x32xf32> to vector<8x32xf32>
      %cst_118 = arith.constant dense<0.000000e+00> : vector<8xf32>
      %189 = vector.multi_reduction <add>, %188, %cst_118 [1] : vector<8x32xf32> to vector<8xf32>
      %190 = vector.shape_cast %189 : vector<8xf32> to vector<8x1xf32>
      %cst_119 = arith.constant 3.200000e+01 : f32
      %191 = vector.broadcast %cst_119 : f32 to vector<8x1xf32>
      %192 = arith.divf %190, %191 : vector<8x1xf32>
      %193 = vector.broadcast %192 : vector<8x1xf32> to vector<8x32xf32>
      %194 = arith.subf %188, %193 : vector<8x32xf32>
      %195 = arith.mulf %194, %194 : vector<8x32xf32>
      %cst_120 = arith.constant dense<0.000000e+00> : vector<8xf32>
      %196 = vector.multi_reduction <add>, %195, %cst_120 [1] : vector<8x32xf32> to vector<8xf32>
      %197 = vector.shape_cast %196 : vector<8xf32> to vector<8x1xf32>
      %cst_121 = arith.constant 3.200000e+01 : f32
      %198 = vector.broadcast %cst_121 : f32 to vector<8x1xf32>
      %199 = arith.divf %197, %198 : vector<8x1xf32>
      %200 = vector.broadcast %192 : vector<8x1xf32> to vector<8x32xf32>
      %201 = arith.subf %188, %200 : vector<8x32xf32>
      %cst_122 = arith.constant 9.99999974E-6 : f32
      %202 = vector.broadcast %cst_122 : f32 to vector<8x1xf32>
      %203 = arith.addf %199, %202 : vector<8x1xf32>
      %204 = math.rsqrt %203 : vector<8x1xf32>
      %205 = vector.broadcast %204 : vector<8x1xf32> to vector<8x32xf32>
      %206 = arith.mulf %201, %205 : vector<8x32xf32>
      %207 = arith.truncf %206 : vector<8x32xf32> to vector<8x32xbf16>
      %c0_123 = arith.constant 0 : index
      %c0_124 = arith.constant 0 : index
      %208 = vector.load %arg5[%c0_123, %c0_124] : memref<32x32xbf16, #tpu.memory_space<vmem>>, vector<32x32xbf16>
      %cst_125 = arith.constant dense<0.000000e+00> : vector<8x32xf32>
      %209 = tpu.matmul %207, %208, %cst_125 {dimension_numbers = #tpu.dot_dimension_numbers<[1], [0], [0], [1], [0, 0, 1, 1], [], []>} : vector<8x32xbf16>, vector<32x32xbf16>, vector<8x32xf32> -> vector<8x32xf32>
      %c0_126 = arith.constant 0 : index
      %c0_127 = arith.constant 0 : index
      %210 = vector.load %arg6[%c0_126, %c0_127] : memref<1x32xf32, #tpu.memory_space<vmem>>, vector<1x32xf32>
      %211 = vector.broadcast %210 : vector<1x32xf32> to vector<8x32xf32>
      %212 = arith.addf %209, %211 : vector<8x32xf32>
      %cst_128 = arith.constant 0.353553385 : f32
      %213 = vector.broadcast %cst_128 : f32 to vector<8x32xf32>
      %214 = arith.mulf %212, %213 : vector<8x32xf32>
      %215 = arith.truncf %214 : vector<8x32xf32> to vector<8x32xbf16>
      %216 = vector.extract_strided_slice %215 {offsets = [0, 0], sizes = [8, 8], strides = [1, 1]} : vector<8x32xbf16> to vector<8x8xbf16>
      %c0_129 = arith.constant 0 : index
      %c0_130 = arith.constant 0 : index
      %c0_131 = arith.constant 0 : index
      %217 = vector.load %arg18[%c0_129, %c0_130, %c0_131] : memref<4x8x8xbf16, #tpu.memory_space<vmem>>, vector<1x8x8xbf16>
      %218 = vector.shape_cast %217 : vector<1x8x8xbf16> to vector<8x8xbf16>
      %219 = vector.shape_cast %216 : vector<8x8xbf16> to vector<1x8x8xbf16>
      tpu.vector_store %arg18[%c0_129, %c0_130, %c0_131], %219 {strides = array<i32>} : memref<4x8x8xbf16, #tpu.memory_space<vmem>>, vector<1x8x8xbf16>,
      %220 = vector.extract_strided_slice %215 {offsets = [0, 8], sizes = [8, 8], strides = [1, 1]} : vector<8x32xbf16> to vector<8x8xbf16>
      %c1_132 = arith.constant 1 : index
      %c0_133 = arith.constant 0 : index
      %c0_134 = arith.constant 0 : index
      %221 = vector.load %arg18[%c1_132, %c0_133, %c0_134] : memref<4x8x8xbf16, #tpu.memory_space<vmem>>, vector<1x8x8xbf16>
      %222 = vector.shape_cast %221 : vector<1x8x8xbf16> to vector<8x8xbf16>
      %223 = vector.shape_cast %220 : vector<8x8xbf16> to vector<1x8x8xbf16>
      tpu.vector_store %arg18[%c1_132, %c0_133, %c0_134], %223 {strides = array<i32>} : memref<4x8x8xbf16, #tpu.memory_space<vmem>>, vector<1x8x8xbf16>,
      %224 = vector.extract_strided_slice %215 {offsets = [0, 16], sizes = [8, 8], strides = [1, 1]} : vector<8x32xbf16> to vector<8x8xbf16>
      %c2_135 = arith.constant 2 : index
      %c0_136 = arith.constant 0 : index
      %c0_137 = arith.constant 0 : index
      %225 = vector.load %arg18[%c2_135, %c0_136, %c0_137] : memref<4x8x8xbf16, #tpu.memory_space<vmem>>, vector<1x8x8xbf16>
      %226 = vector.shape_cast %225 : vector<1x8x8xbf16> to vector<8x8xbf16>
      %227 = vector.shape_cast %224 : vector<8x8xbf16> to vector<1x8x8xbf16>
      tpu.vector_store %arg18[%c2_135, %c0_136, %c0_137], %227 {strides = array<i32>} : memref<4x8x8xbf16, #tpu.memory_space<vmem>>, vector<1x8x8xbf16>,
      %228 = vector.extract_strided_slice %215 {offsets = [0, 24], sizes = [8, 8], strides = [1, 1]} : vector<8x32xbf16> to vector<8x8xbf16>
      %c3_138 = arith.constant 3 : index
      %c0_139 = arith.constant 0 : index
      %c0_140 = arith.constant 0 : index
      %229 = vector.load %arg18[%c3_138, %c0_139, %c0_140] : memref<4x8x8xbf16, #tpu.memory_space<vmem>>, vector<1x8x8xbf16>
      %230 = vector.shape_cast %229 : vector<1x8x8xbf16> to vector<8x8xbf16>
      %231 = vector.shape_cast %228 : vector<8x8xbf16> to vector<1x8x8xbf16>
      tpu.vector_store %arg18[%c3_138, %c0_139, %c0_140], %231 {strides = array<i32>} : memref<4x8x8xbf16, #tpu.memory_space<vmem>>, vector<1x8x8xbf16>,
      %cst_141 = arith.constant 0xFF800000 : f32
      %232 = vector.broadcast %cst_141 : f32 to vector<4x8x1xf32>
      %c0_142 = arith.constant 0 : index
      %c0_143 = arith.constant 0 : index
      %c0_144 = arith.constant 0 : index
      %233 = vector.load %arg20[%c0_142, %c0_143, %c0_144] : memref<4x8x1xf32, #tpu.memory_space<vmem>>, vector<4x8x1xf32>
      tpu.vector_store %arg20[%c0_142, %c0_143, %c0_144], %232 {strides = array<i32>} : memref<4x8x1xf32, #tpu.memory_space<vmem>>, vector<4x8x1xf32>,
      %cst_145 = arith.constant 0.000000e+00 : f32
      %234 = vector.broadcast %cst_145 : f32 to vector<4x8x1xf32>
      %c0_146 = arith.constant 0 : index
      %c0_147 = arith.constant 0 : index
      %c0_148 = arith.constant 0 : index
      %235 = vector.load %arg21[%c0_146, %c0_147, %c0_148] : memref<4x8x1xf32, #tpu.memory_space<vmem>>, vector<4x8x1xf32>
      tpu.vector_store %arg21[%c0_146, %c0_147, %c0_148], %234 {strides = array<i32>} : memref<4x8x1xf32, #tpu.memory_space<vmem>>, vector<4x8x1xf32>,
      %cst_149 = arith.constant 0.000000e+00 : f32
      %236 = vector.broadcast %cst_149 : f32 to vector<4x8x8xf32>
      %c0_150 = arith.constant 0 : index
      %c0_151 = arith.constant 0 : index
      %c0_152 = arith.constant 0 : index
      %237 = vector.load %arg19[%c0_150, %c0_151, %c0_152] : memref<4x8x8xf32, #tpu.memory_space<vmem>>, vector<4x8x8xf32>
      tpu.vector_store %arg19[%c0_150, %c0_151, %c0_152], %236 {strides = array<i32>} : memref<4x8x8xf32, #tpu.memory_space<vmem>>, vector<4x8x8xf32>,
    } else {
    }
    %c0 = arith.constant 0 : index
    %c0_1 = arith.constant 0 : index
    %c0_2 = arith.constant 0 : index
    %3 = vector.load %arg4[%c0, %c0_1, %c0_2] : memref<1x8x32xf32, #tpu.memory_space<vmem>>, vector<1x8x32xf32>
    %4 = vector.shape_cast %3 : vector<1x8x32xf32> to vector<8x32xf32>
    %cst = arith.constant dense<0.000000e+00> : vector<8xf32>
    %5 = vector.multi_reduction <add>, %4, %cst [1] : vector<8x32xf32> to vector<8xf32>
    %6 = vector.shape_cast %5 : vector<8xf32> to vector<8x1xf32>
    %cst_3 = arith.constant 3.200000e+01 : f32
    %7 = vector.broadcast %cst_3 : f32 to vector<8x1xf32>
    %8 = arith.divf %6, %7 : vector<8x1xf32>
    %9 = vector.broadcast %8 : vector<8x1xf32> to vector<8x32xf32>
    %10 = arith.subf %4, %9 : vector<8x32xf32>
    %11 = arith.mulf %10, %10 : vector<8x32xf32>
    %cst_4 = arith.constant dense<0.000000e+00> : vector<8xf32>
    %12 = vector.multi_reduction <add>, %11, %cst_4 [1] : vector<8x32xf32> to vector<8xf32>
    %13 = vector.shape_cast %12 : vector<8xf32> to vector<8x1xf32>
    %cst_5 = arith.constant 3.200000e+01 : f32
    %14 = vector.broadcast %cst_5 : f32 to vector<8x1xf32>
    %15 = arith.divf %13, %14 : vector<8x1xf32>
    %16 = vector.broadcast %8 : vector<8x1xf32> to vector<8x32xf32>
    %17 = arith.subf %4, %16 : vector<8x32xf32>
    %cst_6 = arith.constant 9.99999974E-6 : f32
    %18 = vector.broadcast %cst_6 : f32 to vector<8x1xf32>
    %19 = arith.addf %15, %18 : vector<8x1xf32>
    %20 = math.rsqrt %19 : vector<8x1xf32>
    %21 = vector.broadcast %20 : vector<8x1xf32> to vector<8x32xf32>
    %22 = arith.mulf %17, %21 : vector<8x32xf32>
    %23 = arith.truncf %22 : vector<8x32xf32> to vector<8x32xbf16>
    %c0_7 = arith.constant 0 : index
    %c0_8 = arith.constant 0 : index
    %24 = vector.load %arg7[%c0_7, %c0_8] : memref<32x32xbf16, #tpu.memory_space<vmem>>, vector<32x32xbf16>
    %cst_9 = arith.constant dense<0.000000e+00> : vector<8x32xf32>
    %25 = tpu.matmul %23, %24, %cst_9 {dimension_numbers = #tpu.dot_dimension_numbers<[1], [0], [0], [1], [0, 0, 1, 1], [], []>} : vector<8x32xbf16>, vector<32x32xbf16>, vector<8x32xf32> -> vector<8x32xf32>
    %c0_10 = arith.constant 0 : index
    %c0_11 = arith.constant 0 : index
    %26 = vector.load %arg8[%c0_10, %c0_11] : memref<1x32xf32, #tpu.memory_space<vmem>>, vector<1x32xf32>
    %27 = vector.broadcast %26 : vector<1x32xf32> to vector<8x32xf32>
    %28 = arith.addf %25, %27 : vector<8x32xf32>
    %29 = arith.truncf %28 : vector<8x32xf32> to vector<8x32xbf16>
    %c0_12 = arith.constant 0 : index
    %c0_13 = arith.constant 0 : index
    %30 = vector.load %arg9[%c0_12, %c0_13] : memref<32x32xbf16, #tpu.memory_space<vmem>>, vector<32x32xbf16>
    %cst_14 = arith.constant dense<0.000000e+00> : vector<8x32xf32>
    %31 = tpu.matmul %23, %30, %cst_14 {dimension_numbers = #tpu.dot_dimension_numbers<[1], [0], [0], [1], [0, 0, 1, 1], [], []>} : vector<8x32xbf16>, vector<32x32xbf16>, vector<8x32xf32> -> vector<8x32xf32>
    %c0_15 = arith.constant 0 : index
    %c0_16 = arith.constant 0 : index
    %32 = vector.load %arg10[%c0_15, %c0_16] : memref<1x32xf32, #tpu.memory_space<vmem>>, vector<1x32xf32>
    %33 = vector.broadcast %32 : vector<1x32xf32> to vector<8x32xf32>
    %34 = arith.addf %31, %33 : vector<8x32xf32>
    %35 = arith.truncf %34 : vector<8x32xf32> to vector<8x32xbf16>
    %36 = vector.extract_strided_slice %29 {offsets = [0, 0], sizes = [8, 8], strides = [1, 1]} : vector<8x32xbf16> to vector<8x8xbf16>
    %37 = vector.extract_strided_slice %35 {offsets = [0, 0], sizes = [8, 8], strides = [1, 1]} : vector<8x32xbf16> to vector<8x8xbf16>
    %c0_17 = arith.constant 0 : index
    %c0_18 = arith.constant 0 : index
    %c0_19 = arith.constant 0 : index
    %38 = vector.load %arg18[%c0_17, %c0_18, %c0_19] : memref<4x8x8xbf16, #tpu.memory_space<vmem>>, vector<1x8x8xbf16>
    %39 = vector.shape_cast %38 : vector<1x8x8xbf16> to vector<8x8xbf16>
    %cst_20 = arith.constant dense<0.000000e+00> : vector<8x8xf32>
    %40 = tpu.matmul %39, %36, %cst_20 {dimension_numbers = #tpu.dot_dimension_numbers<[1], [1], [0], [0], [0, 0, 1, 0], [], []>} : vector<8x8xbf16>, vector<8x8xbf16>, vector<8x8xf32> -> vector<8x8xf32>
    %c0_21 = arith.constant 0 : index
    %c0_22 = arith.constant 0 : index
    %c0_23 = arith.constant 0 : index
    %41 = vector.load %arg20[%c0_21, %c0_22, %c0_23] : memref<4x8x1xf32, #tpu.memory_space<vmem>>, vector<1x8x1xf32>
    %42 = vector.shape_cast %41 : vector<1x8x1xf32> to vector<8x1xf32>
    %cst_24 = arith.constant dense<0xFF800000> : vector<8xf32>
    %43 = vector.multi_reduction <maximumf>, %40, %cst_24 [1] : vector<8x8xf32> to vector<8xf32>
    %44 = vector.shape_cast %43 : vector<8xf32> to vector<8x1xf32>
    %45 = arith.maximumf %42, %44 : vector<8x1xf32>
    %46 = arith.subf %42, %45 : vector<8x1xf32>
    %47 = math.exp %46 : vector<8x1xf32>
    %48 = vector.broadcast %45 : vector<8x1xf32> to vector<8x8xf32>
    %49 = arith.subf %40, %48 : vector<8x8xf32>
    %50 = math.exp %49 : vector<8x8xf32>
    %c0_25 = arith.constant 0 : index
    %c0_26 = arith.constant 0 : index
    %c0_27 = arith.constant 0 : index
    %51 = vector.load %arg21[%c0_25, %c0_26, %c0_27] : memref<4x8x1xf32, #tpu.memory_space<vmem>>, vector<1x8x1xf32>
    %52 = vector.shape_cast %51 : vector<1x8x1xf32> to vector<8x1xf32>
    %53 = arith.mulf %47, %52 : vector<8x1xf32>
    %cst_28 = arith.constant dense<0.000000e+00> : vector<8xf32>
    %54 = vector.multi_reduction <add>, %50, %cst_28 [1] : vector<8x8xf32> to vector<8xf32>
    %55 = vector.shape_cast %54 : vector<8xf32> to vector<8x1xf32>
    %56 = arith.addf %53, %55 : vector<8x1xf32>
    %c0_29 = arith.constant 0 : index
    %c0_30 = arith.constant 0 : index
    %c0_31 = arith.constant 0 : index
    %57 = vector.load %arg21[%c0_29, %c0_30, %c0_31] : memref<4x8x1xf32, #tpu.memory_space<vmem>>, vector<1x8x1xf32>
    %58 = vector.shape_cast %57 : vector<1x8x1xf32> to vector<8x1xf32>
    %59 = vector.shape_cast %56 : vector<8x1xf32> to vector<1x8x1xf32>
    tpu.vector_store %arg21[%c0_29, %c0_30, %c0_31], %59 {strides = array<i32>} : memref<4x8x1xf32, #tpu.memory_space<vmem>>, vector<1x8x1xf32>,
    %c0_32 = arith.constant 0 : index
    %c0_33 = arith.constant 0 : index
    %c0_34 = arith.constant 0 : index
    %60 = vector.load %arg19[%c0_32, %c0_33, %c0_34] : memref<4x8x8xf32, #tpu.memory_space<vmem>>, vector<1x8x8xf32>
    %61 = vector.shape_cast %60 : vector<1x8x8xf32> to vector<8x8xf32>
    %62 = vector.broadcast %47 : vector<8x1xf32> to vector<8x8xf32>
    %63 = arith.mulf %62, %61 : vector<8x8xf32>
    %64 = arith.truncf %50 : vector<8x8xf32> to vector<8x8xbf16>
    %cst_35 = arith.constant dense<0.000000e+00> : vector<8x8xf32>
    %65 = tpu.matmul %64, %37, %cst_35 {dimension_numbers = #tpu.dot_dimension_numbers<[1], [0], [0], [1], [0, 0, 1, 1], [], []>} : vector<8x8xbf16>, vector<8x8xbf16>, vector<8x8xf32> -> vector<8x8xf32>
    %66 = arith.addf %63, %65 : vector<8x8xf32>
    %c0_36 = arith.constant 0 : index
    %c0_37 = arith.constant 0 : index
    %c0_38 = arith.constant 0 : index
    %67 = vector.load %arg19[%c0_36, %c0_37, %c0_38] : memref<4x8x8xf32, #tpu.memory_space<vmem>>, vector<1x8x8xf32>
    %68 = vector.shape_cast %67 : vector<1x8x8xf32> to vector<8x8xf32>
    %69 = vector.shape_cast %66 : vector<8x8xf32> to vector<1x8x8xf32>
    tpu.vector_store %arg19[%c0_36, %c0_37, %c0_38], %69 {strides = array<i32>} : memref<4x8x8xf32, #tpu.memory_space<vmem>>, vector<1x8x8xf32>,
    %c0_39 = arith.constant 0 : index
    %c0_40 = arith.constant 0 : index
    %c0_41 = arith.constant 0 : index
    %70 = vector.load %arg20[%c0_39, %c0_40, %c0_41] : memref<4x8x1xf32, #tpu.memory_space<vmem>>, vector<1x8x1xf32>
    %71 = vector.shape_cast %70 : vector<1x8x1xf32> to vector<8x1xf32>
    %72 = vector.shape_cast %45 : vector<8x1xf32> to vector<1x8x1xf32>
    tpu.vector_store %arg20[%c0_39, %c0_40, %c0_41], %72 {strides = array<i32>} : memref<4x8x1xf32, #tpu.memory_space<vmem>>, vector<1x8x1xf32>,
    %73 = vector.extract_strided_slice %29 {offsets = [0, 8], sizes = [8, 8], strides = [1, 1]} : vector<8x32xbf16> to vector<8x8xbf16>
    %74 = vector.extract_strided_slice %35 {offsets = [0, 8], sizes = [8, 8], strides = [1, 1]} : vector<8x32xbf16> to vector<8x8xbf16>
    %c1 = arith.constant 1 : index
    %c0_42 = arith.constant 0 : index
    %c0_43 = arith.constant 0 : index
    %75 = vector.load %arg18[%c1, %c0_42, %c0_43] : memref<4x8x8xbf16, #tpu.memory_space<vmem>>, vector<1x8x8xbf16>
    %76 = vector.shape_cast %75 : vector<1x8x8xbf16> to vector<8x8xbf16>
    %cst_44 = arith.constant dense<0.000000e+00> : vector<8x8xf32>
    %77 = tpu.matmul %76, %73, %cst_44 {dimension_numbers = #tpu.dot_dimension_numbers<[1], [1], [0], [0], [0, 0, 1, 0], [], []>} : vector<8x8xbf16>, vector<8x8xbf16>, vector<8x8xf32> -> vector<8x8xf32>
    %c1_45 = arith.constant 1 : index
    %c0_46 = arith.constant 0 : index
    %c0_47 = arith.constant 0 : index
    %78 = vector.load %arg20[%c1_45, %c0_46, %c0_47] : memref<4x8x1xf32, #tpu.memory_space<vmem>>, vector<1x8x1xf32>
    %79 = vector.shape_cast %78 : vector<1x8x1xf32> to vector<8x1xf32>
    %cst_48 = arith.constant dense<0xFF800000> : vector<8xf32>
    %80 = vector.multi_reduction <maximumf>, %77, %cst_48 [1] : vector<8x8xf32> to vector<8xf32>
    %81 = vector.shape_cast %80 : vector<8xf32> to vector<8x1xf32>
    %82 = arith.maximumf %79, %81 : vector<8x1xf32>
    %83 = arith.subf %79, %82 : vector<8x1xf32>
    %84 = math.exp %83 : vector<8x1xf32>
    %85 = vector.broadcast %82 : vector<8x1xf32> to vector<8x8xf32>
    %86 = arith.subf %77, %85 : vector<8x8xf32>
    %87 = math.exp %86 : vector<8x8xf32>
    %c1_49 = arith.constant 1 : index
    %c0_50 = arith.constant 0 : index
    %c0_51 = arith.constant 0 : index
    %88 = vector.load %arg21[%c1_49, %c0_50, %c0_51] : memref<4x8x1xf32, #tpu.memory_space<vmem>>, vector<1x8x1xf32>
    %89 = vector.shape_cast %88 : vector<1x8x1xf32> to vector<8x1xf32>
    %90 = arith.mulf %84, %89 : vector<8x1xf32>
    %cst_52 = arith.constant dense<0.000000e+00> : vector<8xf32>
    %91 = vector.multi_reduction <add>, %87, %cst_52 [1] : vector<8x8xf32> to vector<8xf32>
    %92 = vector.shape_cast %91 : vector<8xf32> to vector<8x1xf32>
    %93 = arith.addf %90, %92 : vector<8x1xf32>
    %c1_53 = arith.constant 1 : index
    %c0_54 = arith.constant 0 : index
    %c0_55 = arith.constant 0 : index
    %94 = vector.load %arg21[%c1_53, %c0_54, %c0_55] : memref<4x8x1xf32, #tpu.memory_space<vmem>>, vector<1x8x1xf32>
    %95 = vector.shape_cast %94 : vector<1x8x1xf32> to vector<8x1xf32>
    %96 = vector.shape_cast %93 : vector<8x1xf32> to vector<1x8x1xf32>
    tpu.vector_store %arg21[%c1_53, %c0_54, %c0_55], %96 {strides = array<i32>} : memref<4x8x1xf32, #tpu.memory_space<vmem>>, vector<1x8x1xf32>,
    %c1_56 = arith.constant 1 : index
    %c0_57 = arith.constant 0 : index
    %c0_58 = arith.constant 0 : index
    %97 = vector.load %arg19[%c1_56, %c0_57, %c0_58] : memref<4x8x8xf32, #tpu.memory_space<vmem>>, vector<1x8x8xf32>
    %98 = vector.shape_cast %97 : vector<1x8x8xf32> to vector<8x8xf32>
    %99 = vector.broadcast %84 : vector<8x1xf32> to vector<8x8xf32>
    %100 = arith.mulf %99, %98 : vector<8x8xf32>
    %101 = arith.truncf %87 : vector<8x8xf32> to vector<8x8xbf16>
    %cst_59 = arith.constant dense<0.000000e+00> : vector<8x8xf32>
    %102 = tpu.matmul %101, %74, %cst_59 {dimension_numbers = #tpu.dot_dimension_numbers<[1], [0], [0], [1], [0, 0, 1, 1], [], []>} : vector<8x8xbf16>, vector<8x8xbf16>, vector<8x8xf32> -> vector<8x8xf32>
    %103 = arith.addf %100, %102 : vector<8x8xf32>
    %c1_60 = arith.constant 1 : index
    %c0_61 = arith.constant 0 : index
    %c0_62 = arith.constant 0 : index
    %104 = vector.load %arg19[%c1_60, %c0_61, %c0_62] : memref<4x8x8xf32, #tpu.memory_space<vmem>>, vector<1x8x8xf32>
    %105 = vector.shape_cast %104 : vector<1x8x8xf32> to vector<8x8xf32>
    %106 = vector.shape_cast %103 : vector<8x8xf32> to vector<1x8x8xf32>
    tpu.vector_store %arg19[%c1_60, %c0_61, %c0_62], %106 {strides = array<i32>} : memref<4x8x8xf32, #tpu.memory_space<vmem>>, vector<1x8x8xf32>,
    %c1_63 = arith.constant 1 : index
    %c0_64 = arith.constant 0 : index
    %c0_65 = arith.constant 0 : index
    %107 = vector.load %arg20[%c1_63, %c0_64, %c0_65] : memref<4x8x1xf32, #tpu.memory_space<vmem>>, vector<1x8x1xf32>
    %108 = vector.shape_cast %107 : vector<1x8x1xf32> to vector<8x1xf32>
    %109 = vector.shape_cast %82 : vector<8x1xf32> to vector<1x8x1xf32>
    tpu.vector_store %arg20[%c1_63, %c0_64, %c0_65], %109 {strides = array<i32>} : memref<4x8x1xf32, #tpu.memory_space<vmem>>, vector<1x8x1xf32>,
    %110 = vector.extract_strided_slice %29 {offsets = [0, 16], sizes = [8, 8], strides = [1, 1]} : vector<8x32xbf16> to vector<8x8xbf16>
    %111 = vector.extract_strided_slice %35 {offsets = [0, 16], sizes = [8, 8], strides = [1, 1]} : vector<8x32xbf16> to vector<8x8xbf16>
    %c2 = arith.constant 2 : index
    %c0_66 = arith.constant 0 : index
    %c0_67 = arith.constant 0 : index
    %112 = vector.load %arg18[%c2, %c0_66, %c0_67] : memref<4x8x8xbf16, #tpu.memory_space<vmem>>, vector<1x8x8xbf16>
    %113 = vector.shape_cast %112 : vector<1x8x8xbf16> to vector<8x8xbf16>
    %cst_68 = arith.constant dense<0.000000e+00> : vector<8x8xf32>
    %114 = tpu.matmul %113, %110, %cst_68 {dimension_numbers = #tpu.dot_dimension_numbers<[1], [1], [0], [0], [0, 0, 1, 0], [], []>} : vector<8x8xbf16>, vector<8x8xbf16>, vector<8x8xf32> -> vector<8x8xf32>
    %c2_69 = arith.constant 2 : index
    %c0_70 = arith.constant 0 : index
    %c0_71 = arith.constant 0 : index
    %115 = vector.load %arg20[%c2_69, %c0_70, %c0_71] : memref<4x8x1xf32, #tpu.memory_space<vmem>>, vector<1x8x1xf32>
    %116 = vector.shape_cast %115 : vector<1x8x1xf32> to vector<8x1xf32>
    %cst_72 = arith.constant dense<0xFF800000> : vector<8xf32>
    %117 = vector.multi_reduction <maximumf>, %114, %cst_72 [1] : vector<8x8xf32> to vector<8xf32>
    %118 = vector.shape_cast %117 : vector<8xf32> to vector<8x1xf32>
    %119 = arith.maximumf %116, %118 : vector<8x1xf32>
    %120 = arith.subf %116, %119 : vector<8x1xf32>
    %121 = math.exp %120 : vector<8x1xf32>
    %122 = vector.broadcast %119 : vector<8x1xf32> to vector<8x8xf32>
    %123 = arith.subf %114, %122 : vector<8x8xf32>
    %124 = math.exp %123 : vector<8x8xf32>
    %c2_73 = arith.constant 2 : index
    %c0_74 = arith.constant 0 : index
    %c0_75 = arith.constant 0 : index
    %125 = vector.load %arg21[%c2_73, %c0_74, %c0_75] : memref<4x8x1xf32, #tpu.memory_space<vmem>>, vector<1x8x1xf32>
    %126 = vector.shape_cast %125 : vector<1x8x1xf32> to vector<8x1xf32>
    %127 = arith.mulf %121, %126 : vector<8x1xf32>
    %cst_76 = arith.constant dense<0.000000e+00> : vector<8xf32>
    %128 = vector.multi_reduction <add>, %124, %cst_76 [1] : vector<8x8xf32> to vector<8xf32>
    %129 = vector.shape_cast %128 : vector<8xf32> to vector<8x1xf32>
    %130 = arith.addf %127, %129 : vector<8x1xf32>
    %c2_77 = arith.constant 2 : index
    %c0_78 = arith.constant 0 : index
    %c0_79 = arith.constant 0 : index
    %131 = vector.load %arg21[%c2_77, %c0_78, %c0_79] : memref<4x8x1xf32, #tpu.memory_space<vmem>>, vector<1x8x1xf32>
    %132 = vector.shape_cast %131 : vector<1x8x1xf32> to vector<8x1xf32>
    %133 = vector.shape_cast %130 : vector<8x1xf32> to vector<1x8x1xf32>
    tpu.vector_store %arg21[%c2_77, %c0_78, %c0_79], %133 {strides = array<i32>} : memref<4x8x1xf32, #tpu.memory_space<vmem>>, vector<1x8x1xf32>,
    %c2_80 = arith.constant 2 : index
    %c0_81 = arith.constant 0 : index
    %c0_82 = arith.constant 0 : index
    %134 = vector.load %arg19[%c2_80, %c0_81, %c0_82] : memref<4x8x8xf32, #tpu.memory_space<vmem>>, vector<1x8x8xf32>
    %135 = vector.shape_cast %134 : vector<1x8x8xf32> to vector<8x8xf32>
    %136 = vector.broadcast %121 : vector<8x1xf32> to vector<8x8xf32>
    %137 = arith.mulf %136, %135 : vector<8x8xf32>
    %138 = arith.truncf %124 : vector<8x8xf32> to vector<8x8xbf16>
    %cst_83 = arith.constant dense<0.000000e+00> : vector<8x8xf32>
    %139 = tpu.matmul %138, %111, %cst_83 {dimension_numbers = #tpu.dot_dimension_numbers<[1], [0], [0], [1], [0, 0, 1, 1], [], []>} : vector<8x8xbf16>, vector<8x8xbf16>, vector<8x8xf32> -> vector<8x8xf32>
    %140 = arith.addf %137, %139 : vector<8x8xf32>
    %c2_84 = arith.constant 2 : index
    %c0_85 = arith.constant 0 : index
    %c0_86 = arith.constant 0 : index
    %141 = vector.load %arg19[%c2_84, %c0_85, %c0_86] : memref<4x8x8xf32, #tpu.memory_space<vmem>>, vector<1x8x8xf32>
    %142 = vector.shape_cast %141 : vector<1x8x8xf32> to vector<8x8xf32>
    %143 = vector.shape_cast %140 : vector<8x8xf32> to vector<1x8x8xf32>
    tpu.vector_store %arg19[%c2_84, %c0_85, %c0_86], %143 {strides = array<i32>} : memref<4x8x8xf32, #tpu.memory_space<vmem>>, vector<1x8x8xf32>,
    %c2_87 = arith.constant 2 : index
    %c0_88 = arith.constant 0 : index
    %c0_89 = arith.constant 0 : index
    %144 = vector.load %arg20[%c2_87, %c0_88, %c0_89] : memref<4x8x1xf32, #tpu.memory_space<vmem>>, vector<1x8x1xf32>
    %145 = vector.shape_cast %144 : vector<1x8x1xf32> to vector<8x1xf32>
    %146 = vector.shape_cast %119 : vector<8x1xf32> to vector<1x8x1xf32>
    tpu.vector_store %arg20[%c2_87, %c0_88, %c0_89], %146 {strides = array<i32>} : memref<4x8x1xf32, #tpu.memory_space<vmem>>, vector<1x8x1xf32>,
    %147 = vector.extract_strided_slice %29 {offsets = [0, 24], sizes = [8, 8], strides = [1, 1]} : vector<8x32xbf16> to vector<8x8xbf16>
    %148 = vector.extract_strided_slice %35 {offsets = [0, 24], sizes = [8, 8], strides = [1, 1]} : vector<8x32xbf16> to vector<8x8xbf16>
    %c3 = arith.constant 3 : index
    %c0_90 = arith.constant 0 : index
    %c0_91 = arith.constant 0 : index
    %149 = vector.load %arg18[%c3, %c0_90, %c0_91] : memref<4x8x8xbf16, #tpu.memory_space<vmem>>, vector<1x8x8xbf16>
    %150 = vector.shape_cast %149 : vector<1x8x8xbf16> to vector<8x8xbf16>
    %cst_92 = arith.constant dense<0.000000e+00> : vector<8x8xf32>
    %151 = tpu.matmul %150, %147, %cst_92 {dimension_numbers = #tpu.dot_dimension_numbers<[1], [1], [0], [0], [0, 0, 1, 0], [], []>} : vector<8x8xbf16>, vector<8x8xbf16>, vector<8x8xf32> -> vector<8x8xf32>
    %c3_93 = arith.constant 3 : index
    %c0_94 = arith.constant 0 : index
    %c0_95 = arith.constant 0 : index
    %152 = vector.load %arg20[%c3_93, %c0_94, %c0_95] : memref<4x8x1xf32, #tpu.memory_space<vmem>>, vector<1x8x1xf32>
    %153 = vector.shape_cast %152 : vector<1x8x1xf32> to vector<8x1xf32>
    %cst_96 = arith.constant dense<0xFF800000> : vector<8xf32>
    %154 = vector.multi_reduction <maximumf>, %151, %cst_96 [1] : vector<8x8xf32> to vector<8xf32>
    %155 = vector.shape_cast %154 : vector<8xf32> to vector<8x1xf32>
    %156 = arith.maximumf %153, %155 : vector<8x1xf32>
    %157 = arith.subf %153, %156 : vector<8x1xf32>
    %158 = math.exp %157 : vector<8x1xf32>
    %159 = vector.broadcast %156 : vector<8x1xf32> to vector<8x8xf32>
    %160 = arith.subf %151, %159 : vector<8x8xf32>
    %161 = math.exp %160 : vector<8x8xf32>
    %c3_97 = arith.constant 3 : index
    %c0_98 = arith.constant 0 : index
    %c0_99 = arith.constant 0 : index
    %162 = vector.load %arg21[%c3_97, %c0_98, %c0_99] : memref<4x8x1xf32, #tpu.memory_space<vmem>>, vector<1x8x1xf32>
    %163 = vector.shape_cast %162 : vector<1x8x1xf32> to vector<8x1xf32>
    %164 = arith.mulf %158, %163 : vector<8x1xf32>
    %cst_100 = arith.constant dense<0.000000e+00> : vector<8xf32>
    %165 = vector.multi_reduction <add>, %161, %cst_100 [1] : vector<8x8xf32> to vector<8xf32>
    %166 = vector.shape_cast %165 : vector<8xf32> to vector<8x1xf32>
    %167 = arith.addf %164, %166 : vector<8x1xf32>
    %c3_101 = arith.constant 3 : index
    %c0_102 = arith.constant 0 : index
    %c0_103 = arith.constant 0 : index
    %168 = vector.load %arg21[%c3_101, %c0_102, %c0_103] : memref<4x8x1xf32, #tpu.memory_space<vmem>>, vector<1x8x1xf32>
    %169 = vector.shape_cast %168 : vector<1x8x1xf32> to vector<8x1xf32>
    %170 = vector.shape_cast %167 : vector<8x1xf32> to vector<1x8x1xf32>
    tpu.vector_store %arg21[%c3_101, %c0_102, %c0_103], %170 {strides = array<i32>} : memref<4x8x1xf32, #tpu.memory_space<vmem>>, vector<1x8x1xf32>,
    %c3_104 = arith.constant 3 : index
    %c0_105 = arith.constant 0 : index
    %c0_106 = arith.constant 0 : index
    %171 = vector.load %arg19[%c3_104, %c0_105, %c0_106] : memref<4x8x8xf32, #tpu.memory_space<vmem>>, vector<1x8x8xf32>
    %172 = vector.shape_cast %171 : vector<1x8x8xf32> to vector<8x8xf32>
    %173 = vector.broadcast %158 : vector<8x1xf32> to vector<8x8xf32>
    %174 = arith.mulf %173, %172 : vector<8x8xf32>
    %175 = arith.truncf %161 : vector<8x8xf32> to vector<8x8xbf16>
    %cst_107 = arith.constant dense<0.000000e+00> : vector<8x8xf32>
    %176 = tpu.matmul %175, %148, %cst_107 {dimension_numbers = #tpu.dot_dimension_numbers<[1], [0], [0], [1], [0, 0, 1, 1], [], []>} : vector<8x8xbf16>, vector<8x8xbf16>, vector<8x8xf32> -> vector<8x8xf32>
    %177 = arith.addf %174, %176 : vector<8x8xf32>
    %c3_108 = arith.constant 3 : index
    %c0_109 = arith.constant 0 : index
    %c0_110 = arith.constant 0 : index
    %178 = vector.load %arg19[%c3_108, %c0_109, %c0_110] : memref<4x8x8xf32, #tpu.memory_space<vmem>>, vector<1x8x8xf32>
    %179 = vector.shape_cast %178 : vector<1x8x8xf32> to vector<8x8xf32>
    %180 = vector.shape_cast %177 : vector<8x8xf32> to vector<1x8x8xf32>
    tpu.vector_store %arg19[%c3_108, %c0_109, %c0_110], %180 {strides = array<i32>} : memref<4x8x8xf32, #tpu.memory_space<vmem>>, vector<1x8x8xf32>,
    %c3_111 = arith.constant 3 : index
    %c0_112 = arith.constant 0 : index
    %c0_113 = arith.constant 0 : index
    %181 = vector.load %arg20[%c3_111, %c0_112, %c0_113] : memref<4x8x1xf32, #tpu.memory_space<vmem>>, vector<1x8x1xf32>
    %182 = vector.shape_cast %181 : vector<1x8x1xf32> to vector<8x1xf32>
    %183 = vector.shape_cast %156 : vector<8x1xf32> to vector<1x8x1xf32>
    tpu.vector_store %arg20[%c3_111, %c0_112, %c0_113], %183 {strides = array<i32>} : memref<4x8x1xf32, #tpu.memory_space<vmem>>, vector<1x8x1xf32>,
    %c1_i32 = arith.constant 1 : i32
    %184 = arith.cmpi eq, %arg2, %c1_i32 : i32
    %185 = arith.extui %184 : i1 to i32
    %c0_i32_114 = arith.constant 0 : i32
    %186 = arith.cmpi ne, %185, %c0_i32_114 : i32
    scf.if %186 {
      %c0_115 = arith.constant 0 : index
      %c0_116 = arith.constant 0 : index
      %c0_117 = arith.constant 0 : index
      %187 = vector.load %arg19[%c0_115, %c0_116, %c0_117] : memref<4x8x8xf32, #tpu.memory_space<vmem>>, vector<1x8x8xf32>
      %188 = vector.shape_cast %187 : vector<1x8x8xf32> to vector<8x8xf32>
      %c0_118 = arith.constant 0 : index
      %c0_119 = arith.constant 0 : index
      %c0_120 = arith.constant 0 : index
      %189 = vector.load %arg21[%c0_118, %c0_119, %c0_120] : memref<4x8x1xf32, #tpu.memory_space<vmem>>, vector<1x8x1xf32>
      %190 = vector.shape_cast %189 : vector<1x8x1xf32> to vector<8x1xf32>
      %191 = tpu.reciprocal %190 : vector<8x1xf32> -> vector<8x1xf32>
      %192 = vector.broadcast %191 : vector<8x1xf32> to vector<8x8xf32>
      %193 = arith.mulf %188, %192 : vector<8x8xf32>
      %c1_121 = arith.constant 1 : index
      %c0_122 = arith.constant 0 : index
      %c0_123 = arith.constant 0 : index
      %194 = vector.load %arg19[%c1_121, %c0_122, %c0_123] : memref<4x8x8xf32, #tpu.memory_space<vmem>>, vector<1x8x8xf32>
      %195 = vector.shape_cast %194 : vector<1x8x8xf32> to vector<8x8xf32>
      %c1_124 = arith.constant 1 : index
      %c0_125 = arith.constant 0 : index
      %c0_126 = arith.constant 0 : index
      %196 = vector.load %arg21[%c1_124, %c0_125, %c0_126] : memref<4x8x1xf32, #tpu.memory_space<vmem>>, vector<1x8x1xf32>
      %197 = vector.shape_cast %196 : vector<1x8x1xf32> to vector<8x1xf32>
      %198 = tpu.reciprocal %197 : vector<8x1xf32> -> vector<8x1xf32>
      %199 = vector.broadcast %198 : vector<8x1xf32> to vector<8x8xf32>
      %200 = arith.mulf %195, %199 : vector<8x8xf32>
      %c2_127 = arith.constant 2 : index
      %c0_128 = arith.constant 0 : index
      %c0_129 = arith.constant 0 : index
      %201 = vector.load %arg19[%c2_127, %c0_128, %c0_129] : memref<4x8x8xf32, #tpu.memory_space<vmem>>, vector<1x8x8xf32>
      %202 = vector.shape_cast %201 : vector<1x8x8xf32> to vector<8x8xf32>
      %c2_130 = arith.constant 2 : index
      %c0_131 = arith.constant 0 : index
      %c0_132 = arith.constant 0 : index
      %203 = vector.load %arg21[%c2_130, %c0_131, %c0_132] : memref<4x8x1xf32, #tpu.memory_space<vmem>>, vector<1x8x1xf32>
      %204 = vector.shape_cast %203 : vector<1x8x1xf32> to vector<8x1xf32>
      %205 = tpu.reciprocal %204 : vector<8x1xf32> -> vector<8x1xf32>
      %206 = vector.broadcast %205 : vector<8x1xf32> to vector<8x8xf32>
      %207 = arith.mulf %202, %206 : vector<8x8xf32>
      %c3_133 = arith.constant 3 : index
      %c0_134 = arith.constant 0 : index
      %c0_135 = arith.constant 0 : index
      %208 = vector.load %arg19[%c3_133, %c0_134, %c0_135] : memref<4x8x8xf32, #tpu.memory_space<vmem>>, vector<1x8x8xf32>
      %209 = vector.shape_cast %208 : vector<1x8x8xf32> to vector<8x8xf32>
      %c3_136 = arith.constant 3 : index
      %c0_137 = arith.constant 0 : index
      %c0_138 = arith.constant 0 : index
      %210 = vector.load %arg21[%c3_136, %c0_137, %c0_138] : memref<4x8x1xf32, #tpu.memory_space<vmem>>, vector<1x8x1xf32>
      %211 = vector.shape_cast %210 : vector<1x8x1xf32> to vector<8x1xf32>
      %212 = tpu.reciprocal %211 : vector<8x1xf32> -> vector<8x1xf32>
      %213 = vector.broadcast %212 : vector<8x1xf32> to vector<8x8xf32>
      %214 = arith.mulf %209, %213 : vector<8x8xf32>
      %215 = tpu.concatenate %193, %200, %207, %214 in 1 : vector<8x8xf32>, vector<8x8xf32>, vector<8x8xf32>, vector<8x8xf32> -> vector<8x32xf32>
      %216 = arith.truncf %215 : vector<8x32xf32> to vector<8x32xbf16>
      %c0_139 = arith.constant 0 : index
      %c0_140 = arith.constant 0 : index
      %217 = vector.load %arg11[%c0_139, %c0_140] : memref<32x32xbf16, #tpu.memory_space<vmem>>, vector<32x32xbf16>
      %cst_141 = arith.constant dense<0.000000e+00> : vector<8x32xf32>
      %218 = tpu.matmul %216, %217, %cst_141 {dimension_numbers = #tpu.dot_dimension_numbers<[1], [0], [0], [1], [0, 0, 1, 1], [], []>} : vector<8x32xbf16>, vector<32x32xbf16>, vector<8x32xf32> -> vector<8x32xf32>
      %c0_142 = arith.constant 0 : index
      %c0_143 = arith.constant 0 : index
      %219 = vector.load %arg12[%c0_142, %c0_143] : memref<1x32xf32, #tpu.memory_space<vmem>>, vector<1x32xf32>
      %220 = vector.broadcast %219 : vector<1x32xf32> to vector<8x32xf32>
      %221 = arith.addf %218, %220 : vector<8x32xf32>
      %c0_144 = arith.constant 0 : index
      %c0_145 = arith.constant 0 : index
      %c0_146 = arith.constant 0 : index
      %222 = vector.load %arg3[%c0_144, %c0_145, %c0_146] : memref<1x8x32xf32, #tpu.memory_space<vmem>>, vector<1x8x32xf32>
      %223 = vector.shape_cast %222 : vector<1x8x32xf32> to vector<8x32xf32>
      %224 = arith.addf %223, %221 : vector<8x32xf32>
      %cst_147 = arith.constant dense<0.000000e+00> : vector<8xf32>
      %225 = vector.multi_reduction <add>, %224, %cst_147 [1] : vector<8x32xf32> to vector<8xf32>
      %226 = vector.shape_cast %225 : vector<8xf32> to vector<8x1xf32>
      %cst_148 = arith.constant 3.200000e+01 : f32
      %227 = vector.broadcast %cst_148 : f32 to vector<8x1xf32>
      %228 = arith.divf %226, %227 : vector<8x1xf32>
      %229 = vector.broadcast %228 : vector<8x1xf32> to vector<8x32xf32>
      %230 = arith.subf %224, %229 : vector<8x32xf32>
      %231 = arith.mulf %230, %230 : vector<8x32xf32>
      %cst_149 = arith.constant dense<0.000000e+00> : vector<8xf32>
      %232 = vector.multi_reduction <add>, %231, %cst_149 [1] : vector<8x32xf32> to vector<8xf32>
      %233 = vector.shape_cast %232 : vector<8xf32> to vector<8x1xf32>
      %cst_150 = arith.constant 3.200000e+01 : f32
      %234 = vector.broadcast %cst_150 : f32 to vector<8x1xf32>
      %235 = arith.divf %233, %234 : vector<8x1xf32>
      %236 = vector.broadcast %228 : vector<8x1xf32> to vector<8x32xf32>
      %237 = arith.subf %224, %236 : vector<8x32xf32>
      %cst_151 = arith.constant 9.99999974E-6 : f32
      %238 = vector.broadcast %cst_151 : f32 to vector<8x1xf32>
      %239 = arith.addf %235, %238 : vector<8x1xf32>
      %240 = math.rsqrt %239 : vector<8x1xf32>
      %241 = vector.broadcast %240 : vector<8x1xf32> to vector<8x32xf32>
      %242 = arith.mulf %237, %241 : vector<8x32xf32>
      %243 = arith.truncf %242 : vector<8x32xf32> to vector<8x32xbf16>
      %cst_152 = arith.constant 0.000000e+00 : f32
      %244 = vector.broadcast %cst_152 : f32 to vector<8x32xf32>
      %c0_153 = arith.constant 0 : index
      %c0_154 = arith.constant 0 : index
      %245 = vector.load %arg22[%c0_153, %c0_154] : memref<8x32xf32, #tpu.memory_space<vmem>>, vector<8x32xf32>
      tpu.vector_store %arg22[%c0_153, %c0_154], %244 {strides = array<i32>} : memref<8x32xf32, #tpu.memory_space<vmem>>, vector<8x32xf32>,
      %c0_155 = arith.constant 0 : index
      %c0_156 = arith.constant 0 : index
      %246 = vector.load %arg13[%c0_155, %c0_156] : memref<32x128xbf16, #tpu.memory_space<vmem>>, vector<32x64xbf16>
      %cst_157 = arith.constant dense<0.000000e+00> : vector<8x64xf32>
      %247 = tpu.matmul %243, %246, %cst_157 {dimension_numbers = #tpu.dot_dimension_numbers<[1], [0], [0], [1], [0, 0, 1, 1], [], []>} : vector<8x32xbf16>, vector<32x64xbf16>, vector<8x64xf32> -> vector<8x64xf32>
      %c0_158 = arith.constant 0 : index
      %c0_159 = arith.constant 0 : index
      %248 = vector.load %arg14[%c0_158, %c0_159] : memref<1x128xf32, #tpu.memory_space<vmem>>, vector<1x64xf32>
      %249 = vector.broadcast %248 : vector<1x64xf32> to vector<8x64xf32>
      %250 = arith.addf %247, %249 : vector<8x64xf32>
      %cst_160 = arith.constant 0.000000e+00 : f32
      %251 = vector.broadcast %cst_160 : f32 to vector<8x64xf32>
      %252 = arith.maximumf %250, %251 : vector<8x64xf32>
      %c0_161 = arith.constant 0 : index
      %c0_162 = arith.constant 0 : index
      %253 = vector.load %arg22[%c0_161, %c0_162] : memref<8x32xf32, #tpu.memory_space<vmem>>, vector<8x32xf32>
      %254 = arith.truncf %252 : vector<8x64xf32> to vector<8x64xbf16>
      %c0_163 = arith.constant 0 : index
      %c0_164 = arith.constant 0 : index
      %255 = vector.load %arg15[%c0_163, %c0_164] : memref<128x32xbf16, #tpu.memory_space<vmem>>, vector<64x32xbf16>
      %cst_165 = arith.constant dense<0.000000e+00> : vector<8x32xf32>
      %256 = tpu.matmul %254, %255, %cst_165 {dimension_numbers = #tpu.dot_dimension_numbers<[1], [0], [0], [1], [0, 0, 1, 1], [], []>} : vector<8x64xbf16>, vector<64x32xbf16>, vector<8x32xf32> -> vector<8x32xf32>
      %257 = arith.addf %253, %256 : vector<8x32xf32>
      %c0_166 = arith.constant 0 : index
      %c0_167 = arith.constant 0 : index
      %258 = vector.load %arg22[%c0_166, %c0_167] : memref<8x32xf32, #tpu.memory_space<vmem>>, vector<8x32xf32>
      tpu.vector_store %arg22[%c0_166, %c0_167], %257 {strides = array<i32>} : memref<8x32xf32, #tpu.memory_space<vmem>>, vector<8x32xf32>,
      %c0_168 = arith.constant 0 : index
      %c64 = arith.constant 64 : index
      %259 = vector.load %arg13[%c0_168, %c64] : memref<32x128xbf16, #tpu.memory_space<vmem>>, vector<32x64xbf16>
      %cst_169 = arith.constant dense<0.000000e+00> : vector<8x64xf32>
      %260 = tpu.matmul %243, %259, %cst_169 {dimension_numbers = #tpu.dot_dimension_numbers<[1], [0], [0], [1], [0, 0, 1, 1], [], []>} : vector<8x32xbf16>, vector<32x64xbf16>, vector<8x64xf32> -> vector<8x64xf32>
      %c0_170 = arith.constant 0 : index
      %c64_171 = arith.constant 64 : index
      %261 = vector.load %arg14[%c0_170, %c64_171] : memref<1x128xf32, #tpu.memory_space<vmem>>, vector<1x64xf32>
      %262 = vector.broadcast %261 : vector<1x64xf32> to vector<8x64xf32>
      %263 = arith.addf %260, %262 : vector<8x64xf32>
      %cst_172 = arith.constant 0.000000e+00 : f32
      %264 = vector.broadcast %cst_172 : f32 to vector<8x64xf32>
      %265 = arith.maximumf %263, %264 : vector<8x64xf32>
      %c0_173 = arith.constant 0 : index
      %c0_174 = arith.constant 0 : index
      %266 = vector.load %arg22[%c0_173, %c0_174] : memref<8x32xf32, #tpu.memory_space<vmem>>, vector<8x32xf32>
      %267 = arith.truncf %265 : vector<8x64xf32> to vector<8x64xbf16>
      %c64_175 = arith.constant 64 : index
      %c0_176 = arith.constant 0 : index
      %268 = vector.load %arg15[%c64_175, %c0_176] : memref<128x32xbf16, #tpu.memory_space<vmem>>, vector<64x32xbf16>
      %cst_177 = arith.constant dense<0.000000e+00> : vector<8x32xf32>
      %269 = tpu.matmul %267, %268, %cst_177 {dimension_numbers = #tpu.dot_dimension_numbers<[1], [0], [0], [1], [0, 0, 1, 1], [], []>} : vector<8x64xbf16>, vector<64x32xbf16>, vector<8x32xf32> -> vector<8x32xf32>
      %270 = arith.addf %266, %269 : vector<8x32xf32>
      %c0_178 = arith.constant 0 : index
      %c0_179 = arith.constant 0 : index
      %271 = vector.load %arg22[%c0_178, %c0_179] : memref<8x32xf32, #tpu.memory_space<vmem>>, vector<8x32xf32>
      tpu.vector_store %arg22[%c0_178, %c0_179], %270 {strides = array<i32>} : memref<8x32xf32, #tpu.memory_space<vmem>>, vector<8x32xf32>,
      %c0_180 = arith.constant 0 : index
      %c0_181 = arith.constant 0 : index
      %272 = vector.load %arg22[%c0_180, %c0_181] : memref<8x32xf32, #tpu.memory_space<vmem>>, vector<8x32xf32>
      %273 = arith.addf %224, %272 : vector<8x32xf32>
      %c0_182 = arith.constant 0 : index
      %c0_183 = arith.constant 0 : index
      %274 = vector.load %arg16[%c0_182, %c0_183] : memref<1x32xf32, #tpu.memory_space<vmem>>, vector<1x32xf32>
      %275 = vector.broadcast %274 : vector<1x32xf32> to vector<8x32xf32>
      %276 = arith.addf %273, %275 : vector<8x32xf32>
      %c0_184 = arith.constant 0 : index
      %c0_185 = arith.constant 0 : index
      %c0_186 = arith.constant 0 : index
      %277 = vector.load %arg17[%c0_184, %c0_185, %c0_186] : memref<1x8x32xf32, #tpu.memory_space<vmem>>, vector<1x8x32xf32>
      %278 = vector.shape_cast %277 : vector<1x8x32xf32> to vector<8x32xf32>
      %279 = vector.shape_cast %276 : vector<8x32xf32> to vector<1x8x32xf32>
      tpu.vector_store %arg17[%c0_184, %c0_185, %c0_186], %279 {strides = array<i32>} : memref<1x8x32xf32, #tpu.memory_space<vmem>>, vector<1x8x32xf32>,
    } else {
    }
    return
  }
  func.func @transform_0(%arg0: i32, %arg1: i32, %arg2: i32) -> (i32, i32, i32) {
    %c0_i32 = arith.constant 0 : i32
    %c0_i32_0 = arith.constant 0 : i32
    return %arg0, %arg1, %c0_i32 : i32, i32, i32
  }
  func.func @transform_1(%arg0: i32, %arg1: i32, %arg2: i32) -> (i32, i32, i32) {
    %c0_i32 = arith.constant 0 : i32
    %c0_i32_0 = arith.constant 0 : i32
    return %arg0, %arg2, %c0_i32 : i32, i32, i32
  }
  func.func @transform_2(%arg0: i32, %arg1: i32, %arg2: i32) -> (i32, i32) {
    %c0_i32 = arith.constant 0 : i32
    %c0_i32_0 = arith.constant 0 : i32
    %c0_i32_1 = arith.constant 0 : i32
    return %c0_i32, %c0_i32_0 : i32, i32
  }
  func.func @transform_3(%arg0: i32, %arg1: i32, %arg2: i32) -> (i32, i32) {
    %c0_i32 = arith.constant 0 : i32
    %c0_i32_0 = arith.constant 0 : i32
    %c0_i32_1 = arith.constant 0 : i32
    return %c0_i32, %c0_i32_0 : i32, i32
  }
  func.func @transform_4(%arg0: i32, %arg1: i32, %arg2: i32) -> (i32, i32) {
    %c0_i32 = arith.constant 0 : i32
    %c0_i32_0 = arith.constant 0 : i32
    %c0_i32_1 = arith.constant 0 : i32
    return %c0_i32, %c0_i32_0 : i32, i32
  }
  func.func @transform_5(%arg0: i32, %arg1: i32, %arg2: i32) -> (i32, i32) {
    %c0_i32 = arith.constant 0 : i32
    %c0_i32_0 = arith.constant 0 : i32
    %c0_i32_1 = arith.constant 0 : i32
    return %c0_i32, %c0_i32_0 : i32, i32
  }
  func.func @transform_6(%arg0: i32, %arg1: i32, %arg2: i32) -> (i32, i32) {
    %c0_i32 = arith.constant 0 : i32
    %c0_i32_0 = arith.constant 0 : i32
    %c0_i32_1 = arith.constant 0 : i32
    return %c0_i32, %c0_i32_0 : i32, i32
  }
  func.func @transform_7(%arg0: i32, %arg1: i32, %arg2: i32) -> (i32, i32) {
    %c0_i32 = arith.constant 0 : i32
    %c0_i32_0 = arith.constant 0 : i32
    %c0_i32_1 = arith.constant 0 : i32
    return %c0_i32, %c0_i32_0 : i32, i32
  }
  func.func @transform_8(%arg0: i32, %arg1: i32, %arg2: i32) -> (i32, i32) {
    %c0_i32 = arith.constant 0 : i32
    %c0_i32_0 = arith.constant 0 : i32
    %c0_i32_1 = arith.constant 0 : i32
    return %c0_i32, %c0_i32_0 : i32, i32
  }
  func.func @transform_9(%arg0: i32, %arg1: i32, %arg2: i32) -> (i32, i32) {
    %c0_i32 = arith.constant 0 : i32
    %c0_i32_0 = arith.constant 0 : i32
    %c0_i32_1 = arith.constant 0 : i32
    return %c0_i32, %c0_i32_0 : i32, i32
  }
  func.func @transform_10(%arg0: i32, %arg1: i32, %arg2: i32) -> (i32, i32) {
    %c0_i32 = arith.constant 0 : i32
    %c0_i32_0 = arith.constant 0 : i32
    %c0_i32_1 = arith.constant 0 : i32
    return %c0_i32, %c0_i32_0 : i32, i32
  }
  func.func @transform_11(%arg0: i32, %arg1: i32, %arg2: i32) -> (i32, i32) {
    %c0_i32 = arith.constant 0 : i32
    %c0_i32_0 = arith.constant 0 : i32
    %c0_i32_1 = arith.constant 0 : i32
    return %c0_i32, %c0_i32_0 : i32, i32
  }
  func.func @transform_12(%arg0: i32, %arg1: i32, %arg2: i32) -> (i32, i32) {
    %c0_i32 = arith.constant 0 : i32
    %c0_i32_0 = arith.constant 0 : i32
    %c0_i32_1 = arith.constant 0 : i32
    return %c0_i32, %c0_i32_0 : i32, i32
  }
  func.func @transform_13(%arg0: i32, %arg1: i32, %arg2: i32) -> (i32, i32) {
    %c0_i32 = arith.constant 0 : i32
    %c0_i32_0 = arith.constant 0 : i32
    %c0_i32_1 = arith.constant 0 : i32
    return %c0_i32, %c0_i32_0 : i32, i32
  }
  func.func @transform_14(%arg0: i32, %arg1: i32, %arg2: i32) -> (i32, i32, i32) {
    %c0_i32 = arith.constant 0 : i32
    %c0_i32_0 = arith.constant 0 : i32
    return %arg0, %arg1, %c0_i32 : i32, i32, i32
  }
}

</mosaic_0001>

<bundles_post_ra>
// kernel: tpu_custom_call.1
= control target key start
LH: loop header
LB: loop body
LE: loop exit
PB: predicated region body
PF: predicated region fallthrough
CT: control target
= control target key end

     0   :  { %s3361_s0 = inlined_call_operand.vmem [shape: f32[2,16,32], index: 0, kind: input, shape index: {}]   ;;  %s3362_s1 = inlined_call_operand.vmem [shape: f32[2,16,32], index: 1, kind: input, shape index: {}]   ;;  %s3363_s2 = inlined_call_operand.vmem [shape: bf16[32,32], index: 2, kind: input, shape index: {}]   ;;  %s3364_s3 = inlined_call_operand.vmem [shape: f32[1,32], index: 3, kind: input, shape index: {}]   ;;  %s3365_s4 = inlined_call_operand.hbm [shape: bf16[32,32], index: 4, kind: input, shape index: {}]   ;;  %s3366_s5 = inlined_call_operand.vmem [shape: f32[1,32], index: 5, kind: input, shape index: {}]   ;;  %s3367_s6 = inlined_call_operand.hbm [shape: bf16[32,32], index: 6, kind: input, shape index: {}]   ;;  %s3368_s7 = inlined_call_operand.hbm [shape: f32[1,32], index: 7, kind: input, shape index: {}]   ;;  %s3369_s8 = inlined_call_operand.hbm [shape: bf16[32,32], index: 8, kind: input, shape index: {}]   ;;  %s3370_s9 = inlined_call_operand.hbm [shape: f32[1,32], index: 9, kind: input, shape index: {}]   ;;  %s3371_s10 = inlined_call_operand.vmem [shape: bf16[32,128], index: 10, kind: input, shape index: {}]   ;;  %s3372_s11 = inlined_call_operand.vmem [shape: f32[1,128], index: 11, kind: input, shape index: {}]   ;;  %s3373_s12 = inlined_call_operand.vmem [shape: bf16[128,32], index: 12, kind: input, shape index: {}]   ;;  %s3374_s13 = inlined_call_operand.vmem [shape: f32[1,32], index: 13, kind: input, shape index: {}]   ;;  %s3375_s14 = inlined_call_operand.hbm [shape: f32[2,16,32], index: 14, kind: output, shape index: {}]  }
   0x1   :  { %3395 = sst [smem:[#allocation33_spill]] %s3366_s5 }
   0x2   :  { %3396 = sst [smem:[#allocation34_spill]] %s3367_s6 }
   0x3   :  { %3397 = sst [smem:[#allocation35_spill]] %s3371_s10 }
   0x4   :  { %3398 = sst [smem:[#allocation36_spill]] %s3372_s11 }
   0x5   :  { %3399 = sst [smem:[#allocation37_spill]] %s3373_s12 }
   0x6   :  { %3400 = sst [smem:[#allocation38_spill]] %s3374_s13 }
   0x7   :  { %3401 = sst [smem:[#allocation39_spill]] %s3375_s14 }
   0x8   :  { %19 = vsyncpa [#allocation8], 0 }
   0x9   :  { %20 = vsyncpa [#allocation11], 0 }
   0xa   :  { %21 = vsyncpa [#allocation14], 0 }
   0xb   :  { %22 = vsyncpa [#allocation9], 0 }
   0xc   :  { %24 = vsyncpa [#allocation9 + $0x1], 0  ;;  %s2838_s29 = smov 0   ;;  %s2840_s30 = smov 0  }
   0xd   :  { %s2842_s15 = smov 0   ;;  %s2844_s16 = smov 0  }
   0xe   :  { %s2846_s17 = smov 0   ;;  %s2848_s18 = smov 0  }
   0xf   :  { %s2850_s19 = smov 0   ;;  %s2852_s20 = smov 0  }
  0x10   :  { %s2854_s21 = smov 0   ;;  %s2856_s22 = smov 0  }
  0x11 LB: > { %3402 = sst [smem:[#allocation21_spill]] %s2698_s29  ;;  %s2023_s23 = sadd.s32 4294967295, %s2734_s22   ;;  %s2734_s22 = sphi %s2856_s22, %s30_s22   ;;  %s2730_s21 = sphi %s2854_s21, %s3448_s21   ;;  %s2726_s20 = sphi %s2852_s20, %s3443_s20   ;;  %s2722_s19 = sphi %s2850_s19, %s3442_s19   ;;  %s2718_s18 = sphi %s2848_s18, %s3441_s18   ;;  %s2714_s17 = sphi %s2846_s17, %s3440_s17   ;;  %s2710_s16 = sphi %s2844_s16, %s3447_s16   ;;  %s2706_s15 = sphi %s2842_s15, %s3438_s15   ;;  %s2702_s30 = sphi %s2840_s30, %s3446_s30   ;;  %s2698_s29 = sphi %s2838_s29, %s3445_s29  }
  0x12   : > { %3403 = sst [smem:[#allocation22_spill]] %s2706_s15  ;;  %s2024_s24 = sadd.s32 4294967294, %s2734_s22  }
  0x13   : > { %3404 = sst [smem:[#allocation23_spill]] %s2722_s19  ;;  %s42_s25 = sadd.s32 1, %s2722_s19 }
  0x14   : > { %3405 = sst [smem:[#allocation24_spill]] %s2726_s20  ;;  %s45_s26 = sadd.s32 1, %s2726_s20 }
  0x15   : > { %3406 = sst [smem:[#allocation25_spill]] %s2730_s21  ;;  %p43_p0 = scmp.ge.s32.totalorder %s42_s25, 2 }
  0x16   : > { %3407 = sst [smem:[#allocation26_spill]] %s2734_s22  ;;  %s49_s27 = sadd.s32 1, %s2730_s21 }
  0x17   : > { %s366_s28 = sadd.s32 1, %s2706_s15  ;;  %p376_p1 = scmp.ne.s32.totalorder %s2706_s15, %s2702_s30 }
  0x18   : > { %s3450_s25 = smov (%p43_p0, %s42_s25), 0  ;;  %s3452_s26 = smov (!%p43_p0, %s45_s26), %s2726_s20 }
  0x19   : > { %3408 = sst [smem:[#allocation27_spill]] %s3450_s25  ;;  %p377_p2 = scmp.eq.s32.totalorder %s2023_s23, 7 }
  0x1a   : > { %p382_p3 = scmp.ne.s32.totalorder %s2702_s30, %s2698_s29  ;;  %p47_p4 = scmp.ge.s32.totalorder %s3452_s26, 2 }
  0x1b   : > { %p383_p5 = scmp.eq.s32.totalorder %s2024_s24, 7  ;;  %p2901_p6 = por %p377_p2, %p376_p1 }
  0x1c   : > { %p2025_p7 = scmp.ge.s32.totalorder %s2734_s22, 1  ;;  %s3454_s26 = smov (%p47_p4, %s3452_s26), 0 }
  0x1d   : > { %s3409_s14 = scalar_select %p2901_p6, 1, 0 }
  0x1e   : > { %3411 = sst [smem:[#allocation29_spill]] %s3454_s26  ;;  %s3456_s27 = smov (!%p47_p4, %s49_s27), %s2730_s21 }
  0x1f   : > { %3410 = sst [smem:[#allocation28_spill]] %s3409_s14  ;;  %s362_s19 = ssub.s32 %s2726_s20, %s3454_s26 }
  0x20   : > { %p2911_p8 = por %p383_p5, %p382_p3  ;;  %p51_p9 = scmp.ge.s32.totalorder %s3456_s27, 2 }
  0x21   : > { %p390_p10 = scmp.lt.s32.totalorder %s2734_s22, 9  ;;  %p2916_p11 = scmp.eq.s32.totalorder %s2023_s23, 0 }
  0x22   : > { %s3412_s13 = scalar_select %p2911_p8, 1, 0 }
  0x23   : > { %s3414_s25 = scalar_select %p2916_p11, 1, 0 }
  0x24   : > { %3413 = sst [smem:[#allocation30_spill]] %s3412_s13  ;;  %s3458_s27 = smov (%p51_p9, %s3456_s27), 0 }
  0x25   : > { %3415 = sst [smem:[#allocation31_spill]] %s3458_s27  ;;  %p2922_p12 = pnand %p2025_p7, %p390_p10 }
  0x26   : > { %s361_s26 = ssub.s32 %s2730_s21, %s3458_s27  ;;  %s2736_s13 = smov [#allocation10]  }
  0x27   : > { %s3416_s24 = scalar_select %p2922_p12, 1, 0 }
  0x28   : > { %s363_s20 = sor.u32 %s362_s19, %s361_s26  ;;  %p2281_p13 = pneg %p2922_p12 }
  0x29   : > { %p364_p0 = scmp.eq.s32.totalorder %s363_s20, 0  ;;  %s424_s29 = sshll.u32 %s2736_s13, 4  ;;  %s425_s29 = int_to_ptr.vmem [resolvable:$true] %s424_s29 }
  0x2a   : > { %p2932_p1 = pnand %p2916_p11, %p2281_p13  ;;  %s3419_s6 = sld [smem:[#allocation34_spill]] }
  0x2b   : > { %s2937_s22 = scalar_select %p364_p0, %s2706_s15, %s366_s28  }
  0x2c   : > { %p2947_p3 = pneg %p2932_p1 }
  0x2d   : > { %3418 = sst [smem:[#allocation32_spill]] %s2937_s22 }
  0x30   : > { %s2472_s11 = scalar_lea.hbm %s3419_s6, 256 }
  0x31   : > { %p2473_p2 = scmp.ne.s32.totalorder %s3419_s6, %s2472_s11  ;;  %p2479_p7 = scmp.lt.u32.totalorder %s2472_s11, %s3419_s6 }
  0x33   : > { %p2475_p4 = pnand %p2947_p3, %p2473_p2 }
  0x35   : > { %p2476_p5 = pneg %p2475_p4 }
  0x37   : > { %p2481_p9 = pnand %p2479_p7, %p2476_p5 }
  0x39   : > { %2484 = shalt.err (!%p2481_p9)
}
  0x3a   : > { %s2485_s12 = scalar_lea.vmem %s425_s29, 256  ;;  %p2493_p8 = scmp.lt.s32.totalorder %s425_s29, %s425_s29 }
  0x3b   : > { %p2486_p10 = scmp.ne.s32.totalorder %s425_s29, %s2485_s12  ;;  %p2494_p6 = scmp.lt.s32.totalorder %s2485_s12, %s2485_s12 }
  0x3d   : > { %p2488_p13 = pnand %p2486_p10, %p2947_p3  ;;  %p2495_p11 = por %p2494_p6, %p2493_p8 }
  0x3f   : > { %p2489_p0 = pneg %p2488_p13 }
  0x41   : > { %p2496_p12 = pnand %p2495_p11, %p2489_p0 }
  0x43   : > { %2499 = shalt.err (!%p2496_p12)
}
  0x44   : > { %s2737_s14 = smov 64   ;;  %s2738_s27 = smov 4  }
  0x45   : > { %2287 = dma.hbm_to_vmem [thread:$0]  (!%p2932_p1), %s3419_s6, 256, %s425_s29, [#allocation11], %s2737_s14, %s2737_s14, %s2738_s27  }
  0x46   : > { %s2739_s19 = smov [#allocation13]   ;;  %s2500_s21 = scalar_lea.hbm %s3369_s8, 256 }
  0x47   : > { %s448_s13 = sshll.u32 %s2739_s19, 4  ;;  %p2501_p6 = scmp.ne.s32.totalorder %s3369_s8, %s2500_s21  ;;  %s449_s13 = int_to_ptr.vmem [resolvable:$true] %s448_s13 }
  0x48   : > { %p2507_p12 = scmp.lt.u32.totalorder %s2500_s21, %s3369_s8 }
  0x49   : > { %p2503_p8 = pnand %p2501_p6, %p2947_p3 }
  0x4b   : > { %p2504_p11 = pneg %p2503_p8 }
  0x4d   : > { %p2509_p2 = pnand %p2507_p12, %p2504_p11 }
  0x4f   : > { %2512 = shalt.err (!%p2509_p2)
}
  0x50   : > { %s2513_s29 = scalar_lea.vmem %s449_s13, 256  ;;  %p2521_p9 = scmp.lt.s32.totalorder %s449_s13, %s449_s13 }
  0x51   : > { %p2514_p4 = scmp.ne.s32.totalorder %s449_s13, %s2513_s29  ;;  %p2522_p10 = scmp.lt.s32.totalorder %s2513_s29, %s2513_s29 }
  0x53   : > { %p2516_p5 = pnand %p2514_p4, %p2947_p3  ;;  %p2523_p13 = por %p2522_p10, %p2521_p9 }
  0x55   : > { %p2517_p7 = pneg %p2516_p5 }
  0x57   : > { %p2524_p0 = pnand %p2523_p13, %p2517_p7 }
  0x59   : > { %2527 = shalt.err (!%p2524_p0)
}
  0x5a   : > { %2293 = dma.hbm_to_vmem [thread:$0]  (!%p2932_p1), %s3369_s8, 256, %s449_s13, [#allocation14], %s2737_s14, %s2737_s14, %s2738_s27  }
  0x5b   : > { %s2740_s15 = smov [#allocation7]   ;;  %s2741_s22 = smov [#allocation12]  }
  0x5c   : > { %s408_s21 = sshll.u32 %s2740_s15, 4  ;;  %s438_s11 = sshll.u32 %s2741_s22, 4  ;;  %s409_s21 = int_to_ptr.vmem [resolvable:$true] %s408_s21  ;;  %s439_s11 = int_to_ptr.vmem [resolvable:$true] %s438_s11 }
  0x5d   : > { %s2528_s26 = scalar_lea.hbm %s3365_s4, 256 }
  0x5e   : > { %p2529_p6 = scmp.ne.s32.totalorder %s3365_s4, %s2528_s26  ;;  %p2535_p12 = scmp.lt.u32.totalorder %s2528_s26, %s3365_s4 }
  0x60   : > { %p2531_p8 = pnand %p2529_p6, %p2947_p3 }
  0x62   : > { %p2532_p11 = pneg %p2531_p8 }
  0x64   : > { %p2537_p2 = pnand %p2535_p12, %p2532_p11 }
  0x66   : > { %2540 = shalt.err (!%p2537_p2)
}
  0x67   : > { %s2541_s13 = scalar_lea.vmem %s409_s21, 256  ;;  %p2549_p9 = scmp.lt.s32.totalorder %s409_s21, %s409_s21 }
  0x68   : > { %p2542_p4 = scmp.ne.s32.totalorder %s409_s21, %s2541_s13  ;;  %p2550_p10 = scmp.lt.s32.totalorder %s2541_s13, %s2541_s13 }
  0x6a   : > { %p2544_p5 = pnand %p2542_p4, %p2947_p3  ;;  %p2551_p13 = por %p2550_p10, %p2549_p9 }
  0x6c   : > { %p2545_p7 = pneg %p2544_p5 }
  0x6e   : > { %p2552_p0 = pnand %p2551_p13, %p2545_p7 }
  0x70   : > { %2555 = shalt.err (!%p2552_p0)
}
  0x71   : > { %2284 = dma.hbm_to_vmem [thread:$0]  (!%p2932_p1), %s3365_s4, 256, %s409_s21, [#allocation8], %s2737_s14, %s2737_s14, %s2738_s27  }
  0x72   : > { %s2556_s28 = scalar_lea.hbm %s3368_s7, 16 }
  0x73   : > { %p2557_p6 = scmp.ne.s32.totalorder %s3368_s7, %s2556_s28  ;;  %p2563_p12 = scmp.lt.u32.totalorder %s2556_s28, %s3368_s7 }
  0x75   : > { %p2559_p8 = pnand %p2557_p6, %p2947_p3 }
  0x77   : > { %p2560_p11 = pneg %p2559_p8 }
  0x79   : > { %p2565_p2 = pnand %p2563_p12, %p2560_p11 }
  0x7b   : > { %2568 = shalt.err (!%p2565_p2)
}
  0x7c   : > { %s2569_s5 = scalar_lea.vmem %s439_s11, 16  ;;  %s2576_s14 = scalar_lea.vmem %s439_s11, 32 }
  0x7d   : > { %p2570_p4 = scmp.ne.s32.totalorder %s439_s11, %s2569_s5  ;;  %p2577_p9 = scmp.lt.s32.totalorder %s439_s11, %s439_s11 }
  0x7e   : > { %p2578_p10 = scmp.lt.s32.totalorder %s2576_s14, %s2569_s5 }
  0x7f   : > { %p2572_p5 = pnand %p2570_p4, %p2947_p3 }
  0x80   : > { %p2579_p13 = por %p2578_p10, %p2577_p9 }
  0x81   : > { %p2573_p7 = pneg %p2572_p5 }
  0x83   : > { %p2580_p0 = pnand %p2579_p13, %p2573_p7 }
  0x85   : > { %2583 = shalt.err (!%p2580_p0)
}
  0x86   : > { %2290 = dma.hbm_to_vmem [thread:$0]  (!%p2932_p1), %s3368_s7, 16, %s439_s11, [#allocation11]  }
  0x87   : > { %s2742_s13 = smov [#allocation15]   ;;  %s2584_s22 = scalar_lea.hbm %s3370_s9, 16 }
  0x88   : > { %s462_s6 = sshll.u32 %s2742_s13, 4  ;;  %p2585_p6 = scmp.ne.s32.totalorder %s3370_s9, %s2584_s22  ;;  %s463_s6 = int_to_ptr.vmem [resolvable:$true] %s462_s6 }
  0x89   : > { %p2591_p12 = scmp.lt.u32.totalorder %s2584_s22, %s3370_s9 }
  0x8a   : > { %p2587_p8 = pnand %p2585_p6, %p2947_p3 }
  0x8c   : > { %p2588_p11 = pneg %p2587_p8 }
  0x8e   : > { %p2593_p2 = pnand %p2591_p12, %p2588_p11 }
  0x90   : > { %2596 = shalt.err (!%p2593_p2)
}
  0x91   : > { %s2597_s11 = scalar_lea.vmem %s463_s6, 16  ;;  %s2604_s29 = scalar_lea.vmem %s463_s6, 32 }
  0x92   : > { %p2598_p4 = scmp.ne.s32.totalorder %s463_s6, %s2597_s11  ;;  %p2605_p9 = scmp.lt.s32.totalorder %s463_s6, %s463_s6 }
  0x93   : > { %p2606_p10 = scmp.lt.s32.totalorder %s2604_s29, %s2597_s11 }
  0x94   : > { %p2600_p5 = pnand %p2598_p4, %p2947_p3 }
  0x95   : > { %p2607_p13 = por %p2606_p10, %p2605_p9 }
  0x96   : > { %p2601_p7 = pneg %p2600_p5 }
  0x98   : > { %p2608_p0 = pnand %p2607_p13, %p2601_p7 }
  0x9a   : > { %2611 = shalt.err (!%p2608_p0)
}
  0x9b   : > { %2296 = dma.hbm_to_vmem [thread:$0]  (!%p2932_p1), %s3370_s9, 16, %s463_s6, [#allocation14]  }
  0x9c   : > { %p3421_p6 = scmp.ne.s32.totalorder %s3416_s24, 0 }
  0x9d   : > { %p3422_p8 = scmp.ne.s32.totalorder (!%p3421_p6), %s3414_s25, 0 }
  0x9e   : > { %509 = sbr.rel (%p3421_p6) target bundleno = 3420 (0xd5c), region = 76 }
  0xa5   : > { %2681 = dma.done.wait (%p3422_p8), [#allocation8], 256  }
  0xa6   : > { %2683 = vsyncadd (%p3422_p8), [#allocation8], 4294967040 }
  0xa7   : > { %2685 = dma.done.wait (%p3422_p8), [#allocation11], 272  }
  0xa8   : > { %2687 = vsyncadd (%p3422_p8), [#allocation11], 4294967024 }
  0xa9   : > { %2689 = dma.done.wait (%p3422_p8), [#allocation14], 272  }
  0xaa   : > { %2691 = vsyncadd (%p3422_p8), [#allocation14], 4294967024  ;;  %s579_s24 = sand.u32 1, %s2702_s30   ;;  %p582_p1 = scmp.lt.s32.totalorder %s2718_s18, 1 }
  0xab   : > { %s3062_s23 = sshll.u32 %s579_s24, 3  ;;  %p584_p3 = scmp.lt.s32.totalorder %s2714_s17, 1 }
  0xac   : > { %s583_s20 = scalar_select %p582_p1, %s2718_s18, 1 }
  0xad   : > { %s585_s27 = scalar_select %p584_p3, %s2714_s17, 1 }
  0xae   : > { %s2039_s21 = sshll.u32 %s583_s20, 1  ;;  %p592_p11 = scmp.lt.s32.totalorder %s2710_s16, 1 }
  0xaf   : > { %s587_s25 = sadd.s32 %s2039_s21, %s585_s27  ;;  %s581_s29 = scalar_lea.vmem [#allocation16], %s3062_s23 }
  0xb0   : > { %s2040_s13 = sshll.u32 %s587_s25, 3  ;;  %p2043_p12 = scmp.ne.s32.totalorder %s2710_s16, 0 }
  0xb1   : > { %s3071_s15 = scalar_lea.vmem %s3361_s0, %s2040_s13  ;;  %vm604_vm0 = vcmask (!%p2043_p12), 261120   ;;  %vm708_vm1 = vcmask (!%p2043_p12), 7168   ;;  %vm717_vm2 = vcmask (!%p2043_p12), 64512   ;;  %v2418_v7 = vld [vmem:[%s3363_s2] sm:$0xff] (!%p2043_p12)   ;;  %v2743_v8 = vmov (!%p2043_p12), 0.0   ;;  %v2419_v10 = vld [vmem:[%s3363_s2 + $0x8] sm:$0xff] (!%p2043_p12)  }
  0xb2   : > { %s593_s22 = scalar_select %p592_p11, %s2710_s16, 1 }
  0xb3   : > { %602 = sbr.rel (%p2043_p12) target bundleno = 829 (0x33d), region = 100  ;;  %v603_v0 = vld [vmem:[%s3071_s15] sm:$0xff] (!%p2043_p12)  ;;  %2139 = vmatprep.subr.bf16.mxu0 (!%p2043_p12), %v2743_v8  ;;  %v2744_v9 = vmov (!%p2043_p12), -inf   ;;  %713 = vst.msk [vmem:[#allocation5] sm:$0xff] (!%p2043_p12), %vm708_vm1, %v2743_v8  ;;  %714 = vst.msk [vmem:[#allocation5 + $0x8] sm:$0xff] (!%p2043_p12), %vm708_vm1, %v2743_v8  ;;  %vm2745_vm3 = vmmov (!%p2043_p12), 0  }
  0xb4   : > { %s595_s28 = sadd.s32 %s2039_s21, %s593_s22  ;;  %v605_v1 = vsel (!%p2043_p12), %vm604_vm0, %v603_v0, 0.0  ;;  %709 = vst.msk [vmem:[#allocation4] sm:$0xff] (!%p2043_p12), %vm708_vm1, %v2744_v9  ;;  %710 = vst.msk [vmem:[#allocation4 + $0x8] sm:$0xff] (!%p2043_p12), %vm708_vm1, %v2744_v9  ;;  %2140 = vmatpush3.bf16.msra.mxu0 (!%p2043_p12), %v2418_v7  ;;  %2143 = vmatprep.mubr.msk.bf16.mxu0 (!%p2043_p12), %vm2745_vm3, %v2743_v8  ;;  %v2044_v17 = vld [vmem:[%s3364_s3] ss:$0 sm:$0xff] (!%p2043_p12)  ;;  %vm688_vm4 = vcmask (!%p2043_p12), 60416  }
  0xb5   : > { %s2042_s19 = sshll.u32 %s595_s28, 3  ;;  %606 = vadd.xlane.f32.xlu0 (!%p2043_p12), %v605_v1  ;;  %711 = vst.msk [vmem:[#allocation4 + $0x10] sm:$0xff] (!%p2043_p12), %vm708_vm1, %v2744_v9  ;;  %712 = vst.msk [vmem:[#allocation4 + $0x18] sm:$0xff] (!%p2043_p12), %vm708_vm1, %v2744_v9  ;;  %2141 = vmatprep.subr.bf16.mxu0 (!%p2043_p12), %v2743_v8  ;;  %s2746_s13 = smov (!%p2043_p12), 104  }
  0xb6   : > { %s3077_s11 = scalar_lea.vmem %s3362_s1, %s2042_s19  ;;  %715 = vst.msk [vmem:[#allocation5 + $0x10] sm:$0xff] (!%p2043_p12), %vm708_vm1, %v2743_v8  ;;  %716 = vst.msk [vmem:[#allocation5 + $0x18] sm:$0xff] (!%p2043_p12), %vm708_vm1, %v2743_v8  ;;  %s2747_s6 = smov (!%p2043_p12), 120  }
  0xb7   : > { %718 = vst.msk [vmem:[#allocation3] sm:$0xff] (!%p2043_p12), %vm717_vm2, %v2743_v8  ;;  %719 = vst.msk [vmem:[#allocation3 + $0x8] sm:$0xff] (!%p2043_p12), %vm717_vm2, %v2743_v8  ;;  %s2748_s10 = smov (!%p2043_p12), 112  }
  0xb8   : > { %720 = vst.msk [vmem:[#allocation3 + $0x10] sm:$0xff] (!%p2043_p12), %vm717_vm2, %v2743_v8  ;;  %721 = vst.msk [vmem:[#allocation3 + $0x18] sm:$0xff] (!%p2043_p12), %vm717_vm2, %v2743_v8  ;;  %2142 = vmatpush3.bf16.msra.mxu0 (!%p2043_p12), %v2419_v10 }
 0x142   : > { %v607_v2 = vpop.xlane.xlu0 %606 }
 0x143   : > { %v609_v3 = vmul.f32 0.03125, %v607_v2 }
 0x145   : > { %v610_v4 = vsub.f32 %v603_v0, %v609_v3 }
 0x147   : > { %v611_v5 = vmul.f32 %v610_v4, %v610_v4 }
 0x149   : > { %v612_v6 = vsel %vm604_vm0, %v611_v5, 0.0 }
 0x14a   : > { %613 = vadd.xlane.f32.xlu0 %v612_v6 }
 0x1d7   : > { %v614_v11 = vpop.xlane.xlu0 %613 }
 0x1d8   : > { %v615_v12 = vmul.f32 0.03125, %v614_v11 }
 0x1da   : > { %v616_v13 = vadd.f32 1e-05, %v615_v12 }
 0x1dc   : > { %2420 = vrsqrt.f32 %v616_v13 }
 0x1e6   : > { %v2421_v14 = vpop.eup %2420 }
 0x1e7   : > { %v618_v15 = vmul.f32 %v2421_v14, %v610_v4 }
 0x1e9   : > { %v619_v16 = vpack.c.bf16 %v618_v15, %v618_v15 }
 0x1eb   : > { %2144 = vmatmul.mubr.msk.bf16.vlgmr.msra.gmra.mrb[0].mxu0 %vm604_vm0, %v619_v16 }
 0x2be   : > { %v680_v18 = vpop.f32.mrb[0].mxu0 }
 0x2bf   : > { %v681_v19 = vadd.f32 %v2044_v17, %v680_v18  ;;  %v2145_v20 = vpop.f32.mrb[1].mxu0 }
 0x2c0   : > { %v683_v21 = vpop.f32.mrb[2].mxu0 }
 0x2c1   : > { %v686_v22 = vmul.f32 0.35355338, %v681_v19  ;;  %v2146_v23 = vpop.f32.mrb[3].mxu0 }
 0x2c3   : > { %v687_v24 = vpack.c.bf16 %v686_v22, %v686_v22 }
 0x2c5   : > { %703 = vrot.lane.b32.xlu0 %v687_v24, %s2746_s13  ;;  %693 = vrot.lane.b32.xlu1 %v687_v24, %s2747_s6  ;;  %689 = vst.msk [vmem:[#allocation2] sm:$0xf] %vm688_vm4, %v687_v24 }
 0x2c9   : > { %698 = vrot.lane.b32.xlu1 %v687_v24, %s2748_s10 }
 0x337   : > { %v704_v25 = vpop.permute.xlu0 %703  ;;  %v694_v26 = vpop.permute.xlu1 %693 }
 0x338   : > { %707 = vst.msk [vmem:[#allocation2 + $0xc] sm:$0xf] %vm688_vm4, %v704_v25  ;;  %697 = vst.msk [vmem:[#allocation2 + $0x4] sm:$0xf] %vm688_vm4, %v694_v26 }
 0x33b   : > { %v699_v27 = vpop.permute.xlu1 %698 }
 0x33c   : > { %702 = vst.msk [vmem:[#allocation2 + $0x8] sm:$0xf] %vm688_vm4, %v699_v27 }
 0x33d PF: > { %v722_v28 = vld [vmem:[%s3077_s11] sm:$0xff]  ;;  %vm723_vm5 = vcmask 261120   ;;  %v2424_v35 = vld [vmem:[#allocation7] sm:$0xff]   ;;  %v2425_v36 = vld [vmem:[#allocation10] sm:$0xff]   ;;  %v2749_v37 = vmov 0.0   ;;  %vm2750_vm6 = vmmov 0  }
 0x33e   : > { %v724_v29 = vsel %vm723_vm5, %v722_v28, 0.0  ;;  %2147 = vmatprep.subr.bf16.mxu0 %v2749_v37  ;;  %2155 = vmatprep.subr.bf16.mxu1 %v2749_v37  ;;  %v2426_v38 = vld [vmem:[#allocation7 + $0x8] sm:$0xff]   ;;  %v2427_v39 = vld [vmem:[#allocation10 + $0x8] sm:$0xff]   ;;  %s3423_s19 = sld [smem:[#allocation33_spill]]  ;;  %v2053_v47 = vld [vmem:[#allocation12] ss:$0 sm:$0xff] }
 0x33f   : > { %725 = vadd.xlane.f32.xlu0 %v724_v29  ;;  %2148 = vmatpush3.bf16.msra.mxu0 %v2424_v35  ;;  %vm871_vm7 = vcmask 64512   ;;  %vm953_vm8 = vcmask 1043456   ;;  %s2751_s26 = smov 104   ;;  %s2752_s12 = smov 120   ;;  %v870_v62 = vld [vmem:[#allocation2] sm:$0xf] }
 0x340   : > { %2156 = vmatpush3.bf16.msra.mxu1 %v2425_v36  ;;  %2149 = vmatprep.subr.bf16.mxu0 %v2749_v37  ;;  %s2753_s11 = smov 112   ;;  %v1001_v2 = vld [vmem:[#allocation2 + $0x4] sm:$0xf]  ;;  %v1273_v7 = vld [vmem:[#allocation2 + $0xc] sm:$0xf]  ;;  %v2754_v13 = vmov 0  }
 0x341   : > { %2157 = vmatprep.subr.bf16.mxu1 %v2749_v37  ;;  %2151 = vmatprep.mubr.msk.bf16.mxu0 %vm2750_vm6, %v2749_v37  ;;  %v918_v29 = vld [vmem:[#allocation4] sm:$0xff]  ;;  %vm940_vm9 = vcmask 7168   ;;  %p2065_p2 = scmp.ne.s32.totalorder %s2710_s16, 1 }
 0x342   : > { %2159 = vmatprep.mubr.msk.bf16.mxu1 %vm2750_vm6, %v2749_v37  ;;  %2422 = vset.pattern.permute.xlu1 %v2754_v13  ;;  %vm2757_vm10 = vmmov (!%p2065_p2), 0   ;;  %s2758_s16 = smov (!%p2065_p2), 8   ;;  %s2759_s5 = smov (!%p2065_p2), 16   ;;  %vm1460_vm11 = vcmask (!%p2065_p2), 130048   ;;  %vm1462_vm12 = vcmask (!%p2065_p2), 195584   ;;  %vm1649_vm13 = vcmask (!%p2065_p2), 523264  }
 0x343   : > { %2150 = vmatpush3.bf16.msra.mxu0 %v2426_v38  ;;  %v1138_v5 = vld [vmem:[#allocation2 + $0x8] sm:$0xf]  ;;  %2423 = vset.pattern.permute.xlu0 %v2754_v13  ;;  %s2760_s14 = smov (!%p2065_p2), 24   ;;  %s3424_s21 = sld [smem:[#allocation35_spill]] (!%p2065_p2) }
 0x344   : > { %2158 = vmatpush3.bf16.msra.mxu1 %v2427_v39  ;;  %2163 = vmatprep.subr.bf16.mxu0 %v2749_v37  ;;  %v2049_v46 = vld [vmem:[%s3423_s19] ss:$0 sm:$0xff]  ;;  %s2761_s13 = smov (!%p2065_p2), 64   ;;  %s3428_s27 = sld [smem:[#allocation38_spill]] (!%p2065_p2) }
 0x345   : > { %2169 = vmatprep.subr.bf16.mxu1 %v2749_v37  ;;  %v1188_v39 = vld [vmem:[#allocation4 + $0x10] sm:$0xff] }
 0x349   : > { %s3425_s25 = smov (!%p2065_p2), %s3424_s21 }
 0x3cc   : > { %v726_v30 = vpop.xlane.xlu0 %725 }
 0x3cd   : > { %v728_v31 = vmul.f32 0.03125, %v726_v30 }
 0x3cf   : > { %v729_v32 = vsub.f32 %v722_v28, %v728_v31 }
 0x3d1   : > { %v730_v33 = vmul.f32 %v729_v32, %v729_v32 }
 0x3d3   : > { %v731_v34 = vsel %vm723_vm5, %v730_v33, 0.0 }
 0x3d4   : > { %732 = vadd.xlane.f32.xlu0 %v731_v34  ;;  %v1052_v34 = vld [vmem:[#allocation4 + $0x8] sm:$0xff] }
 0x461   : > { %v733_v40 = vpop.xlane.xlu0 %732 }
 0x462   : > { %v734_v41 = vmul.f32 0.03125, %v733_v40 }
 0x464   : > { %v735_v42 = vadd.f32 1e-05, %v734_v41 }
 0x466   : > { %2428 = vrsqrt.f32 %v735_v42  ;;  %v1323_v42 = vld [vmem:[#allocation4 + $0x18] sm:$0xff] }
 0x470   : > { %v2429_v43 = vpop.eup %2428 }
 0x471   : > { %v737_v44 = vmul.f32 %v2429_v43, %v729_v32 }
 0x473   : > { %v738_v45 = vpack.c.bf16 %v737_v44, %v737_v44 }
 0x475   : > { %2152 = vmatmul.mubr.msk.bf16.vlgmr.msra.gmra.mrb[0].mxu0 %vm723_vm5, %v738_v45  ;;  %2160 = vmatmul.mubr.msk.bf16.vlgmr.msra.gmra.mrb[0].mxu1 %vm723_vm5, %v738_v45 }
 0x476   : > { %2165 = vmatprep.mubr.msk.bf16.mxu0 %vm2750_vm6, %v2749_v37  ;;  %2171 = vmatprep.mubr.msk.bf16.mxu1 %vm2750_vm6, %v2749_v37 }
 0x548   : > { %v799_v48 = vpop.f32.mrb[0].mxu0  ;;  %v863_v49 = vpop.f32.mrb[0].mxu1 }
 0x549   : > { %v800_v50 = vadd.f32 %v2049_v46, %v799_v48  ;;  %v864_v51 = vadd.f32 %v2053_v47, %v863_v49  ;;  %v2153_v52 = vpop.f32.mrb[1].mxu0  ;;  %v2161_v53 = vpop.f32.mrb[1].mxu1 }
 0x54a   : > { %v802_v54 = vpop.f32.mrb[2].mxu0  ;;  %v866_v55 = vpop.f32.mrb[2].mxu1 }
 0x54b   : > { %v805_v56 = vpack.c.bf16 %v800_v50, %v800_v50  ;;  %v3120_v57 = vpack.c.bf16 %v864_v51, %v864_v51  ;;  %v2154_v58 = vpop.f32.mrb[3].mxu0  ;;  %v2162_v59 = vpop.f32.mrb[3].mxu1 }
 0x54d   : > { %1274 = vrot.lane.b32.xlu0 %v805_v56, %s2751_s26  ;;  %1003 = vrot.lane.b32.xlu1 %v805_v56, %s2752_s12  ;;  %v876_v60 = vsel %vm871_vm7, %v805_v56, 0  ;;  %v955_v61 = vsel %vm953_vm8, %v3120_v57, 0 }
 0x54e   : > { %2164 = vmatpush3.bf16.xpose.msra.mxu0 %v876_v60  ;;  %2170 = vmatpush3.bf16.msra.mxu1 %v955_v61 }
 0x54f   : > { %2175 = vmatprep.subr.bf16.mxu0 %v2749_v37  ;;  %2181 = vmatprep.subr.bf16.mxu1 %v2749_v37 }
 0x551   : > { %1139 = vrot.lane.b32.xlu1 %v805_v56, %s2753_s11 }
 0x555   : > { %2166 = vmatmul.mubr.msk.bf16.vlgmr.msra.gmra.mrb[4].mxu0 %vm871_vm7, %v870_v62 }
 0x556   : > { %2177 = vmatprep.mubr.msk.bf16.mxu0 %vm2750_vm6, %v2749_v37 }
 0x5bf   : > { %v1004_v63 = vpop.permute.xlu1 %1003  ;;  %v1275_v4 = vpop.permute.xlu0 %1274 }
 0x5c0   : > { %v1009_v0 = vsel %vm871_vm7, %v1004_v63, 0  ;;  %v1280_v6 = vsel %vm871_vm7, %v1275_v4, 0 }
 0x5c1   : > { %2176 = vmatpush3.bf16.xpose.msra.mxu0 %v1009_v0 }
 0x5c2   : > { %2187 = vmatprep.subr.bf16.mxu0 %v2749_v37 }
 0x5c3   : > { %v1140_v1 = vpop.permute.xlu1 %1139 }
 0x5c4   : > { %v1145_v3 = vsel %vm871_vm7, %v1140_v1, 0 }
 0x5c8   : > { %2178 = vmatmul.mubr.msk.bf16.vlgmr.msra.gmra.mrb[8].mxu0 %vm871_vm7, %v1001_v2 }
 0x5c9   : > { %2188 = vmatpush3.bf16.xpose.msra.mxu0 %v1145_v3  ;;  %2189 = vmatprep.mubr.msk.bf16.mxu0 %vm2750_vm6, %v2749_v37 }
 0x5ca   : > { %2199 = vmatprep.subr.bf16.mxu0 %v2749_v37 }
 0x5d0   : > { %2190 = vmatmul.mubr.msk.bf16.vlgmr.msra.gmra.mrb[12].mxu0 %vm871_vm7, %v1138_v5 }
 0x5d1   : > { %2200 = vmatpush3.bf16.xpose.msra.mxu0 %v1280_v6  ;;  %2201 = vmatprep.mubr.msk.bf16.mxu0 %vm2750_vm6, %v2749_v37 }
 0x5d8   : > { %2202 = vmatmul.mubr.msk.bf16.vlgmr.msra.gmra.mrb[16].mxu0 %vm871_vm7, %v1273_v7 }
 0x628   : > { %v912_v8 = vpop.f32.mrb[4].mxu0 }
 0x629   : > { %v919_v9 = vsel %vm871_vm7, %v912_v8, -inf  ;;  %v2167_v10 = vpop.f32.mrb[5].mxu0 }
 0x62a   : > { %920 = vmax.xlane.f32.xlu1 %v919_v9  ;;  %v915_v11 = vpop.f32.mrb[6].mxu0 }
 0x62b   : > { %v2168_v12 = vpop.f32.mrb[7].mxu0 }
 0x69b   : > { %v3146_v14 = vpop.f32.mrb[8].mxu0 }
 0x69c   : > { %v2179_v15 = vpop.f32.mrb[9].mxu0  ;;  %v1053_v16 = vsel %vm871_vm7, %v3146_v14, -inf }
 0x69d   : > { %1054 = vmax.xlane.f32.xlu0 %v1053_v16  ;;  %v1048_v17 = vpop.f32.mrb[10].mxu0 }
 0x69e   : > { %v2180_v18 = vpop.f32.mrb[11].mxu0 }
 0x6a3   : > { %v3150_v19 = vpop.f32.mrb[12].mxu0 }
 0x6a4   : > { %v2191_v20 = vpop.f32.mrb[13].mxu0  ;;  %v1189_v21 = vsel %vm871_vm7, %v3150_v19, -inf }
 0x6a5   : > { %1190 = vmax.xlane.f32.xlu1 %v1189_v21  ;;  %v1184_v22 = vpop.f32.mrb[14].mxu0 }
 0x6a6   : > { %v2192_v23 = vpop.f32.mrb[15].mxu0  ;;  %v934_v22 = vld [vmem:[#allocation5] sm:$0xff] }
 0x6ab   : > { %v3154_v24 = vpop.f32.mrb[16].mxu0 }
 0x6ac   : > { %v2203_v25 = vpop.f32.mrb[17].mxu0  ;;  %v1324_v26 = vsel %vm871_vm7, %v3154_v24, -inf }
 0x6ad   : > { %1325 = vmax.xlane.f32.xlu1 %v1324_v26  ;;  %v1319_v27 = vpop.f32.mrb[18].mxu0  ;;  %v942_v26 = vld [vmem:[#allocation3] sm:$0xff] }
 0x6ae   : > { %v2204_v28 = vpop.f32.mrb[19].mxu0 }
 0x6b7   : > { %v921_v30 = vpop.xlane.xlu1 %920 }
 0x6b8   : > { %v922_v31 = vmax.f32 %v918_v29, %v921_v30 }
 0x6ba   : > { %v923_v32 = vsub.f32 %v918_v29, %v922_v31  ;;  %999 = vst.msk [vmem:[#allocation4] sm:$0xff] %vm940_vm9, %v922_v31 }
 0x6bc   : > { %v924_v33 = vmul.f32 1.442695, %v923_v32 }
 0x6be   : > { %928 = vperm.xlu1 %2422, %v922_v31   ;;  %2430 = vpow2.f32 %v924_v33  ;;  %v1069_v33 = vld [vmem:[#allocation5 + $0x8] sm:$0xff] }
 0x6c8   : > { %v3160_v38 = vpop.eup %2430 }
 0x6c9   : > { %v935_v23 = vmul.f32 %v3160_v38, %v934_v22 }
 0x72a   : > { %v1055_v35 = vpop.xlane.xlu0 %1054 }
 0x72b   : > { %v1056_v36 = vmax.f32 %v1052_v34, %v1055_v35 }
 0x72d   : > { %1136 = vst.msk [vmem:[#allocation4 + $0x8] sm:$0xff] %vm940_vm9, %v1056_v36  ;;  %1062 = vperm.xlu0 %2423, %v1056_v36   ;;  %v1057_v43 = vsub.f32 %v1052_v34, %v1056_v36 }
 0x72f   : > { %v1058_v46 = vmul.f32 1.442695, %v1057_v43 }
 0x731   : > { %945 = vperm.xlu0 %2423, %v3160_v38   ;;  %2432 = vpow2.f32 %v1058_v46  ;;  %v1205_v38 = vld [vmem:[#allocation5 + $0x10] sm:$0xff]  ;;  %v1077_v46 = vld [vmem:[#allocation3 + $0x8] sm:$0xff] }
 0x732   : > { %v1191_v40 = vpop.xlane.xlu1 %1190 }
 0x733   : > { %v1192_v41 = vmax.f32 %v1188_v39, %v1191_v40 }
 0x735   : > { %1271 = vst.msk [vmem:[#allocation4 + $0x10] sm:$0xff] %vm940_vm9, %v1192_v41  ;;  %1198 = vperm.xlu1 %2422, %v1192_v41   ;;  %v1193_v47 = vsub.f32 %v1188_v39, %v1192_v41 }
 0x737   : > { %v1194_v51 = vmul.f32 1.442695, %v1193_v47 }
 0x73a   : > { %v1326_v44 = vpop.xlane.xlu1 %1325 }
 0x73b   : > { %v1327_v45 = vmax.f32 %v1323_v42, %v1326_v44  ;;  %v3171_v52 = vpop.eup %2432 }
 0x73c   : > { %v1070_v34 = vmul.f32 %v3171_v52, %v1069_v33 }
 0x73d   : > { %1406 = vst.msk [vmem:[#allocation4 + $0x18] sm:$0xff] %vm940_vm9, %v1327_v45  ;;  %1333 = vperm.xlu1 %2422, %v1327_v45   ;;  %v1328_v56 = vsub.f32 %v1323_v42, %v1327_v45  ;;  %v1340_v42 = vld [vmem:[#allocation5 + $0x18] sm:$0xff] }
 0x73e   : > { %v929_v48 = vpop.permute.xlu1 %928 }
 0x73f   : > { %v931_v49 = vsub.f32 %v912_v8, %v929_v48 }
 0x741   : > { %v932_v50 = vmul.f32 1.442695, %v931_v49  ;;  %1086 = vrot.lane.b32.xlu1 %v3120_v57, %s2752_s12 }
 0x743   : > { %2434 = vpow2.f32 %v932_v50 }
 0x744   : > { %2436 = vpow2.f32 %v1194_v51 }
 0x745   : > { %1221 = vrot.lane.b32.xlu1 %v3120_v57, %s2753_s11  ;;  %s3426_s11 = sld [smem:[#allocation36_spill]] (!%p2065_p2) }
 0x749   : > { %1356 = vrot.lane.b32.xlu1 %v3120_v57, %s2751_s26  ;;  %v1329_v57 = vmul.f32 1.442695, %v1328_v56 }
 0x74b   : > { %2438 = vpow2.f32 %v1329_v57 }
 0x74d   : > { %v2435_v53 = vpop.eup %2434  ;;  %1080 = vperm.xlu1 %2422, %v3171_v52  }
 0x74e   : > { %v949_v54 = vpack.c.bf16 %v2435_v53, %v2435_v53  ;;  %v3174_v55 = vpop.eup %2436  ;;  %v936_v58 = vsel %vm871_vm7, %v2435_v53, 0.0  ;;  %v1213_v53 = vld [vmem:[#allocation3 + $0x10] sm:$0xff] }
 0x74f   : > { %v1206_v39 = vmul.f32 %v3174_v55, %v1205_v38 }
 0x750   : > { %2172 = vmatmul.mubr.msk.bf16.vlgmr.msra.gmra.mrb[4].mxu1 %vm871_vm7, %v949_v54 }
 0x751   : > { %1216 = vperm.xlu1 %2422, %v3174_v55   ;;  %2183 = vmatprep.mubr.msk.bf16.mxu1 %vm2750_vm6, %v2749_v37 }
 0x755   : > { %v3181_v59 = vpop.eup %2438 }
 0x756   : > { %v1341_v43 = vmul.f32 %v3181_v59, %v1340_v42 }
 0x775   : > { %937 = vadd.xlane.f32.xlu1 %v936_v58 }
 0x786   : > { %1351 = vperm.xlu1 %2422, %v3181_v59  }
 0x7ac   : > { %v1063_v60 = vpop.permute.xlu0 %1062 }
 0x7ad   : > { %v1065_v61 = vsub.f32 %v3146_v14, %v1063_v60  ;;  %v1348_v60 = vld [vmem:[#allocation3 + $0x18] sm:$0xff] }
 0x7af   : > { %v1066_v62 = vmul.f32 1.442695, %v1065_v61 }
 0x7b0   : > { %v946_v27 = vpop.permute.xlu0 %945 }
 0x7b1   : > { %2440 = vpow2.f32 %v1066_v62  ;;  %v948_v28 = vmul.f32 %v946_v27, %v942_v26 }
 0x7b4   : > { %v1199_v63 = vpop.permute.xlu1 %1198 }
 0x7b5   : > { %v1201_v0 = vsub.f32 %v3150_v19, %v1199_v63 }
 0x7b7   : > { %v1202_v1 = vmul.f32 1.442695, %v1201_v0 }
 0x7b9   : > { %2442 = vpow2.f32 %v1202_v1 }
 0x7bb   : > { %v2441_v2 = vpop.eup %2440 }
 0x7bc   : > { %v1334_v3 = vpop.permute.xlu1 %1333  ;;  %v1071_v4 = vsel %vm871_vm7, %v2441_v2, 0.0  ;;  %v1084_v10 = vpack.c.bf16 %v2441_v2, %v2441_v2 }
 0x7bd   : > { %v1336_v5 = vsub.f32 %v3154_v24, %v1334_v3  ;;  %1072 = vadd.xlane.f32.xlu0 %v1071_v4 }
 0x7bf   : > { %v1337_v6 = vmul.f32 1.442695, %v1336_v5 }
 0x7c0   : > { %v1087_v7 = vpop.permute.xlu1 %1086 }
 0x7c1   : > { %2444 = vpow2.f32 %v1337_v6  ;;  %v1092_v8 = vsel %vm953_vm8, %v1087_v7, 0  ;;  %v2755_v7 = vmov (!%p2065_p2), 0  }
 0x7c2   : > { %2182 = vmatpush3.bf16.msra.mxu1 %v1092_v8  ;;  %2446 = vset.pattern.permute.xlu0 (!%p2065_p2), %v2755_v7 }
 0x7c3   : > { %v2443_v9 = vpop.eup %2442  ;;  %2193 = vmatprep.subr.bf16.mxu1 %v2749_v37  ;;  %2447 = vset.pattern.permute.xlu1 (!%p2065_p2), %v2755_v7 }
 0x7c4   : > { %v1222_v11 = vpop.permute.xlu1 %1221  ;;  %v1207_v12 = vsel %vm871_vm7, %v2443_v9, 0.0  ;;  %v1220_v16 = vpack.c.bf16 %v2443_v9, %v2443_v9 }
 0x7c5   : > { %v1227_v13 = vsel %vm953_vm8, %v1222_v11, 0  ;;  %1208 = vadd.xlane.f32.xlu0 %v1207_v12  ;;  %2184 = vmatmul.mubr.msk.bf16.vlgmr.msra.gmra.mrb[8].mxu1 %vm871_vm7, %v1084_v10 }
 0x7c6   : > { %2194 = vmatpush3.bf16.msra.mxu1 %v1227_v13  ;;  %2195 = vmatprep.mubr.msk.bf16.mxu1 %vm2750_vm6, %v2749_v37  ;;  %v2448_v13 = vld [vmem:[#allocation13] sm:$0xff] (!%p2065_p2)  }
 0x7c7   : > { %2205 = vmatprep.subr.bf16.mxu1 %v2749_v37 }
 0x7c8   : > { %v1357_v14 = vpop.permute.xlu1 %1356 }
 0x7c9   : > { %v1362_v18 = vsel %vm953_vm8, %v1357_v14, 0  ;;  %v2756_v14 = vmov (!%p2065_p2), 0.0  }
 0x7ca   : > { %2211 = vmatprep.subr.bf16.mxu0 (!%p2065_p2), %v2756_v14  ;;  %1547 = vst.msk [vmem:[#allocation6] sm:$0xff] (!%p2065_p2), %vm723_vm5, %v2756_v14  ;;  %2215 = vmatprep.mubr.msk.bf16.mxu0 (!%p2065_p2), %vm2757_vm10, %v2756_v14 }
 0x7cb   : > { %v2445_v15 = vpop.eup %2444  ;;  %2212 = vmatpush3.bf16.msra.mxu0 (!%p2065_p2), %v2448_v13 }
 0x7cc   : > { %v1342_v17 = vsel %vm871_vm7, %v2445_v15, 0.0  ;;  %v1355_v19 = vpack.c.bf16 %v2445_v15, %v2445_v15  ;;  %v1081_v20 = vpop.permute.xlu1 %1080  ;;  %2213 = vmatprep.subr.bf16.mxu0 (!%p2065_p2), %v2756_v14  ;;  %v2449_v15 = vld [vmem:[#allocation13 + $0x8] sm:$0xff] (!%p2065_p2)  }
 0x7cd   : > { %1343 = vadd.xlane.f32.xlu0 %v1342_v17  ;;  %2196 = vmatmul.mubr.msk.bf16.vlgmr.msra.gmra.mrb[12].mxu1 %vm871_vm7, %v1220_v16  ;;  %v1083_v47 = vmul.f32 %v1081_v20, %v1077_v46 }
 0x7ce   : > { %2206 = vmatpush3.bf16.msra.mxu1 %v1362_v18  ;;  %2207 = vmatprep.mubr.msk.bf16.mxu1 %vm2750_vm6, %v2749_v37 }
 0x7cf   : > { %2219 = vmatprep.subr.bf16.mxu1 (!%p2065_p2), %v2756_v14  ;;  %2214 = vmatpush3.bf16.msra.mxu0 (!%p2065_p2), %v2449_v15 }
 0x7d0   : > { %v1217_v21 = vpop.permute.xlu1 %1216  ;;  %2227 = vmatprep.subr.bf16.mxu0 (!%p2065_p2), %v2756_v14 }
 0x7d1   : > { %v1219_v54 = vmul.f32 %v1217_v21, %v1213_v53  ;;  %v2079_v53 = vld [vmem:[%s3426_s11] ss:$0 sm:$0xff] (!%p2065_p2) }
 0x7d5   : > { %2208 = vmatmul.mubr.msk.bf16.vlgmr.msra.gmra.mrb[16].mxu1 %vm871_vm7, %v1355_v19 }
 0x7d6   : > { %2223 = vmatprep.mubr.msk.bf16.mxu1 (!%p2065_p2), %vm2757_vm10, %v2756_v14 }
 0x802   : > { %v938_v24 = vpop.xlane.xlu1 %937 }
 0x803   : > { %v939_v25 = vadd.f32 %v938_v24, %v935_v23 }
 0x805   : > { %941 = vst.msk [vmem:[#allocation5] sm:$0xff] %vm940_vm9, %v939_v25 }
 0x806   : > { %v1352_v61 = vpop.permute.xlu1 %1351 }
 0x807   : > { %v1354_v62 = vmul.f32 %v1352_v61, %v1348_v60 }
 0x80c   : > { %v1412_v8 = vld [vmem:[#allocation5] sm:$0xff] (!%p2065_p2) }
 0x823   : > { %v991_v29 = vpop.f32.mrb[4].mxu1 }
 0x824   : > { %v997_v30 = vadd.f32 %v991_v29, %v948_v28  ;;  %v2173_v31 = vpop.f32.mrb[5].mxu1 }
 0x825   : > { %v994_v32 = vpop.f32.mrb[6].mxu1 }
 0x826   : > { %998 = vst.msk [vmem:[#allocation3] sm:$0xff] %vm871_vm7, %v997_v30  ;;  %v2174_v37 = vpop.f32.mrb[7].mxu1 }
 0x82d   : > { %v1411_v26 = vld [vmem:[#allocation3] sm:$0xff] (!%p2065_p2) }
 0x84a   : > { %v1073_v35 = vpop.xlane.xlu0 %1072 }
 0x84b   : > { %v1074_v36 = vadd.f32 %v1073_v35, %v1070_v34  ;;  %v2066_v34 = vld [vmem:[#allocation15] ss:$0 sm:$0xff] (!%p2065_p2) }
 0x84d   : > { %1075 = vst.msk [vmem:[#allocation5 + $0x8] sm:$0xff] %vm940_vm9, %v1074_v36  ;;  %v1531_v36 = vld [vmem:[%s3071_s15] sm:$0xff] (!%p2065_p2) }
 0x852   : > { %v1209_v40 = vpop.xlane.xlu0 %1208 }
 0x853   : > { %v1210_v41 = vadd.f32 %v1209_v40, %v1206_v39 }
 0x854   : > { %v1421_v4 = vld [vmem:[#allocation5 + $0x8] sm:$0xff] (!%p2065_p2) }
 0x855   : > { %1211 = vst.msk [vmem:[#allocation5 + $0x10] sm:$0xff] %vm940_vm9, %v1210_v41  ;;  %2462 = vrcp.f32 (!%p2065_p2), %v1421_v4 }
 0x85a   : > { %v1344_v44 = vpop.xlane.xlu0 %1343 }
 0x85b   : > { %v1345_v45 = vadd.f32 %v1344_v44, %v1341_v43  ;;  %v2451_v44 = vld [vmem:[%s3424_s21 + $0x8] sm:$0xff] (!%p2065_p2)  }
 0x85c   : > { %v1430_v6 = vld [vmem:[#allocation5 + $0x10] sm:$0xff] (!%p2065_p2) }
 0x85d   : > { %1346 = vst.msk [vmem:[#allocation5 + $0x18] sm:$0xff] %vm940_vm9, %v1345_v45 }
 0x85f   : > { %v2463_v9 = vpop.eup (!%p2065_p2), %2462 }
 0x860   : > { %1425 = vperm.xlu0 (!%p2065_p2), %2446, %v2463_v9  }
 0x864   : > { %v1439_v5 = vld [vmem:[#allocation5 + $0x18] sm:$0xff] (!%p2065_p2) }
 0x865   : > { %2464 = vrcp.f32 (!%p2065_p2), %v1439_v5 }
 0x866   : > { %2466 = vrcp.f32 (!%p2065_p2), %v1430_v6 }
 0x867   : > { %2468 = vrcp.f32 (!%p2065_p2), %v1412_v8 }
 0x86f   : > { %v2465_v10 = vpop.eup (!%p2065_p2), %2464 }
 0x870   : > { %v2467_v11 = vpop.eup (!%p2065_p2), %2466  ;;  %1443 = vperm.xlu1 (!%p2065_p2), %2447, %v2465_v10  }
 0x871   : > { %v2469_v12 = vpop.eup (!%p2065_p2), %2468  ;;  %1434 = vperm.xlu0 (!%p2065_p2), %2446, %v2467_v11  }
 0x874   : > { %1416 = vperm.xlu1 (!%p2065_p2), %2447, %v2469_v12  }
 0x898   : > { %v1128_v48 = vpop.f32.mrb[8].mxu1 }
 0x899   : > { %v1134_v49 = vadd.f32 %v1128_v48, %v1083_v47  ;;  %v2185_v50 = vpop.f32.mrb[9].mxu1 }
 0x89a   : > { %v1131_v51 = vpop.f32.mrb[10].mxu1  ;;  %v2450_v50 = vld [vmem:[%s3425_s25] sm:$0xff] (!%p2065_p2)  }
 0x89b   : > { %1135 = vst.msk [vmem:[#allocation3 + $0x8] sm:$0xff] %vm871_vm7, %v1134_v49  ;;  %v2186_v52 = vpop.f32.mrb[11].mxu1  ;;  %v2452_v51 = vld [vmem:[%s3425_s25] sm:$0xff] (!%p2065_p2)  }
 0x89c   : > { %2220 = vmatpush3.bf16.msra.mxu1 (!%p2065_p2), %v2452_v51  ;;  %v2453_v52 = vld [vmem:[%s3425_s25 + $0x8] sm:$0xff] (!%p2065_p2)  }
 0x89d   : > { %2221 = vmatprep.subr.bf16.mxu1 (!%p2065_p2), %v2756_v14 }
 0x8a0   : > { %v1263_v55 = vpop.f32.mrb[12].mxu1  ;;  %2222 = vmatpush3.bf16.msra.mxu1 (!%p2065_p2), %v2453_v52 }
 0x8a1   : > { %v1269_v56 = vadd.f32 %v1263_v55, %v1219_v54  ;;  %v2197_v58 = vpop.f32.mrb[13].mxu1  ;;  %2239 = vmatprep.subr.bf16.mxu1 (!%p2065_p2), %v2756_v14 }
 0x8a2   : > { %v1266_v57 = vpop.f32.mrb[14].mxu1  ;;  %v1420_v16 = vld [vmem:[#allocation3 + $0x8] sm:$0xff] (!%p2065_p2) }
 0x8a3   : > { %1270 = vst.msk [vmem:[#allocation3 + $0x10] sm:$0xff] %vm871_vm7, %v1269_v56  ;;  %v2198_v59 = vpop.f32.mrb[15].mxu1 }
 0x8a5   : > { %1410 = sbr.rel (%p2065_p2) target bundleno = 3392 (0xd40), region = 104 }
 0x8a8   : > { %v1398_v63 = vpop.f32.mrb[16].mxu1 }
 0x8a9   : > { %v1404_v0 = vadd.f32 %v1398_v63, %v1354_v62  ;;  %v2209_v1 = vpop.f32.mrb[17].mxu1 }
 0x8aa   : > { %v1401_v2 = vpop.f32.mrb[18].mxu1  ;;  %v1429_v21 = vld [vmem:[#allocation3 + $0x10] sm:$0xff] (!%p2065_p2) }
 0x8ab   : > { %1405 = vst.msk [vmem:[#allocation3 + $0x18] sm:$0xff] %vm871_vm7, %v1404_v0  ;;  %v2210_v3 = vpop.f32.mrb[19].mxu1 }
 0x8b2   : > { %v1438_v18 = vld [vmem:[#allocation3 + $0x18] sm:$0xff] }
 0x8df   : > { %v1426_v17 = vpop.permute.xlu0 %1425 }
 0x8e0   : > { %v1428_v19 = vmul.f32 %v1426_v17, %v1420_v16 }
 0x8e2   : > { %1448 = vrot.lane.b32.xlu0 %v1428_v19, %s2758_s16 }
 0x8ef   : > { %v1444_v20 = vpop.permute.xlu1 %1443 }
 0x8f0   : > { %v1446_v22 = vmul.f32 %v1444_v20, %v1438_v18  ;;  %v1435_v23 = vpop.permute.xlu0 %1434 }
 0x8f1   : > { %v1437_v24 = vmul.f32 %v1435_v23, %v1429_v21  ;;  %v1615_v21 = vld [vmem:[#allocation6] sm:$0xff] }
 0x8f2   : > { %1456 = vrot.lane.b32.xlu0 %v1446_v22, %s2760_s14  ;;  %s3427_s14 = sld [smem:[#allocation37_spill]] }
 0x8f3   : > { %1452 = vrot.lane.b32.xlu1 %v1437_v24, %s2759_s5  ;;  %v1417_v25 = vpop.permute.xlu1 %1416 }
 0x8f4   : > { %v1419_v28 = vmul.f32 %v1417_v25, %v1411_v26 }
 0x8f8   : > { %v2454_v54 = vld [vmem:[%s3427_s14] sm:$0xff]   ;;  %v2455_v55 = vld [vmem:[%s3427_s14 + $0x8] sm:$0xff]   ;;  %v2456_v0 = vld [vmem:[%s3427_s14 + $0x10] sm:$0xff]  }
 0x8f9   : > { %v2457_v1 = vld [vmem:[%s3427_s14 + $0x20] sm:$0xff]   ;;  %v2458_v2 = vld [vmem:[%s3427_s14 + $0x18] sm:$0xff]   ;;  %v2459_v3 = vld [vmem:[%s3427_s14 + $0x28] sm:$0xff]  }
 0x8fa   : > { %v2460_v4 = vld [vmem:[%s3427_s14 + $0x30] sm:$0xff]   ;;  %v2461_v5 = vld [vmem:[%s3427_s14 + $0x38] sm:$0xff]  }
 0x954   : > { %v1449_v27 = vpop.permute.xlu0 %1448 }
 0x955   : > { %v1459_v29 = vsel %vm871_vm7, %v1419_v28, %v1449_v27 }
 0x964   : > { %v1457_v31 = vpop.permute.xlu0 %1456 }
 0x965   : > { %v1453_v30 = vpop.permute.xlu1 %1452 }
 0x966   : > { %v1461_v32 = vsel %vm1460_vm11, %v1459_v29, %v1453_v30 }
 0x967   : > { %v1463_v37 = vsel %vm1462_vm12, %v1461_v32, %v1457_v31 }
 0x968   : > { %v1464_v33 = vpack.c.bf16 %v1463_v37, %v1463_v37 }
 0x96a   : > { %2216 = vmatmul.mubr.msk.bf16.vlgmr.msra.gmra.mrb[0].mxu0 %vm723_vm5, %v1464_v33  ;;  %v2088_v33 = vld [vmem:[%s3428_s27] ss:$0 sm:$0xff] }
 0x96b   : > { %2235 = vmatprep.mubr.msk.bf16.mxu0 %vm2757_vm10, %v2756_v14  ;;  %2228 = vmatpush3.bf16.msra.mxu0 %v2454_v54 }
 0x96c   : > { %2229 = vmatprep.subr.bf16.mxu0 %v2756_v14 }
 0x96f   : > { %2230 = vmatpush3.bf16.msra.mxu0 %v2455_v55 }
 0x970   : > { %2231 = vmatprep.subr.bf16.mxu0 %v2756_v14 }
 0x973   : > { %2232 = vmatpush3.bf16.msra.mxu0 %v2456_v0 }
 0x974   : > { %2233 = vmatprep.subr.bf16.mxu0 %v2756_v14 }
 0x977   : > { %2234 = vmatpush3.bf16.msra.mxu0 %v2458_v2 }
 0xa3d   : > { %v1525_v35 = vpop.f32.mrb[0].mxu0 }
 0xa3e   : > { %v1526_v38 = vadd.f32 %v2066_v34, %v1525_v35  ;;  %v2217_v39 = vpop.f32.mrb[1].mxu0 }
 0xa3f   : > { %v1528_v40 = vpop.f32.mrb[2].mxu0 }
 0xa40   : > { %v3230_v41 = vadd.f32 %v1531_v36, %v1526_v38  ;;  %v2218_v42 = vpop.f32.mrb[3].mxu0 }
 0xa42   : > { %v1533_v43 = vsel %vm723_vm5, %v3230_v41, 0.0 }
 0xa43   : > { %1534 = vadd.xlane.f32.xlu1 %v1533_v43 }
 0xa54   : > { %1717 = vrot.lane.b32.xlu1 %v2451_v44, %s2761_s13 }
 0xa58   : > { %1721 = vrot.lane.b32.xlu1 %v2079_v53, %s2761_s13 }
 0xad0   : > { %v1535_v45 = vpop.xlane.xlu1 %1534 }
 0xad1   : > { %v1536_v46 = vmul.f32 0.03125, %v1535_v45 }
 0xad3   : > { %v1537_v47 = vsub.f32 %v3230_v41, %v1536_v46 }
 0xad4   : > { %v1718_v63 = vpop.permute.xlu1 %1717 }
 0xad5   : > { %v1538_v48 = vmul.f32 %v1537_v47, %v1537_v47 }
 0xad7   : > { %v1539_v49 = vsel %vm723_vm5, %v1538_v48, 0.0 }
 0xad8   : > { %1540 = vadd.xlane.f32.xlu0 %v1539_v49  ;;  %v1722_v13 = vpop.permute.xlu1 %1721 }
 0xaee   : > { %1715 = vrot.lane.b32.xlu0 %v2450_v50, %s2761_s13 }
 0xb65   : > { %v1541_v56 = vpop.xlane.xlu0 %1540 }
 0xb66   : > { %v1542_v58 = vmul.f32 0.03125, %v1541_v56 }
 0xb68   : > { %v1543_v57 = vadd.f32 1e-05, %v1542_v58 }
 0xb69   : > { %v1716_v62 = vpop.permute.xlu0 %1715 }
 0xb6a   : > { %2470 = vrsqrt.f32 %v1543_v57 }
 0xb74   : > { %v2471_v59 = vpop.eup %2470 }
 0xb75   : > { %v1545_v60 = vmul.f32 %v2471_v59, %v1537_v47 }
 0xb77   : > { %v1546_v61 = vpack.c.bf16 %v1545_v60, %v1545_v60 }
 0xb79   : > { %2224 = vmatmul.mubr.msk.bf16.vlgmr.msra.gmra.mrb[0].mxu1 %vm723_vm5, %v1546_v61 }
 0xb7a   : > { %2240 = vmatpush3.bf16.msra.mxu1 %v1716_v62  ;;  %2243 = vmatprep.mubr.msk.bf16.mxu1 %vm2757_vm10, %v2756_v14 }
 0xb7b   : > { %2241 = vmatprep.subr.bf16.mxu1 %v2756_v14 }
 0xb7e   : > { %2242 = vmatpush3.bf16.msra.mxu1 %v1718_v63 }
 0xb7f   : > { %2247 = vmatprep.subr.bf16.mxu1 %v2756_v14 }
 0xb81   : > { %2244 = vmatmul.mubr.msk.bf16.vlgmr.msra.gmra.mrb[4].mxu1 %vm723_vm5, %v1546_v61 }
 0xb82   : > { %2255 = vmatprep.mubr.msk.bf16.mxu1 %vm2757_vm10, %v2756_v14  ;;  %2248 = vmatpush3.bf16.msra.mxu1 %v2457_v1 }
 0xb83   : > { %2249 = vmatprep.subr.bf16.mxu1 %v2756_v14 }
 0xb86   : > { %2250 = vmatpush3.bf16.msra.mxu1 %v2459_v3 }
 0xb87   : > { %2251 = vmatprep.subr.bf16.mxu1 %v2756_v14 }
 0xb8a   : > { %2252 = vmatpush3.bf16.msra.mxu1 %v2460_v4 }
 0xb8b   : > { %2253 = vmatprep.subr.bf16.mxu1 %v2756_v14 }
 0xb8e   : > { %2254 = vmatpush3.bf16.msra.mxu1 %v2461_v5 }
 0xc4c   : > { %v1608_v6 = vpop.f32.mrb[0].mxu1 }
 0xc4d   : > { %v1609_v7 = vadd.f32 %v2079_v53, %v1608_v6  ;;  %v2225_v8 = vpop.f32.mrb[1].mxu1 }
 0xc4e   : > { %v1611_v9 = vpop.f32.mrb[2].mxu1 }
 0xc4f   : > { %v1614_v10 = vmax.f32 %v1609_v7, 0.0  ;;  %v2226_v11 = vpop.f32.mrb[3].mxu1 }
 0xc51   : > { %v1616_v12 = vpack.c.bf16 %v1614_v10, %v1614_v10 }
 0xc53   : > { %2236 = vmatmul.mubr.msk.bf16.vlgmr.msra.gmra.mrb[4].mxu0 %vm1649_vm13, %v1616_v12 }
 0xc54   : > { %v1758_v15 = vpop.f32.mrb[4].mxu1 }
 0xc55   : > { %v1759_v16 = vadd.f32 %v1758_v15, %v1722_v13  ;;  %v2245_v17 = vpop.f32.mrb[5].mxu1 }
 0xc56   : > { %v1761_v18 = vpop.f32.mrb[6].mxu1 }
 0xc57   : > { %v1764_v14 = vmax.f32 %v1759_v16, 0.0  ;;  %v2246_v19 = vpop.f32.mrb[7].mxu1 }
 0xc59   : > { %v1766_v20 = vpack.c.bf16 %v1764_v14, %v1764_v14 }
 0xc5b   : > { %2256 = vmatmul.mubr.msk.bf16.vlgmr.msra.gmra.mrb[8].mxu1 %vm1649_vm13, %v1766_v20 }
 0xd26   : > { %v1687_v22 = vpop.f32.mrb[4].mxu0 }
 0xd27   : > { %v1693_v23 = vadd.f32 %v1687_v22, %v1615_v21  ;;  %v2237_v24 = vpop.f32.mrb[5].mxu0 }
 0xd28   : > { %v1690_v25 = vpop.f32.mrb[6].mxu0 }
 0xd29   : > { %1694 = vst.msk [vmem:[#allocation6] sm:$0xff] %vm723_vm5, %v1693_v23  ;;  %v2238_v26 = vpop.f32.mrb[7].mxu0 }
 0xd2e   : > { %v1836_v27 = vpop.f32.mrb[8].mxu1 }
 0xd2f   : > { %v2257_v28 = vpop.f32.mrb[9].mxu1 }
 0xd30   : > { %v1765_v29 = vld [vmem:[#allocation6] sm:$0xff]  ;;  %v1839_v30 = vpop.f32.mrb[10].mxu1 }
 0xd31   : > { %v1842_v31 = vadd.f32 %v1836_v27, %v1765_v29  ;;  %v2258_v32 = vpop.f32.mrb[11].mxu1 }
 0xd33   : > { %1843 = vst.msk [vmem:[#allocation6] sm:$0xff] %vm723_vm5, %v1842_v31 }
 0xd3a   : > { %v1844_v37 = vld [vmem:[#allocation6] sm:$0xff] }
 0xd3b   : > { %v1845_v34 = vadd.f32 %v1844_v37, %v3230_v41 }
 0xd3d   : > { %v1853_v35 = vadd.f32 %v2088_v33, %v1845_v34 }
 0xd3f   : > { %1854 = vst.msk [vmem:[%s581_s29] sm:$0xff] %vm723_vm5, %v1853_v35 }
 0xd40 PF: > { %s3429_s21 = sld [smem:[#allocation28_spill]]  ;;  %s2090_s13 = sshll.u32 %s2718_s18, 1 }
 0xd41   : > { %s1867_s15 = sadd.s32 %s2714_s17, %s2090_s13  ;;  %s1871_s6 = sshll.u32 %s581_s29, 4  ;;  %s3304_s6 = int_to_ptr.vmem [resolvable:$true] %s1871_s6 }
 0xd42   : > { %s2091_s10 = sshll.u32 %s1867_s15, 7  ;;  %s3430_s19 = sld [smem:[#allocation39_spill]] }
 0xd43   : > { %s1856_s11 = scalar_lea.sflag [#allocation9], %s579_s24  ;;  %s2612_s16 = scalar_lea.vmem %s3304_s6, 128 }
 0xd44   : > { %p2613_p4 = scmp.ne.s32.totalorder %s3304_s6, %s2612_s16  ;;  %s2762_s17 = smov [#allocation16]  }
 0xd45   : > { %s2616_s18 = sshll.u32 %s2762_s17, 4  ;;  %s2617_s18 = int_to_ptr.vmem [resolvable:$false] %s2616_s18 }
 0xd46   : > { %p3432_p5 = scmp.ne.s32.totalorder %s3429_s21, 0  ;;  %s2618_s23 = scalar_lea.vmem %s2617_s18, 256 }
 0xd47   : > { %p2619_p10 = scmp.lt.s32.totalorder %s3304_s6, %s2617_s18  ;;  %p2620_p13 = scmp.lt.s32.totalorder %s2618_s23, %s2612_s16 }
 0xd48   : > { %s3431_s26 = smov %s3430_s19  ;;  %s1869_s12 = scalar_lea.hbm %s3430_s19, %s2091_s10 }
 0xd49   : > { %p2614_p7 = pnand %p2613_p4, %p3432_p5  ;;  %p2621_p0 = por %p2620_p13, %p2619_p10 }
 0xd4b   : > { %p2615_p9 = pneg %p2614_p7 }
 0xd4d   : > { %p2622_p6 = pnand %p2621_p0, %p2615_p9 }
 0xd4f   : > { %2625 = shalt.err (!%p2622_p6)
}
 0xd50   : > { %s2626_s29 = scalar_lea.hbm %s1869_s12, 128  ;;  %s2630_s20 = scalar_lea.hbm %s3431_s26, 512 }
 0xd51   : > { %p2627_p8 = scmp.ne.s32.totalorder %s1869_s12, %s2626_s29  ;;  %p2631_p11 = scmp.lt.u32.totalorder %s1869_s12, %s3431_s26 }
 0xd52   : > { %p2632_p12 = scmp.lt.u32.totalorder %s2630_s20, %s2626_s29  ;;  %p2634_p4 = scmp.lt.u32.totalorder %s2626_s29, %s1869_s12 }
 0xd53   : > { %p2628_p1 = pnand %p2627_p8, %p3432_p5 }
 0xd54   : > { %p2633_p2 = por %p2632_p12, %p2631_p11 }
 0xd55   : > { %p2629_p3 = pneg %p2628_p1 }
 0xd56   : > { %p2635_p7 = por %p2634_p4, %p2633_p2 }
 0xd58   : > { %p2636_p9 = pnand %p2635_p7, %p2629_p3 }
 0xd5a   : > { %2639 = shalt.err (!%p2636_p9)
}
 0xd5b   : > { %2279 = dma.vmem_to_hbm [thread:$0]  (%p3432_p5), %s3304_s6, 128, %s1869_s12, %s1856_s11  }
 0xd5c PF: > { %s3433_s15 = sld [smem:[#allocation26_spill]]  ;;  %s3434_s10 = sld [smem:[#allocation21_spill]] }
 0xd5d   : > { %s3435_s22 = sld [smem:[#allocation30_spill]] }
 0xd62   : > { %p2311_p10 = scmp.ge.s32.totalorder %s3433_s15, 2  ;;  %s1883_s28 = sand.u32 1, %s3434_s10  }
 0xd63   : > { %p3436_p13 = scmp.ne.s32.totalorder %s3435_s22, 0  ;;  %s1884_s19 = scalar_lea.sflag [#allocation9], %s1883_s28 }
 0xd65   : > { %p2298_p0 = pnand %p2311_p10, %p3436_p13 }
 0xd67   : > { %2693 = dma.done.wait (!%p2298_p0), %s1884_s19, 128  }
 0xd68   : > { %2695 = vsyncadd (!%p2298_p0), %s1884_s19, 4294967168  ;;  %s30_s22 = sadd.s32 1, %s3433_s15   ;;  %s3437_s16 = sld [smem:[#allocation22_spill]] }
 0xd69   : > { %p27_p6 = scmp.ge.s32.totalorder %s30_s22, 10   ;;  %s3438_s15 = sld [smem:[#allocation32_spill]] }
 0xd6a   : > { %s3439_s21 = sld [smem:[#allocation23_spill]]  ;;  %s3440_s17 = sld [smem:[#allocation24_spill]] }
 0xd6b   : > { %s3441_s18 = sld [smem:[#allocation25_spill]]  ;;  %s3442_s19 = sld [smem:[#allocation27_spill]] }
 0xd6c   : > { %s3443_s20 = sld [smem:[#allocation29_spill]]  ;;  %s3444_s6 = sld [smem:[#allocation31_spill]] }
 0xd6d   : > { %s3445_s29 = smov %s2702_s30  ;;  %29 = sbr.rel (!%p27_p6) target bundleno = 17 (0x11), region = 158 }
 0xd6e   : > { %s3446_s30 = smov %s3437_s16 }
 0xd70   : > { %s3447_s16 = smov %s3439_s21 }
 0xd72   : > { %s3448_s21 = smov %s3444_s6 }
 0xd74   :  { %1889 = vsyncpa [#allocation8], 1 }
 0xd75   :  { %1891 = vsyncpa [#allocation8 + $0x1], 1 }
 0xd76   :  { %1892 = vsyncpa [#allocation11], 1 }
 0xd77   :  { %1893 = vsyncpa [#allocation14], 1 }
 0xd78   :  { %1894 = vsyncpa [#allocation9], 1 }
 0xd79   :  { %1896 = vsyncpa [#allocation9 + $0x1], 1 }

// kernel: tpu_custom_call.1
= control target key start
LH: loop header
LB: loop body
LE: loop exit
PB: predicated region body
PF: predicated region fallthrough
CT: control target
= control target key end

     0   :  { %s3361_s0 = inlined_call_operand.vmem [shape: f32[2,16,32], index: 0, kind: input, shape index: {}]   ;;  %s3362_s1 = inlined_call_operand.vmem [shape: f32[2,16,32], index: 1, kind: input, shape index: {}]   ;;  %s3363_s2 = inlined_call_operand.vmem [shape: bf16[32,32], index: 2, kind: input, shape index: {}]   ;;  %s3364_s3 = inlined_call_operand.vmem [shape: f32[1,32], index: 3, kind: input, shape index: {}]   ;;  %s3365_s4 = inlined_call_operand.hbm [shape: bf16[32,32], index: 4, kind: input, shape index: {}]   ;;  %s3366_s5 = inlined_call_operand.vmem [shape: f32[1,32], index: 5, kind: input, shape index: {}]   ;;  %s3367_s6 = inlined_call_operand.hbm [shape: bf16[32,32], index: 6, kind: input, shape index: {}]   ;;  %s3368_s7 = inlined_call_operand.hbm [shape: f32[1,32], index: 7, kind: input, shape index: {}]   ;;  %s3369_s8 = inlined_call_operand.hbm [shape: bf16[32,32], index: 8, kind: input, shape index: {}]   ;;  %s3370_s9 = inlined_call_operand.hbm [shape: f32[1,32], index: 9, kind: input, shape index: {}]   ;;  %s3371_s10 = inlined_call_operand.vmem [shape: bf16[32,128], index: 10, kind: input, shape index: {}]   ;;  %s3372_s11 = inlined_call_operand.vmem [shape: f32[1,128], index: 11, kind: input, shape index: {}]   ;;  %s3373_s12 = inlined_call_operand.vmem [shape: bf16[128,32], index: 12, kind: input, shape index: {}]   ;;  %s3374_s13 = inlined_call_operand.vmem [shape: f32[1,32], index: 13, kind: input, shape index: {}]   ;;  %s3375_s14 = inlined_call_operand.hbm [shape: f32[2,16,32], index: 14, kind: output, shape index: {}]  }
   0x1   :  { %3395 = sst [smem:[#allocation33_spill]] %s3366_s5 }
   0x2   :  { %3396 = sst [smem:[#allocation34_spill]] %s3367_s6 }
   0x3   :  { %3397 = sst [smem:[#allocation35_spill]] %s3371_s10 }
   0x4   :  { %3398 = sst [smem:[#allocation36_spill]] %s3372_s11 }
   0x5   :  { %3399 = sst [smem:[#allocation37_spill]] %s3373_s12 }
   0x6   :  { %3400 = sst [smem:[#allocation38_spill]] %s3374_s13 }
   0x7   :  { %3401 = sst [smem:[#allocation39_spill]] %s3375_s14 }
   0x8   :  { %19 = vsyncpa [#allocation8], 0 }
   0x9   :  { %20 = vsyncpa [#allocation11], 0 }
   0xa   :  { %21 = vsyncpa [#allocation14], 0 }
   0xb   :  { %22 = vsyncpa [#allocation9], 0 }
   0xc   :  { %24 = vsyncpa [#allocation9 + $0x1], 0  ;;  %s2838_s29 = smov 0   ;;  %s2840_s30 = smov 0  }
   0xd   :  { %s2842_s15 = smov 0   ;;  %s2844_s16 = smov 0  }
   0xe   :  { %s2846_s17 = smov 0   ;;  %s2848_s18 = smov 0  }
   0xf   :  { %s2850_s19 = smov 0   ;;  %s2852_s20 = smov 0  }
  0x10   :  { %s2854_s21 = smov 0   ;;  %s2856_s22 = smov 0  }
  0x11 LB: > { %3402 = sst [smem:[#allocation21_spill]] %s2698_s29  ;;  %s2023_s23 = sadd.s32 4294967295, %s2734_s22   ;;  %s2734_s22 = sphi %s2856_s22, %s30_s22   ;;  %s2730_s21 = sphi %s2854_s21, %s3448_s21   ;;  %s2726_s20 = sphi %s2852_s20, %s3443_s20   ;;  %s2722_s19 = sphi %s2850_s19, %s3442_s19   ;;  %s2718_s18 = sphi %s2848_s18, %s3441_s18   ;;  %s2714_s17 = sphi %s2846_s17, %s3440_s17   ;;  %s2710_s16 = sphi %s2844_s16, %s3447_s16   ;;  %s2706_s15 = sphi %s2842_s15, %s3438_s15   ;;  %s2702_s30 = sphi %s2840_s30, %s3446_s30   ;;  %s2698_s29 = sphi %s2838_s29, %s3445_s29  }
  0x12   : > { %3403 = sst [smem:[#allocation22_spill]] %s2706_s15  ;;  %s2024_s24 = sadd.s32 4294967294, %s2734_s22  }
  0x13   : > { %3404 = sst [smem:[#allocation23_spill]] %s2722_s19  ;;  %s42_s25 = sadd.s32 1, %s2722_s19 }
  0x14   : > { %3405 = sst [smem:[#allocation24_spill]] %s2726_s20  ;;  %s45_s26 = sadd.s32 1, %s2726_s20 }
  0x15   : > { %3406 = sst [smem:[#allocation25_spill]] %s2730_s21  ;;  %p43_p0 = scmp.ge.s32.totalorder %s42_s25, 2 }
  0x16   : > { %3407 = sst [smem:[#allocation26_spill]] %s2734_s22  ;;  %s49_s27 = sadd.s32 1, %s2730_s21 }
  0x17   : > { %s366_s28 = sadd.s32 1, %s2706_s15  ;;  %p376_p1 = scmp.ne.s32.totalorder %s2706_s15, %s2702_s30 }
  0x18   : > { %s3450_s25 = smov (%p43_p0, %s42_s25), 0  ;;  %s3452_s26 = smov (!%p43_p0, %s45_s26), %s2726_s20 }
  0x19   : > { %3408 = sst [smem:[#allocation27_spill]] %s3450_s25  ;;  %p377_p2 = scmp.eq.s32.totalorder %s2023_s23, 7 }
  0x1a   : > { %p382_p3 = scmp.ne.s32.totalorder %s2702_s30, %s2698_s29  ;;  %p47_p4 = scmp.ge.s32.totalorder %s3452_s26, 2 }
  0x1b   : > { %p383_p5 = scmp.eq.s32.totalorder %s2024_s24, 7  ;;  %p2901_p6 = por %p377_p2, %p376_p1 }
  0x1c   : > { %p2025_p7 = scmp.ge.s32.totalorder %s2734_s22, 1  ;;  %s3454_s26 = smov (%p47_p4, %s3452_s26), 0 }
  0x1d   : > { %s3409_s14 = scalar_select %p2901_p6, 1, 0 }
  0x1e   : > { %3411 = sst [smem:[#allocation29_spill]] %s3454_s26  ;;  %s3456_s27 = smov (!%p47_p4, %s49_s27), %s2730_s21 }
  0x1f   : > { %3410 = sst [smem:[#allocation28_spill]] %s3409_s14  ;;  %s362_s19 = ssub.s32 %s2726_s20, %s3454_s26 }
  0x20   : > { %p2911_p8 = por %p383_p5, %p382_p3  ;;  %p51_p9 = scmp.ge.s32.totalorder %s3456_s27, 2 }
  0x21   : > { %p390_p10 = scmp.lt.s32.totalorder %s2734_s22, 9  ;;  %p2916_p11 = scmp.eq.s32.totalorder %s2023_s23, 0 }
  0x22   : > { %s3412_s13 = scalar_select %p2911_p8, 1, 0 }
  0x23   : > { %s3414_s25 = scalar_select %p2916_p11, 1, 0 }
  0x24   : > { %3413 = sst [smem:[#allocation30_spill]] %s3412_s13  ;;  %s3458_s27 = smov (%p51_p9, %s3456_s27), 0 }
  0x25   : > { %3415 = sst [smem:[#allocation31_spill]] %s3458_s27  ;;  %p2922_p12 = pnand %p2025_p7, %p390_p10 }
  0x26   : > { %s361_s26 = ssub.s32 %s2730_s21, %s3458_s27  ;;  %s2736_s13 = smov [#allocation10]  }
  0x27   : > { %s3416_s24 = scalar_select %p2922_p12, 1, 0 }
  0x28   : > { %s363_s20 = sor.u32 %s362_s19, %s361_s26  ;;  %p2281_p13 = pneg %p2922_p12 }
  0x29   : > { %p364_p0 = scmp.eq.s32.totalorder %s363_s20, 0  ;;  %s424_s29 = sshll.u32 %s2736_s13, 4  ;;  %s425_s29 = int_to_ptr.vmem [resolvable:$true] %s424_s29 }
  0x2a   : > { %p2932_p1 = pnand %p2916_p11, %p2281_p13  ;;  %s3419_s6 = sld [smem:[#allocation34_spill]] }
  0x2b   : > { %s2937_s22 = scalar_select %p364_p0, %s2706_s15, %s366_s28  }
  0x2c   : > { %p2947_p3 = pneg %p2932_p1 }
  0x2d   : > { %3418 = sst [smem:[#allocation32_spill]] %s2937_s22 }
  0x30   : > { %s2472_s11 = scalar_lea.hbm %s3419_s6, 256 }
  0x31   : > { %p2473_p2 = scmp.ne.s32.totalorder %s3419_s6, %s2472_s11  ;;  %p2479_p7 = scmp.lt.u32.totalorder %s2472_s11, %s3419_s6 }
  0x33   : > { %p2475_p4 = pnand %p2947_p3, %p2473_p2 }
  0x35   : > { %p2476_p5 = pneg %p2475_p4 }
  0x37   : > { %p2481_p9 = pnand %p2479_p7, %p2476_p5 }
  0x39   : > { %2484 = shalt.err (!%p2481_p9)
}
  0x3a   : > { %s2485_s12 = scalar_lea.vmem %s425_s29, 256  ;;  %p2493_p8 = scmp.lt.s32.totalorder %s425_s29, %s425_s29 }
  0x3b   : > { %p2486_p10 = scmp.ne.s32.totalorder %s425_s29, %s2485_s12  ;;  %p2494_p6 = scmp.lt.s32.totalorder %s2485_s12, %s2485_s12 }
  0x3d   : > { %p2488_p13 = pnand %p2486_p10, %p2947_p3  ;;  %p2495_p11 = por %p2494_p6, %p2493_p8 }
  0x3f   : > { %p2489_p0 = pneg %p2488_p13 }
  0x41   : > { %p2496_p12 = pnand %p2495_p11, %p2489_p0 }
  0x43   : > { %2499 = shalt.err (!%p2496_p12)
}
  0x44   : > { %s2737_s14 = smov 64   ;;  %s2738_s27 = smov 4  }
  0x45   : > { %2287 = dma.hbm_to_vmem [thread:$0]  (!%p2932_p1), %s3419_s6, 256, %s425_s29, [#allocation11], %s2737_s14, %s2737_s14, %s2738_s27  }
  0x46   : > { %s2739_s19 = smov [#allocation13]   ;;  %s2500_s21 = scalar_lea.hbm %s3369_s8, 256 }
  0x47   : > { %s448_s13 = sshll.u32 %s2739_s19, 4  ;;  %p2501_p6 = scmp.ne.s32.totalorder %s3369_s8, %s2500_s21  ;;  %s449_s13 = int_to_ptr.vmem [resolvable:$true] %s448_s13 }
  0x48   : > { %p2507_p12 = scmp.lt.u32.totalorder %s2500_s21, %s3369_s8 }
  0x49   : > { %p2503_p8 = pnand %p2501_p6, %p2947_p3 }
  0x4b   : > { %p2504_p11 = pneg %p2503_p8 }
  0x4d   : > { %p2509_p2 = pnand %p2507_p12, %p2504_p11 }
  0x4f   : > { %2512 = shalt.err (!%p2509_p2)
}
  0x50   : > { %s2513_s29 = scalar_lea.vmem %s449_s13, 256  ;;  %p2521_p9 = scmp.lt.s32.totalorder %s449_s13, %s449_s13 }
  0x51   : > { %p2514_p4 = scmp.ne.s32.totalorder %s449_s13, %s2513_s29  ;;  %p2522_p10 = scmp.lt.s32.totalorder %s2513_s29, %s2513_s29 }
  0x53   : > { %p2516_p5 = pnand %p2514_p4, %p2947_p3  ;;  %p2523_p13 = por %p2522_p10, %p2521_p9 }
  0x55   : > { %p2517_p7 = pneg %p2516_p5 }
  0x57   : > { %p2524_p0 = pnand %p2523_p13, %p2517_p7 }
  0x59   : > { %2527 = shalt.err (!%p2524_p0)
}
  0x5a   : > { %2293 = dma.hbm_to_vmem [thread:$0]  (!%p2932_p1), %s3369_s8, 256, %s449_s13, [#allocation14], %s2737_s14, %s2737_s14, %s2738_s27  }
  0x5b   : > { %s2740_s15 = smov [#allocation7]   ;;  %s2741_s22 = smov [#allocation12]  }
  0x5c   : > { %s408_s21 = sshll.u32 %s2740_s15, 4  ;;  %s438_s11 = sshll.u32 %s2741_s22, 4  ;;  %s409_s21 = int_to_ptr.vmem [resolvable:$true] %s408_s21  ;;  %s439_s11 = int_to_ptr.vmem [resolvable:$true] %s438_s11 }
  0x5d   : > { %s2528_s26 = scalar_lea.hbm %s3365_s4, 256 }
  0x5e   : > { %p2529_p6 = scmp.ne.s32.totalorder %s3365_s4, %s2528_s26  ;;  %p2535_p12 = scmp.lt.u32.totalorder %s2528_s26, %s3365_s4 }
  0x60   : > { %p2531_p8 = pnand %p2529_p6, %p2947_p3 }
  0x62   : > { %p2532_p11 = pneg %p2531_p8 }
  0x64   : > { %p2537_p2 = pnand %p2535_p12, %p2532_p11 }
  0x66   : > { %2540 = shalt.err (!%p2537_p2)
}
  0x67   : > { %s2541_s13 = scalar_lea.vmem %s409_s21, 256  ;;  %p2549_p9 = scmp.lt.s32.totalorder %s409_s21, %s409_s21 }
  0x68   : > { %p2542_p4 = scmp.ne.s32.totalorder %s409_s21, %s2541_s13  ;;  %p2550_p10 = scmp.lt.s32.totalorder %s2541_s13, %s2541_s13 }
  0x6a   : > { %p2544_p5 = pnand %p2542_p4, %p2947_p3  ;;  %p2551_p13 = por %p2550_p10, %p2549_p9 }
  0x6c   : > { %p2545_p7 = pneg %p2544_p5 }
  0x6e   : > { %p2552_p0 = pnand %p2551_p13, %p2545_p7 }
  0x70   : > { %2555 = shalt.err (!%p2552_p0)
}
  0x71   : > { %2284 = dma.hbm_to_vmem [thread:$0]  (!%p2932_p1), %s3365_s4, 256, %s409_s21, [#allocation8], %s2737_s14, %s2737_s14, %s2738_s27  }
  0x72   : > { %s2556_s28 = scalar_lea.hbm %s3368_s7, 16 }
  0x73   : > { %p2557_p6 = scmp.ne.s32.totalorder %s3368_s7, %s2556_s28  ;;  %p2563_p12 = scmp.lt.u32.totalorder %s2556_s28, %s3368_s7 }
  0x75   : > { %p2559_p8 = pnand %p2557_p6, %p2947_p3 }
  0x77   : > { %p2560_p11 = pneg %p2559_p8 }
  0x79   : > { %p2565_p2 = pnand %p2563_p12, %p2560_p11 }
  0x7b   : > { %2568 = shalt.err (!%p2565_p2)
}
  0x7c   : > { %s2569_s5 = scalar_lea.vmem %s439_s11, 16  ;;  %s2576_s14 = scalar_lea.vmem %s439_s11, 32 }
  0x7d   : > { %p2570_p4 = scmp.ne.s32.totalorder %s439_s11, %s2569_s5  ;;  %p2577_p9 = scmp.lt.s32.totalorder %s439_s11, %s439_s11 }
  0x7e   : > { %p2578_p10 = scmp.lt.s32.totalorder %s2576_s14, %s2569_s5 }
  0x7f   : > { %p2572_p5 = pnand %p2570_p4, %p2947_p3 }
  0x80   : > { %p2579_p13 = por %p2578_p10, %p2577_p9 }
  0x81   : > { %p2573_p7 = pneg %p2572_p5 }
  0x83   : > { %p2580_p0 = pnand %p2579_p13, %p2573_p7 }
  0x85   : > { %2583 = shalt.err (!%p2580_p0)
}
  0x86   : > { %2290 = dma.hbm_to_vmem [thread:$0]  (!%p2932_p1), %s3368_s7, 16, %s439_s11, [#allocation11]  }
  0x87   : > { %s2742_s13 = smov [#allocation15]   ;;  %s2584_s22 = scalar_lea.hbm %s3370_s9, 16 }
  0x88   : > { %s462_s6 = sshll.u32 %s2742_s13, 4  ;;  %p2585_p6 = scmp.ne.s32.totalorder %s3370_s9, %s2584_s22  ;;  %s463_s6 = int_to_ptr.vmem [resolvable:$true] %s462_s6 }
  0x89   : > { %p2591_p12 = scmp.lt.u32.totalorder %s2584_s22, %s3370_s9 }
  0x8a   : > { %p2587_p8 = pnand %p2585_p6, %p2947_p3 }
  0x8c   : > { %p2588_p11 = pneg %p2587_p8 }
  0x8e   : > { %p2593_p2 = pnand %p2591_p12, %p2588_p11 }
  0x90   : > { %2596 = shalt.err (!%p2593_p2)
}
  0x91   : > { %s2597_s11 = scalar_lea.vmem %s463_s6, 16  ;;  %s2604_s29 = scalar_lea.vmem %s463_s6, 32 }
  0x92   : > { %p2598_p4 = scmp.ne.s32.totalorder %s463_s6, %s2597_s11  ;;  %p2605_p9 = scmp.lt.s32.totalorder %s463_s6, %s463_s6 }
  0x93   : > { %p2606_p10 = scmp.lt.s32.totalorder %s2604_s29, %s2597_s11 }
  0x94   : > { %p2600_p5 = pnand %p2598_p4, %p2947_p3 }
  0x95   : > { %p2607_p13 = por %p2606_p10, %p2605_p9 }
  0x96   : > { %p2601_p7 = pneg %p2600_p5 }
  0x98   : > { %p2608_p0 = pnand %p2607_p13, %p2601_p7 }
  0x9a   : > { %2611 = shalt.err (!%p2608_p0)
}
  0x9b   : > { %2296 = dma.hbm_to_vmem [thread:$0]  (!%p2932_p1), %s3370_s9, 16, %s463_s6, [#allocation14]  }
  0x9c   : > { %p3421_p6 = scmp.ne.s32.totalorder %s3416_s24, 0 }
  0x9d   : > { %p3422_p8 = scmp.ne.s32.totalorder (!%p3421_p6), %s3414_s25, 0 }
  0x9e   : > { %509 = sbr.rel (%p3421_p6) target bundleno = 3420 (0xd5c), region = 76 }
  0xa5   : > { %2681 = dma.done.wait (%p3422_p8), [#allocation8], 256  }
  0xa6   : > { %2683 = vsyncadd (%p3422_p8), [#allocation8], 4294967040 }
  0xa7   : > { %2685 = dma.done.wait (%p3422_p8), [#allocation11], 272  }
  0xa8   : > { %2687 = vsyncadd (%p3422_p8), [#allocation11], 4294967024 }
  0xa9   : > { %2689 = dma.done.wait (%p3422_p8), [#allocation14], 272  }
  0xaa   : > { %2691 = vsyncadd (%p3422_p8), [#allocation14], 4294967024  ;;  %s579_s24 = sand.u32 1, %s2702_s30   ;;  %p582_p1 = scmp.lt.s32.totalorder %s2718_s18, 1 }
  0xab   : > { %s3062_s23 = sshll.u32 %s579_s24, 3  ;;  %p584_p3 = scmp.lt.s32.totalorder %s2714_s17, 1 }
  0xac   : > { %s583_s20 = scalar_select %p582_p1, %s2718_s18, 1 }
  0xad   : > { %s585_s27 = scalar_select %p584_p3, %s2714_s17, 1 }
  0xae   : > { %s2039_s21 = sshll.u32 %s583_s20, 1  ;;  %p592_p11 = scmp.lt.s32.totalorder %s2710_s16, 1 }
  0xaf   : > { %s587_s25 = sadd.s32 %s2039_s21, %s585_s27  ;;  %s581_s29 = scalar_lea.vmem [#allocation16], %s3062_s23 }
  0xb0   : > { %s2040_s13 = sshll.u32 %s587_s25, 3  ;;  %p2043_p12 = scmp.ne.s32.totalorder %s2710_s16, 0 }
  0xb1   : > { %s3071_s15 = scalar_lea.vmem %s3361_s0, %s2040_s13  ;;  %vm604_vm0 = vcmask (!%p2043_p12), 261120   ;;  %vm708_vm1 = vcmask (!%p2043_p12), 7168   ;;  %vm717_vm2 = vcmask (!%p2043_p12), 64512   ;;  %v2418_v7 = vld [vmem:[%s3363_s2] sm:$0xff] (!%p2043_p12)   ;;  %v2743_v8 = vmov (!%p2043_p12), 0.0   ;;  %v2419_v10 = vld [vmem:[%s3363_s2 + $0x8] sm:$0xff] (!%p2043_p12)  }
  0xb2   : > { %s593_s22 = scalar_select %p592_p11, %s2710_s16, 1 }
  0xb3   : > { %602 = sbr.rel (%p2043_p12) target bundleno = 829 (0x33d), region = 100  ;;  %v603_v0 = vld [vmem:[%s3071_s15] sm:$0xff] (!%p2043_p12)  ;;  %2139 = vmatprep.subr.bf16.mxu0 (!%p2043_p12), %v2743_v8  ;;  %v2744_v9 = vmov (!%p2043_p12), -inf   ;;  %713 = vst.msk [vmem:[#allocation5] sm:$0xff] (!%p2043_p12), %vm708_vm1, %v2743_v8  ;;  %714 = vst.msk [vmem:[#allocation5 + $0x8] sm:$0xff] (!%p2043_p12), %vm708_vm1, %v2743_v8  ;;  %vm2745_vm3 = vmmov (!%p2043_p12), 0  }
  0xb4   : > { %s595_s28 = sadd.s32 %s2039_s21, %s593_s22  ;;  %v605_v1 = vsel (!%p2043_p12), %vm604_vm0, %v603_v0, 0.0  ;;  %709 = vst.msk [vmem:[#allocation4] sm:$0xff] (!%p2043_p12), %vm708_vm1, %v2744_v9  ;;  %710 = vst.msk [vmem:[#allocation4 + $0x8] sm:$0xff] (!%p2043_p12), %vm708_vm1, %v2744_v9  ;;  %2140 = vmatpush3.bf16.msra.mxu0 (!%p2043_p12), %v2418_v7  ;;  %2143 = vmatprep.mubr.msk.bf16.mxu0 (!%p2043_p12), %vm2745_vm3, %v2743_v8  ;;  %v2044_v17 = vld [vmem:[%s3364_s3] ss:$0 sm:$0xff] (!%p2043_p12)  ;;  %vm688_vm4 = vcmask (!%p2043_p12), 60416  }
  0xb5   : > { %s2042_s19 = sshll.u32 %s595_s28, 3  ;;  %606 = vadd.xlane.f32.xlu0 (!%p2043_p12), %v605_v1  ;;  %711 = vst.msk [vmem:[#allocation4 + $0x10] sm:$0xff] (!%p2043_p12), %vm708_vm1, %v2744_v9  ;;  %712 = vst.msk [vmem:[#allocation4 + $0x18] sm:$0xff] (!%p2043_p12), %vm708_vm1, %v2744_v9  ;;  %2141 = vmatprep.subr.bf16.mxu0 (!%p2043_p12), %v2743_v8  ;;  %s2746_s13 = smov (!%p2043_p12), 104  }
  0xb6   : > { %s3077_s11 = scalar_lea.vmem %s3362_s1, %s2042_s19  ;;  %715 = vst.msk [vmem:[#allocation5 + $0x10] sm:$0xff] (!%p2043_p12), %vm708_vm1, %v2743_v8  ;;  %716 = vst.msk [vmem:[#allocation5 + $0x18] sm:$0xff] (!%p2043_p12), %vm708_vm1, %v2743_v8  ;;  %s2747_s6 = smov (!%p2043_p12), 120  }
  0xb7   : > { %718 = vst.msk [vmem:[#allocation3] sm:$0xff] (!%p2043_p12), %vm717_vm2, %v2743_v8  ;;  %719 = vst.msk [vmem:[#allocation3 + $0x8] sm:$0xff] (!%p2043_p12), %vm717_vm2, %v2743_v8  ;;  %s2748_s10 = smov (!%p2043_p12), 112  }
  0xb8   : > { %720 = vst.msk [vmem:[#allocation3 + $0x10] sm:$0xff] (!%p2043_p12), %vm717_vm2, %v2743_v8  ;;  %721 = vst.msk [vmem:[#allocation3 + $0x18] sm:$0xff] (!%p2043_p12), %vm717_vm2, %v2743_v8  ;;  %2142 = vmatpush3.bf16.msra.mxu0 (!%p2043_p12), %v2419_v10 }
 0x142   : > { %v607_v2 = vpop.xlane.xlu0 %606 }
 0x143   : > { %v609_v3 = vmul.f32 0.03125, %v607_v2 }
 0x145   : > { %v610_v4 = vsub.f32 %v603_v0, %v609_v3 }
 0x147   : > { %v611_v5 = vmul.f32 %v610_v4, %v610_v4 }
 0x149   : > { %v612_v6 = vsel %vm604_vm0, %v611_v5, 0.0 }
 0x14a   : > { %613 = vadd.xlane.f32.xlu0 %v612_v6 }
 0x1d7   : > { %v614_v11 = vpop.xlane.xlu0 %613 }
 0x1d8   : > { %v615_v12 = vmul.f32 0.03125, %v614_v11 }
 0x1da   : > { %v616_v13 = vadd.f32 1e-05, %v615_v12 }
 0x1dc   : > { %2420 = vrsqrt.f32 %v616_v13 }
 0x1e6   : > { %v2421_v14 = vpop.eup %2420 }
 0x1e7   : > { %v618_v15 = vmul.f32 %v2421_v14, %v610_v4 }
 0x1e9   : > { %v619_v16 = vpack.c.bf16 %v618_v15, %v618_v15 }
 0x1eb   : > { %2144 = vmatmul.mubr.msk.bf16.vlgmr.msra.gmra.mrb[0].mxu0 %vm604_vm0, %v619_v16 }
 0x2be   : > { %v680_v18 = vpop.f32.mrb[0].mxu0 }
 0x2bf   : > { %v681_v19 = vadd.f32 %v2044_v17, %v680_v18  ;;  %v2145_v20 = vpop.f32.mrb[1].mxu0 }
 0x2c0   : > { %v683_v21 = vpop.f32.mrb[2].mxu0 }
 0x2c1   : > { %v686_v22 = vmul.f32 0.35355338, %v681_v19  ;;  %v2146_v23 = vpop.f32.mrb[3].mxu0 }
 0x2c3   : > { %v687_v24 = vpack.c.bf16 %v686_v22, %v686_v22 }
 0x2c5   : > { %703 = vrot.lane.b32.xlu0 %v687_v24, %s2746_s13  ;;  %693 = vrot.lane.b32.xlu1 %v687_v24, %s2747_s6  ;;  %689 = vst.msk [vmem:[#allocation2] sm:$0xf] %vm688_vm4, %v687_v24 }
 0x2c9   : > { %698 = vrot.lane.b32.xlu1 %v687_v24, %s2748_s10 }
 0x337   : > { %v704_v25 = vpop.permute.xlu0 %703  ;;  %v694_v26 = vpop.permute.xlu1 %693 }
 0x338   : > { %707 = vst.msk [vmem:[#allocation2 + $0xc] sm:$0xf] %vm688_vm4, %v704_v25  ;;  %697 = vst.msk [vmem:[#allocation2 + $0x4] sm:$0xf] %vm688_vm4, %v694_v26 }
 0x33b   : > { %v699_v27 = vpop.permute.xlu1 %698 }
 0x33c   : > { %702 = vst.msk [vmem:[#allocation2 + $0x8] sm:$0xf] %vm688_vm4, %v699_v27 }
 0x33d PF: > { %v722_v28 = vld [vmem:[%s3077_s11] sm:$0xff]  ;;  %vm723_vm5 = vcmask 261120   ;;  %v2424_v35 = vld [vmem:[#allocation7] sm:$0xff]   ;;  %v2425_v36 = vld [vmem:[#allocation10] sm:$0xff]   ;;  %v2749_v37 = vmov 0.0   ;;  %vm2750_vm6 = vmmov 0  }
 0x33e   : > { %v724_v29 = vsel %vm723_vm5, %v722_v28, 0.0  ;;  %2147 = vmatprep.subr.bf16.mxu0 %v2749_v37  ;;  %2155 = vmatprep.subr.bf16.mxu1 %v2749_v37  ;;  %v2426_v38 = vld [vmem:[#allocation7 + $0x8] sm:$0xff]   ;;  %v2427_v39 = vld [vmem:[#allocation10 + $0x8] sm:$0xff]   ;;  %s3423_s19 = sld [smem:[#allocation33_spill]]  ;;  %v2053_v47 = vld [vmem:[#allocation12] ss:$0 sm:$0xff] }
 0x33f   : > { %725 = vadd.xlane.f32.xlu0 %v724_v29  ;;  %2148 = vmatpush3.bf16.msra.mxu0 %v2424_v35  ;;  %vm871_vm7 = vcmask 64512   ;;  %vm953_vm8 = vcmask 1043456   ;;  %s2751_s26 = smov 104   ;;  %s2752_s12 = smov 120   ;;  %v870_v62 = vld [vmem:[#allocation2] sm:$0xf] }
 0x340   : > { %2156 = vmatpush3.bf16.msra.mxu1 %v2425_v36  ;;  %2149 = vmatprep.subr.bf16.mxu0 %v2749_v37  ;;  %s2753_s11 = smov 112   ;;  %v1001_v2 = vld [vmem:[#allocation2 + $0x4] sm:$0xf]  ;;  %v1273_v7 = vld [vmem:[#allocation2 + $0xc] sm:$0xf]  ;;  %v2754_v13 = vmov 0  }
 0x341   : > { %2157 = vmatprep.subr.bf16.mxu1 %v2749_v37  ;;  %2151 = vmatprep.mubr.msk.bf16.mxu0 %vm2750_vm6, %v2749_v37  ;;  %v918_v29 = vld [vmem:[#allocation4] sm:$0xff]  ;;  %vm940_vm9 = vcmask 7168   ;;  %p2065_p2 = scmp.ne.s32.totalorder %s2710_s16, 1 }
 0x342   : > { %2159 = vmatprep.mubr.msk.bf16.mxu1 %vm2750_vm6, %v2749_v37  ;;  %2422 = vset.pattern.permute.xlu1 %v2754_v13  ;;  %vm2757_vm10 = vmmov (!%p2065_p2), 0   ;;  %s2758_s16 = smov (!%p2065_p2), 8   ;;  %s2759_s5 = smov (!%p2065_p2), 16   ;;  %vm1460_vm11 = vcmask (!%p2065_p2), 130048   ;;  %vm1462_vm12 = vcmask (!%p2065_p2), 195584   ;;  %vm1649_vm13 = vcmask (!%p2065_p2), 523264  }
 0x343   : > { %2150 = vmatpush3.bf16.msra.mxu0 %v2426_v38  ;;  %v1138_v5 = vld [vmem:[#allocation2 + $0x8] sm:$0xf]  ;;  %2423 = vset.pattern.permute.xlu0 %v2754_v13  ;;  %s2760_s14 = smov (!%p2065_p2), 24   ;;  %s3424_s21 = sld [smem:[#allocation35_spill]] (!%p2065_p2) }
 0x344   : > { %2158 = vmatpush3.bf16.msra.mxu1 %v2427_v39  ;;  %2163 = vmatprep.subr.bf16.mxu0 %v2749_v37  ;;  %v2049_v46 = vld [vmem:[%s3423_s19] ss:$0 sm:$0xff]  ;;  %s2761_s13 = smov (!%p2065_p2), 64   ;;  %s3428_s27 = sld [smem:[#allocation38_spill]] (!%p2065_p2) }
 0x345   : > { %2169 = vmatprep.subr.bf16.mxu1 %v2749_v37  ;;  %v1188_v39 = vld [vmem:[#allocation4 + $0x10] sm:$0xff] }
 0x349   : > { %s3425_s25 = smov (!%p2065_p2), %s3424_s21 }
 0x3cc   : > { %v726_v30 = vpop.xlane.xlu0 %725 }
 0x3cd   : > { %v728_v31 = vmul.f32 0.03125, %v726_v30 }
 0x3cf   : > { %v729_v32 = vsub.f32 %v722_v28, %v728_v31 }
 0x3d1   : > { %v730_v33 = vmul.f32 %v729_v32, %v729_v32 }
 0x3d3   : > { %v731_v34 = vsel %vm723_vm5, %v730_v33, 0.0 }
 0x3d4   : > { %732 = vadd.xlane.f32.xlu0 %v731_v34  ;;  %v1052_v34 = vld [vmem:[#allocation4 + $0x8] sm:$0xff] }
 0x461   : > { %v733_v40 = vpop.xlane.xlu0 %732 }
 0x462   : > { %v734_v41 = vmul.f32 0.03125, %v733_v40 }
 0x464   : > { %v735_v42 = vadd.f32 1e-05, %v734_v41 }
 0x466   : > { %2428 = vrsqrt.f32 %v735_v42  ;;  %v1323_v42 = vld [vmem:[#allocation4 + $0x18] sm:$0xff] }
 0x470   : > { %v2429_v43 = vpop.eup %2428 }
 0x471   : > { %v737_v44 = vmul.f32 %v2429_v43, %v729_v32 }
 0x473   : > { %v738_v45 = vpack.c.bf16 %v737_v44, %v737_v44 }
 0x475   : > { %2152 = vmatmul.mubr.msk.bf16.vlgmr.msra.gmra.mrb[0].mxu0 %vm723_vm5, %v738_v45  ;;  %2160 = vmatmul.mubr.msk.bf16.vlgmr.msra.gmra.mrb[0].mxu1 %vm723_vm5, %v738_v45 }
 0x476   : > { %2165 = vmatprep.mubr.msk.bf16.mxu0 %vm2750_vm6, %v2749_v37  ;;  %2171 = vmatprep.mubr.msk.bf16.mxu1 %vm2750_vm6, %v2749_v37 }
 0x548   : > { %v799_v48 = vpop.f32.mrb[0].mxu0  ;;  %v863_v49 = vpop.f32.mrb[0].mxu1 }
 0x549   : > { %v800_v50 = vadd.f32 %v2049_v46, %v799_v48  ;;  %v864_v51 = vadd.f32 %v2053_v47, %v863_v49  ;;  %v2153_v52 = vpop.f32.mrb[1].mxu0  ;;  %v2161_v53 = vpop.f32.mrb[1].mxu1 }
 0x54a   : > { %v802_v54 = vpop.f32.mrb[2].mxu0  ;;  %v866_v55 = vpop.f32.mrb[2].mxu1 }
 0x54b   : > { %v805_v56 = vpack.c.bf16 %v800_v50, %v800_v50  ;;  %v3120_v57 = vpack.c.bf16 %v864_v51, %v864_v51  ;;  %v2154_v58 = vpop.f32.mrb[3].mxu0  ;;  %v2162_v59 = vpop.f32.mrb[3].mxu1 }
 0x54d   : > { %1274 = vrot.lane.b32.xlu0 %v805_v56, %s2751_s26  ;;  %1003 = vrot.lane.b32.xlu1 %v805_v56, %s2752_s12  ;;  %v876_v60 = vsel %vm871_vm7, %v805_v56, 0  ;;  %v955_v61 = vsel %vm953_vm8, %v3120_v57, 0 }
 0x54e   : > { %2164 = vmatpush3.bf16.xpose.msra.mxu0 %v876_v60  ;;  %2170 = vmatpush3.bf16.msra.mxu1 %v955_v61 }
 0x54f   : > { %2175 = vmatprep.subr.bf16.mxu0 %v2749_v37  ;;  %2181 = vmatprep.subr.bf16.mxu1 %v2749_v37 }
 0x551   : > { %1139 = vrot.lane.b32.xlu1 %v805_v56, %s2753_s11 }
 0x555   : > { %2166 = vmatmul.mubr.msk.bf16.vlgmr.msra.gmra.mrb[4].mxu0 %vm871_vm7, %v870_v62 }
 0x556   : > { %2177 = vmatprep.mubr.msk.bf16.mxu0 %vm2750_vm6, %v2749_v37 }
 0x5bf   : > { %v1004_v63 = vpop.permute.xlu1 %1003  ;;  %v1275_v4 = vpop.permute.xlu0 %1274 }
 0x5c0   : > { %v1009_v0 = vsel %vm871_vm7, %v1004_v63, 0  ;;  %v1280_v6 = vsel %vm871_vm7, %v1275_v4, 0 }
 0x5c1   : > { %2176 = vmatpush3.bf16.xpose.msra.mxu0 %v1009_v0 }
 0x5c2   : > { %2187 = vmatprep.subr.bf16.mxu0 %v2749_v37 }
 0x5c3   : > { %v1140_v1 = vpop.permute.xlu1 %1139 }
 0x5c4   : > { %v1145_v3 = vsel %vm871_vm7, %v1140_v1, 0 }
 0x5c8   : > { %2178 = vmatmul.mubr.msk.bf16.vlgmr.msra.gmra.mrb[8].mxu0 %vm871_vm7, %v1001_v2 }
 0x5c9   : > { %2188 = vmatpush3.bf16.xpose.msra.mxu0 %v1145_v3  ;;  %2189 = vmatprep.mubr.msk.bf16.mxu0 %vm2750_vm6, %v2749_v37 }
 0x5ca   : > { %2199 = vmatprep.subr.bf16.mxu0 %v2749_v37 }
 0x5d0   : > { %2190 = vmatmul.mubr.msk.bf16.vlgmr.msra.gmra.mrb[12].mxu0 %vm871_vm7, %v1138_v5 }
 0x5d1   : > { %2200 = vmatpush3.bf16.xpose.msra.mxu0 %v1280_v6  ;;  %2201 = vmatprep.mubr.msk.bf16.mxu0 %vm2750_vm6, %v2749_v37 }
 0x5d8   : > { %2202 = vmatmul.mubr.msk.bf16.vlgmr.msra.gmra.mrb[16].mxu0 %vm871_vm7, %v1273_v7 }
 0x628   : > { %v912_v8 = vpop.f32.mrb[4].mxu0 }
 0x629   : > { %v919_v9 = vsel %vm871_vm7, %v912_v8, -inf  ;;  %v2167_v10 = vpop.f32.mrb[5].mxu0 }
 0x62a   : > { %920 = vmax.xlane.f32.xlu1 %v919_v9  ;;  %v915_v11 = vpop.f32.mrb[6].mxu0 }
 0x62b   : > { %v2168_v12 = vpop.f32.mrb[7].mxu0 }
 0x69b   : > { %v3146_v14 = vpop.f32.mrb[8].mxu0 }
 0x69c   : > { %v2179_v15 = vpop.f32.mrb[9].mxu0  ;;  %v1053_v16 = vsel %vm871_vm7, %v3146_v14, -inf }
 0x69d   : > { %1054 = vmax.xlane.f32.xlu0 %v1053_v16  ;;  %v1048_v17 = vpop.f32.mrb[10].mxu0 }
 0x69e   : > { %v2180_v18 = vpop.f32.mrb[11].mxu0 }
 0x6a3   : > { %v3150_v19 = vpop.f32.mrb[12].mxu0 }
 0x6a4   : > { %v2191_v20 = vpop.f32.mrb[13].mxu0  ;;  %v1189_v21 = vsel %vm871_vm7, %v3150_v19, -inf }
 0x6a5   : > { %1190 = vmax.xlane.f32.xlu1 %v1189_v21  ;;  %v1184_v22 = vpop.f32.mrb[14].mxu0 }
 0x6a6   : > { %v2192_v23 = vpop.f32.mrb[15].mxu0  ;;  %v934_v22 = vld [vmem:[#allocation5] sm:$0xff] }
 0x6ab   : > { %v3154_v24 = vpop.f32.mrb[16].mxu0 }
 0x6ac   : > { %v2203_v25 = vpop.f32.mrb[17].mxu0  ;;  %v1324_v26 = vsel %vm871_vm7, %v3154_v24, -inf }
 0x6ad   : > { %1325 = vmax.xlane.f32.xlu1 %v1324_v26  ;;  %v1319_v27 = vpop.f32.mrb[18].mxu0  ;;  %v942_v26 = vld [vmem:[#allocation3] sm:$0xff] }
 0x6ae   : > { %v2204_v28 = vpop.f32.mrb[19].mxu0 }
 0x6b7   : > { %v921_v30 = vpop.xlane.xlu1 %920 }
 0x6b8   : > { %v922_v31 = vmax.f32 %v918_v29, %v921_v30 }
 0x6ba   : > { %v923_v32 = vsub.f32 %v918_v29, %v922_v31  ;;  %999 = vst.msk [vmem:[#allocation4] sm:$0xff] %vm940_vm9, %v922_v31 }
 0x6bc   : > { %v924_v33 = vmul.f32 1.442695, %v923_v32 }
 0x6be   : > { %928 = vperm.xlu1 %2422, %v922_v31   ;;  %2430 = vpow2.f32 %v924_v33  ;;  %v1069_v33 = vld [vmem:[#allocation5 + $0x8] sm:$0xff] }
 0x6c8   : > { %v3160_v38 = vpop.eup %2430 }
 0x6c9   : > { %v935_v23 = vmul.f32 %v3160_v38, %v934_v22 }
 0x72a   : > { %v1055_v35 = vpop.xlane.xlu0 %1054 }
 0x72b   : > { %v1056_v36 = vmax.f32 %v1052_v34, %v1055_v35 }
 0x72d   : > { %1136 = vst.msk [vmem:[#allocation4 + $0x8] sm:$0xff] %vm940_vm9, %v1056_v36  ;;  %1062 = vperm.xlu0 %2423, %v1056_v36   ;;  %v1057_v43 = vsub.f32 %v1052_v34, %v1056_v36 }
 0x72f   : > { %v1058_v46 = vmul.f32 1.442695, %v1057_v43 }
 0x731   : > { %945 = vperm.xlu0 %2423, %v3160_v38   ;;  %2432 = vpow2.f32 %v1058_v46  ;;  %v1205_v38 = vld [vmem:[#allocation5 + $0x10] sm:$0xff]  ;;  %v1077_v46 = vld [vmem:[#allocation3 + $0x8] sm:$0xff] }
 0x732   : > { %v1191_v40 = vpop.xlane.xlu1 %1190 }
 0x733   : > { %v1192_v41 = vmax.f32 %v1188_v39, %v1191_v40 }
 0x735   : > { %1271 = vst.msk [vmem:[#allocation4 + $0x10] sm:$0xff] %vm940_vm9, %v1192_v41  ;;  %1198 = vperm.xlu1 %2422, %v1192_v41   ;;  %v1193_v47 = vsub.f32 %v1188_v39, %v1192_v41 }
 0x737   : > { %v1194_v51 = vmul.f32 1.442695, %v1193_v47 }
 0x73a   : > { %v1326_v44 = vpop.xlane.xlu1 %1325 }
 0x73b   : > { %v1327_v45 = vmax.f32 %v1323_v42, %v1326_v44  ;;  %v3171_v52 = vpop.eup %2432 }
 0x73c   : > { %v1070_v34 = vmul.f32 %v3171_v52, %v1069_v33 }
 0x73d   : > { %1406 = vst.msk [vmem:[#allocation4 + $0x18] sm:$0xff] %vm940_vm9, %v1327_v45  ;;  %1333 = vperm.xlu1 %2422, %v1327_v45   ;;  %v1328_v56 = vsub.f32 %v1323_v42, %v1327_v45  ;;  %v1340_v42 = vld [vmem:[#allocation5 + $0x18] sm:$0xff] }
 0x73e   : > { %v929_v48 = vpop.permute.xlu1 %928 }
 0x73f   : > { %v931_v49 = vsub.f32 %v912_v8, %v929_v48 }
 0x741   : > { %v932_v50 = vmul.f32 1.442695, %v931_v49  ;;  %1086 = vrot.lane.b32.xlu1 %v3120_v57, %s2752_s12 }
 0x743   : > { %2434 = vpow2.f32 %v932_v50 }
 0x744   : > { %2436 = vpow2.f32 %v1194_v51 }
 0x745   : > { %1221 = vrot.lane.b32.xlu1 %v3120_v57, %s2753_s11  ;;  %s3426_s11 = sld [smem:[#allocation36_spill]] (!%p2065_p2) }
 0x749   : > { %1356 = vrot.lane.b32.xlu1 %v3120_v57, %s2751_s26  ;;  %v1329_v57 = vmul.f32 1.442695, %v1328_v56 }
 0x74b   : > { %2438 = vpow2.f32 %v1329_v57 }
 0x74d   : > { %v2435_v53 = vpop.eup %2434  ;;  %1080 = vperm.xlu1 %2422, %v3171_v52  }
 0x74e   : > { %v949_v54 = vpack.c.bf16 %v2435_v53, %v2435_v53  ;;  %v3174_v55 = vpop.eup %2436  ;;  %v936_v58 = vsel %vm871_vm7, %v2435_v53, 0.0  ;;  %v1213_v53 = vld [vmem:[#allocation3 + $0x10] sm:$0xff] }
 0x74f   : > { %v1206_v39 = vmul.f32 %v3174_v55, %v1205_v38 }
 0x750   : > { %2172 = vmatmul.mubr.msk.bf16.vlgmr.msra.gmra.mrb[4].mxu1 %vm871_vm7, %v949_v54 }
 0x751   : > { %1216 = vperm.xlu1 %2422, %v3174_v55   ;;  %2183 = vmatprep.mubr.msk.bf16.mxu1 %vm2750_vm6, %v2749_v37 }
 0x755   : > { %v3181_v59 = vpop.eup %2438 }
 0x756   : > { %v1341_v43 = vmul.f32 %v3181_v59, %v1340_v42 }
 0x775   : > { %937 = vadd.xlane.f32.xlu1 %v936_v58 }
 0x786   : > { %1351 = vperm.xlu1 %2422, %v3181_v59  }
 0x7ac   : > { %v1063_v60 = vpop.permute.xlu0 %1062 }
 0x7ad   : > { %v1065_v61 = vsub.f32 %v3146_v14, %v1063_v60  ;;  %v1348_v60 = vld [vmem:[#allocation3 + $0x18] sm:$0xff] }
 0x7af   : > { %v1066_v62 = vmul.f32 1.442695, %v1065_v61 }
 0x7b0   : > { %v946_v27 = vpop.permute.xlu0 %945 }
 0x7b1   : > { %2440 = vpow2.f32 %v1066_v62  ;;  %v948_v28 = vmul.f32 %v946_v27, %v942_v26 }
 0x7b4   : > { %v1199_v63 = vpop.permute.xlu1 %1198 }
 0x7b5   : > { %v1201_v0 = vsub.f32 %v3150_v19, %v1199_v63 }
 0x7b7   : > { %v1202_v1 = vmul.f32 1.442695, %v1201_v0 }
 0x7b9   : > { %2442 = vpow2.f32 %v1202_v1 }
 0x7bb   : > { %v2441_v2 = vpop.eup %2440 }
 0x7bc   : > { %v1334_v3 = vpop.permute.xlu1 %1333  ;;  %v1071_v4 = vsel %vm871_vm7, %v2441_v2, 0.0  ;;  %v1084_v10 = vpack.c.bf16 %v2441_v2, %v2441_v2 }
 0x7bd   : > { %v1336_v5 = vsub.f32 %v3154_v24, %v1334_v3  ;;  %1072 = vadd.xlane.f32.xlu0 %v1071_v4 }
 0x7bf   : > { %v1337_v6 = vmul.f32 1.442695, %v1336_v5 }
 0x7c0   : > { %v1087_v7 = vpop.permute.xlu1 %1086 }
 0x7c1   : > { %2444 = vpow2.f32 %v1337_v6  ;;  %v1092_v8 = vsel %vm953_vm8, %v1087_v7, 0  ;;  %v2755_v7 = vmov (!%p2065_p2), 0  }
 0x7c2   : > { %2182 = vmatpush3.bf16.msra.mxu1 %v1092_v8  ;;  %2446 = vset.pattern.permute.xlu0 (!%p2065_p2), %v2755_v7 }
 0x7c3   : > { %v2443_v9 = vpop.eup %2442  ;;  %2193 = vmatprep.subr.bf16.mxu1 %v2749_v37  ;;  %2447 = vset.pattern.permute.xlu1 (!%p2065_p2), %v2755_v7 }
 0x7c4   : > { %v1222_v11 = vpop.permute.xlu1 %1221  ;;  %v1207_v12 = vsel %vm871_vm7, %v2443_v9, 0.0  ;;  %v1220_v16 = vpack.c.bf16 %v2443_v9, %v2443_v9 }
 0x7c5   : > { %v1227_v13 = vsel %vm953_vm8, %v1222_v11, 0  ;;  %1208 = vadd.xlane.f32.xlu0 %v1207_v12  ;;  %2184 = vmatmul.mubr.msk.bf16.vlgmr.msra.gmra.mrb[8].mxu1 %vm871_vm7, %v1084_v10 }
 0x7c6   : > { %2194 = vmatpush3.bf16.msra.mxu1 %v1227_v13  ;;  %2195 = vmatprep.mubr.msk.bf16.mxu1 %vm2750_vm6, %v2749_v37  ;;  %v2448_v13 = vld [vmem:[#allocation13] sm:$0xff] (!%p2065_p2)  }
 0x7c7   : > { %2205 = vmatprep.subr.bf16.mxu1 %v2749_v37 }
 0x7c8   : > { %v1357_v14 = vpop.permute.xlu1 %1356 }
 0x7c9   : > { %v1362_v18 = vsel %vm953_vm8, %v1357_v14, 0  ;;  %v2756_v14 = vmov (!%p2065_p2), 0.0  }
 0x7ca   : > { %2211 = vmatprep.subr.bf16.mxu0 (!%p2065_p2), %v2756_v14  ;;  %1547 = vst.msk [vmem:[#allocation6] sm:$0xff] (!%p2065_p2), %vm723_vm5, %v2756_v14  ;;  %2215 = vmatprep.mubr.msk.bf16.mxu0 (!%p2065_p2), %vm2757_vm10, %v2756_v14 }
 0x7cb   : > { %v2445_v15 = vpop.eup %2444  ;;  %2212 = vmatpush3.bf16.msra.mxu0 (!%p2065_p2), %v2448_v13 }
 0x7cc   : > { %v1342_v17 = vsel %vm871_vm7, %v2445_v15, 0.0  ;;  %v1355_v19 = vpack.c.bf16 %v2445_v15, %v2445_v15  ;;  %v1081_v20 = vpop.permute.xlu1 %1080  ;;  %2213 = vmatprep.subr.bf16.mxu0 (!%p2065_p2), %v2756_v14  ;;  %v2449_v15 = vld [vmem:[#allocation13 + $0x8] sm:$0xff] (!%p2065_p2)  }
 0x7cd   : > { %1343 = vadd.xlane.f32.xlu0 %v1342_v17  ;;  %2196 = vmatmul.mubr.msk.bf16.vlgmr.msra.gmra.mrb[12].mxu1 %vm871_vm7, %v1220_v16  ;;  %v1083_v47 = vmul.f32 %v1081_v20, %v1077_v46 }
 0x7ce   : > { %2206 = vmatpush3.bf16.msra.mxu1 %v1362_v18  ;;  %2207 = vmatprep.mubr.msk.bf16.mxu1 %vm2750_vm6, %v2749_v37 }
 0x7cf   : > { %2219 = vmatprep.subr.bf16.mxu1 (!%p2065_p2), %v2756_v14  ;;  %2214 = vmatpush3.bf16.msra.mxu0 (!%p2065_p2), %v2449_v15 }
 0x7d0   : > { %v1217_v21 = vpop.permute.xlu1 %1216  ;;  %2227 = vmatprep.subr.bf16.mxu0 (!%p2065_p2), %v2756_v14 }
 0x7d1   : > { %v1219_v54 = vmul.f32 %v1217_v21, %v1213_v53  ;;  %v2079_v53 = vld [vmem:[%s3426_s11] ss:$0 sm:$0xff] (!%p2065_p2) }
 0x7d5   : > { %2208 = vmatmul.mubr.msk.bf16.vlgmr.msra.gmra.mrb[16].mxu1 %vm871_vm7, %v1355_v19 }
 0x7d6   : > { %2223 = vmatprep.mubr.msk.bf16.mxu1 (!%p2065_p2), %vm2757_vm10, %v2756_v14 }
 0x802   : > { %v938_v24 = vpop.xlane.xlu1 %937 }
 0x803   : > { %v939_v25 = vadd.f32 %v938_v24, %v935_v23 }
 0x805   : > { %941 = vst.msk [vmem:[#allocation5] sm:$0xff] %vm940_vm9, %v939_v25 }
 0x806   : > { %v1352_v61 = vpop.permute.xlu1 %1351 }
 0x807   : > { %v1354_v62 = vmul.f32 %v1352_v61, %v1348_v60 }
 0x80c   : > { %v1412_v8 = vld [vmem:[#allocation5] sm:$0xff] (!%p2065_p2) }
 0x823   : > { %v991_v29 = vpop.f32.mrb[4].mxu1 }
 0x824   : > { %v997_v30 = vadd.f32 %v991_v29, %v948_v28  ;;  %v2173_v31 = vpop.f32.mrb[5].mxu1 }
 0x825   : > { %v994_v32 = vpop.f32.mrb[6].mxu1 }
 0x826   : > { %998 = vst.msk [vmem:[#allocation3] sm:$0xff] %vm871_vm7, %v997_v30  ;;  %v2174_v37 = vpop.f32.mrb[7].mxu1 }
 0x82d   : > { %v1411_v26 = vld [vmem:[#allocation3] sm:$0xff] (!%p2065_p2) }
 0x84a   : > { %v1073_v35 = vpop.xlane.xlu0 %1072 }
 0x84b   : > { %v1074_v36 = vadd.f32 %v1073_v35, %v1070_v34  ;;  %v2066_v34 = vld [vmem:[#allocation15] ss:$0 sm:$0xff] (!%p2065_p2) }
 0x84d   : > { %1075 = vst.msk [vmem:[#allocation5 + $0x8] sm:$0xff] %vm940_vm9, %v1074_v36  ;;  %v1531_v36 = vld [vmem:[%s3071_s15] sm:$0xff] (!%p2065_p2) }
 0x852   : > { %v1209_v40 = vpop.xlane.xlu0 %1208 }
 0x853   : > { %v1210_v41 = vadd.f32 %v1209_v40, %v1206_v39 }
 0x854   : > { %v1421_v4 = vld [vmem:[#allocation5 + $0x8] sm:$0xff] (!%p2065_p2) }
 0x855   : > { %1211 = vst.msk [vmem:[#allocation5 + $0x10] sm:$0xff] %vm940_vm9, %v1210_v41  ;;  %2462 = vrcp.f32 (!%p2065_p2), %v1421_v4 }
 0x85a   : > { %v1344_v44 = vpop.xlane.xlu0 %1343 }
 0x85b   : > { %v1345_v45 = vadd.f32 %v1344_v44, %v1341_v43  ;;  %v2451_v44 = vld [vmem:[%s3424_s21 + $0x8] sm:$0xff] (!%p2065_p2)  }
 0x85c   : > { %v1430_v6 = vld [vmem:[#allocation5 + $0x10] sm:$0xff] (!%p2065_p2) }
 0x85d   : > { %1346 = vst.msk [vmem:[#allocation5 + $0x18] sm:$0xff] %vm940_vm9, %v1345_v45 }
 0x85f   : > { %v2463_v9 = vpop.eup (!%p2065_p2), %2462 }
 0x860   : > { %1425 = vperm.xlu0 (!%p2065_p2), %2446, %v2463_v9  }
 0x864   : > { %v1439_v5 = vld [vmem:[#allocation5 + $0x18] sm:$0xff] (!%p2065_p2) }
 0x865   : > { %2464 = vrcp.f32 (!%p2065_p2), %v1439_v5 }
 0x866   : > { %2466 = vrcp.f32 (!%p2065_p2), %v1430_v6 }
 0x867   : > { %2468 = vrcp.f32 (!%p2065_p2), %v1412_v8 }
 0x86f   : > { %v2465_v10 = vpop.eup (!%p2065_p2), %2464 }
 0x870   : > { %v2467_v11 = vpop.eup (!%p2065_p2), %2466  ;;  %1443 = vperm.xlu1 (!%p2065_p2), %2447, %v2465_v10  }
 0x871   : > { %v2469_v12 = vpop.eup (!%p2065_p2), %2468  ;;  %1434 = vperm.xlu0 (!%p2065_p2), %2446, %v2467_v11  }
 0x874   : > { %1416 = vperm.xlu1 (!%p2065_p2), %2447, %v2469_v12  }
 0x898   : > { %v1128_v48 = vpop.f32.mrb[8].mxu1 }
 0x899   : > { %v1134_v49 = vadd.f32 %v1128_v48, %v1083_v47  ;;  %v2185_v50 = vpop.f32.mrb[9].mxu1 }
 0x89a   : > { %v1131_v51 = vpop.f32.mrb[10].mxu1  ;;  %v2450_v50 = vld [vmem:[%s3425_s25] sm:$0xff] (!%p2065_p2)  }
 0x89b   : > { %1135 = vst.msk [vmem:[#allocation3 + $0x8] sm:$0xff] %vm871_vm7, %v1134_v49  ;;  %v2186_v52 = vpop.f32.mrb[11].mxu1  ;;  %v2452_v51 = vld [vmem:[%s3425_s25] sm:$0xff] (!%p2065_p2)  }
 0x89c   : > { %2220 = vmatpush3.bf16.msra.mxu1 (!%p2065_p2), %v2452_v51  ;;  %v2453_v52 = vld [vmem:[%s3425_s25 + $0x8] sm:$0xff] (!%p2065_p2)  }
 0x89d   : > { %2221 = vmatprep.subr.bf16.mxu1 (!%p2065_p2), %v2756_v14 }
 0x8a0   : > { %v1263_v55 = vpop.f32.mrb[12].mxu1  ;;  %2222 = vmatpush3.bf16.msra.mxu1 (!%p2065_p2), %v2453_v52 }
 0x8a1   : > { %v1269_v56 = vadd.f32 %v1263_v55, %v1219_v54  ;;  %v2197_v58 = vpop.f32.mrb[13].mxu1  ;;  %2239 = vmatprep.subr.bf16.mxu1 (!%p2065_p2), %v2756_v14 }
 0x8a2   : > { %v1266_v57 = vpop.f32.mrb[14].mxu1  ;;  %v1420_v16 = vld [vmem:[#allocation3 + $0x8] sm:$0xff] (!%p2065_p2) }
 0x8a3   : > { %1270 = vst.msk [vmem:[#allocation3 + $0x10] sm:$0xff] %vm871_vm7, %v1269_v56  ;;  %v2198_v59 = vpop.f32.mrb[15].mxu1 }
 0x8a5   : > { %1410 = sbr.rel (%p2065_p2) target bundleno = 3392 (0xd40), region = 104 }
 0x8a8   : > { %v1398_v63 = vpop.f32.mrb[16].mxu1 }
 0x8a9   : > { %v1404_v0 = vadd.f32 %v1398_v63, %v1354_v62  ;;  %v2209_v1 = vpop.f32.mrb[17].mxu1 }
 0x8aa   : > { %v1401_v2 = vpop.f32.mrb[18].mxu1  ;;  %v1429_v21 = vld [vmem:[#allocation3 + $0x10] sm:$0xff] (!%p2065_p2) }
 0x8ab   : > { %1405 = vst.msk [vmem:[#allocation3 + $0x18] sm:$0xff] %vm871_vm7, %v1404_v0  ;;  %v2210_v3 = vpop.f32.mrb[19].mxu1 }
 0x8b2   : > { %v1438_v18 = vld [vmem:[#allocation3 + $0x18] sm:$0xff] }
 0x8df   : > { %v1426_v17 = vpop.permute.xlu0 %1425 }
 0x8e0   : > { %v1428_v19 = vmul.f32 %v1426_v17, %v1420_v16 }
 0x8e2   : > { %1448 = vrot.lane.b32.xlu0 %v1428_v19, %s2758_s16 }
 0x8ef   : > { %v1444_v20 = vpop.permute.xlu1 %1443 }
 0x8f0   : > { %v1446_v22 = vmul.f32 %v1444_v20, %v1438_v18  ;;  %v1435_v23 = vpop.permute.xlu0 %1434 }
 0x8f1   : > { %v1437_v24 = vmul.f32 %v1435_v23, %v1429_v21  ;;  %v1615_v21 = vld [vmem:[#allocation6] sm:$0xff] }
 0x8f2   : > { %1456 = vrot.lane.b32.xlu0 %v1446_v22, %s2760_s14  ;;  %s3427_s14 = sld [smem:[#allocation37_spill]] }
 0x8f3   : > { %1452 = vrot.lane.b32.xlu1 %v1437_v24, %s2759_s5  ;;  %v1417_v25 = vpop.permute.xlu1 %1416 }
 0x8f4   : > { %v1419_v28 = vmul.f32 %v1417_v25, %v1411_v26 }
 0x8f8   : > { %v2454_v54 = vld [vmem:[%s3427_s14] sm:$0xff]   ;;  %v2455_v55 = vld [vmem:[%s3427_s14 + $0x8] sm:$0xff]   ;;  %v2456_v0 = vld [vmem:[%s3427_s14 + $0x10] sm:$0xff]  }
 0x8f9   : > { %v2457_v1 = vld [vmem:[%s3427_s14 + $0x20] sm:$0xff]   ;;  %v2458_v2 = vld [vmem:[%s3427_s14 + $0x18] sm:$0xff]   ;;  %v2459_v3 = vld [vmem:[%s3427_s14 + $0x28] sm:$0xff]  }
 0x8fa   : > { %v2460_v4 = vld [vmem:[%s3427_s14 + $0x30] sm:$0xff]   ;;  %v2461_v5 = vld [vmem:[%s3427_s14 + $0x38] sm:$0xff]  }
 0x954   : > { %v1449_v27 = vpop.permute.xlu0 %1448 }
 0x955   : > { %v1459_v29 = vsel %vm871_vm7, %v1419_v28, %v1449_v27 }
 0x964   : > { %v1457_v31 = vpop.permute.xlu0 %1456 }
 0x965   : > { %v1453_v30 = vpop.permute.xlu1 %1452 }
 0x966   : > { %v1461_v32 = vsel %vm1460_vm11, %v1459_v29, %v1453_v30 }
 0x967   : > { %v1463_v37 = vsel %vm1462_vm12, %v1461_v32, %v1457_v31 }
 0x968   : > { %v1464_v33 = vpack.c.bf16 %v1463_v37, %v1463_v37 }
 0x96a   : > { %2216 = vmatmul.mubr.msk.bf16.vlgmr.msra.gmra.mrb[0].mxu0 %vm723_vm5, %v1464_v33  ;;  %v2088_v33 = vld [vmem:[%s3428_s27] ss:$0 sm:$0xff] }
 0x96b   : > { %2235 = vmatprep.mubr.msk.bf16.mxu0 %vm2757_vm10, %v2756_v14  ;;  %2228 = vmatpush3.bf16.msra.mxu0 %v2454_v54 }
 0x96c   : > { %2229 = vmatprep.subr.bf16.mxu0 %v2756_v14 }
 0x96f   : > { %2230 = vmatpush3.bf16.msra.mxu0 %v2455_v55 }
 0x970   : > { %2231 = vmatprep.subr.bf16.mxu0 %v2756_v14 }
 0x973   : > { %2232 = vmatpush3.bf16.msra.mxu0 %v2456_v0 }
 0x974   : > { %2233 = vmatprep.subr.bf16.mxu0 %v2756_v14 }
 0x977   : > { %2234 = vmatpush3.bf16.msra.mxu0 %v2458_v2 }
 0xa3d   : > { %v1525_v35 = vpop.f32.mrb[0].mxu0 }
 0xa3e   : > { %v1526_v38 = vadd.f32 %v2066_v34, %v1525_v35  ;;  %v2217_v39 = vpop.f32.mrb[1].mxu0 }
 0xa3f   : > { %v1528_v40 = vpop.f32.mrb[2].mxu0 }
 0xa40   : > { %v3230_v41 = vadd.f32 %v1531_v36, %v1526_v38  ;;  %v2218_v42 = vpop.f32.mrb[3].mxu0 }
 0xa42   : > { %v1533_v43 = vsel %vm723_vm5, %v3230_v41, 0.0 }
 0xa43   : > { %1534 = vadd.xlane.f32.xlu1 %v1533_v43 }
 0xa54   : > { %1717 = vrot.lane.b32.xlu1 %v2451_v44, %s2761_s13 }
 0xa58   : > { %1721 = vrot.lane.b32.xlu1 %v2079_v53, %s2761_s13 }
 0xad0   : > { %v1535_v45 = vpop.xlane.xlu1 %1534 }
 0xad1   : > { %v1536_v46 = vmul.f32 0.03125, %v1535_v45 }
 0xad3   : > { %v1537_v47 = vsub.f32 %v3230_v41, %v1536_v46 }
 0xad4   : > { %v1718_v63 = vpop.permute.xlu1 %1717 }
 0xad5   : > { %v1538_v48 = vmul.f32 %v1537_v47, %v1537_v47 }
 0xad7   : > { %v1539_v49 = vsel %vm723_vm5, %v1538_v48, 0.0 }
 0xad8   : > { %1540 = vadd.xlane.f32.xlu0 %v1539_v49  ;;  %v1722_v13 = vpop.permute.xlu1 %1721 }
 0xaee   : > { %1715 = vrot.lane.b32.xlu0 %v2450_v50, %s2761_s13 }
 0xb65   : > { %v1541_v56 = vpop.xlane.xlu0 %1540 }
 0xb66   : > { %v1542_v58 = vmul.f32 0.03125, %v1541_v56 }
 0xb68   : > { %v1543_v57 = vadd.f32 1e-05, %v1542_v58 }
 0xb69   : > { %v1716_v62 = vpop.permute.xlu0 %1715 }
 0xb6a   : > { %2470 = vrsqrt.f32 %v1543_v57 }
 0xb74   : > { %v2471_v59 = vpop.eup %2470 }
 0xb75   : > { %v1545_v60 = vmul.f32 %v2471_v59, %v1537_v47 }
 0xb77   : > { %v1546_v61 = vpack.c.bf16 %v1545_v60, %v1545_v60 }
 0xb79   : > { %2224 = vmatmul.mubr.msk.bf16.vlgmr.msra.gmra.mrb[0].mxu1 %vm723_vm5, %v1546_v61 }
 0xb7a   : > { %2240 = vmatpush3.bf16.msra.mxu1 %v1716_v62  ;;  %2243 = vmatprep.mubr.msk.bf16.mxu1 %vm2757_vm10, %v2756_v14 }
 0xb7b   : > { %2241 = vmatprep.subr.bf16.mxu1 %v2756_v14 }
 0xb7e   : > { %2242 = vmatpush3.bf16.msra.mxu1 %v1718_v63 }
 0xb7f   : > { %2247 = vmatprep.subr.bf16.mxu1 %v2756_v14 }
 0xb81   : > { %2244 = vmatmul.mubr.msk.bf16.vlgmr.msra.gmra.mrb[4].mxu1 %vm723_vm5, %v1546_v61 }
 0xb82   : > { %2255 = vmatprep.mubr.msk.bf16.mxu1 %vm2757_vm10, %v2756_v14  ;;  %2248 = vmatpush3.bf16.msra.mxu1 %v2457_v1 }
 0xb83   : > { %2249 = vmatprep.subr.bf16.mxu1 %v2756_v14 }
 0xb86   : > { %2250 = vmatpush3.bf16.msra.mxu1 %v2459_v3 }
 0xb87   : > { %2251 = vmatprep.subr.bf16.mxu1 %v2756_v14 }
 0xb8a   : > { %2252 = vmatpush3.bf16.msra.mxu1 %v2460_v4 }
 0xb8b   : > { %2253 = vmatprep.subr.bf16.mxu1 %v2756_v14 }
 0xb8e   : > { %2254 = vmatpush3.bf16.msra.mxu1 %v2461_v5 }
 0xc4c   : > { %v1608_v6 = vpop.f32.mrb[0].mxu1 }
 0xc4d   : > { %v1609_v7 = vadd.f32 %v2079_v53, %v1608_v6  ;;  %v2225_v8 = vpop.f32.mrb[1].mxu1 }
 0xc4e   : > { %v1611_v9 = vpop.f32.mrb[2].mxu1 }
 0xc4f   : > { %v1614_v10 = vmax.f32 %v1609_v7, 0.0  ;;  %v2226_v11 = vpop.f32.mrb[3].mxu1 }
 0xc51   : > { %v1616_v12 = vpack.c.bf16 %v1614_v10, %v1614_v10 }
 0xc53   : > { %2236 = vmatmul.mubr.msk.bf16.vlgmr.msra.gmra.mrb[4].mxu0 %vm1649_vm13, %v1616_v12 }
 0xc54   : > { %v1758_v15 = vpop.f32.mrb[4].mxu1 }
 0xc55   : > { %v1759_v16 = vadd.f32 %v1758_v15, %v1722_v13  ;;  %v2245_v17 = vpop.f32.mrb[5].mxu1 }
 0xc56   : > { %v1761_v18 = vpop.f32.mrb[6].mxu1 }
 0xc57   : > { %v1764_v14 = vmax.f32 %v1759_v16, 0.0  ;;  %v2246_v19 = vpop.f32.mrb[7].mxu1 }
 0xc59   : > { %v1766_v20 = vpack.c.bf16 %v1764_v14, %v1764_v14 }
 0xc5b   : > { %2256 = vmatmul.mubr.msk.bf16.vlgmr.msra.gmra.mrb[8].mxu1 %vm1649_vm13, %v1766_v20 }
 0xd26   : > { %v1687_v22 = vpop.f32.mrb[4].mxu0 }
 0xd27   : > { %v1693_v23 = vadd.f32 %v1687_v22, %v1615_v21  ;;  %v2237_v24 = vpop.f32.mrb[5].mxu0 }
 0xd28   : > { %v1690_v25 = vpop.f32.mrb[6].mxu0 }
 0xd29   : > { %1694 = vst.msk [vmem:[#allocation6] sm:$0xff] %vm723_vm5, %v1693_v23  ;;  %v2238_v26 = vpop.f32.mrb[7].mxu0 }
 0xd2e   : > { %v1836_v27 = vpop.f32.mrb[8].mxu1 }
 0xd2f   : > { %v2257_v28 = vpop.f32.mrb[9].mxu1 }
 0xd30   : > { %v1765_v29 = vld [vmem:[#allocation6] sm:$0xff]  ;;  %v1839_v30 = vpop.f32.mrb[10].mxu1 }
 0xd31   : > { %v1842_v31 = vadd.f32 %v1836_v27, %v1765_v29  ;;  %v2258_v32 = vpop.f32.mrb[11].mxu1 }
 0xd33   : > { %1843 = vst.msk [vmem:[#allocation6] sm:$0xff] %vm723_vm5, %v1842_v31 }
 0xd3a   : > { %v1844_v37 = vld [vmem:[#allocation6] sm:$0xff] }
 0xd3b   : > { %v1845_v34 = vadd.f32 %v1844_v37, %v3230_v41 }
 0xd3d   : > { %v1853_v35 = vadd.f32 %v2088_v33, %v1845_v34 }
 0xd3f   : > { %1854 = vst.msk [vmem:[%s581_s29] sm:$0xff] %vm723_vm5, %v1853_v35 }
 0xd40 PF: > { %s3429_s21 = sld [smem:[#allocation28_spill]]  ;;  %s2090_s13 = sshll.u32 %s2718_s18, 1 }
 0xd41   : > { %s1867_s15 = sadd.s32 %s2714_s17, %s2090_s13  ;;  %s1871_s6 = sshll.u32 %s581_s29, 4  ;;  %s3304_s6 = int_to_ptr.vmem [resolvable:$true] %s1871_s6 }
 0xd42   : > { %s2091_s10 = sshll.u32 %s1867_s15, 7  ;;  %s3430_s19 = sld [smem:[#allocation39_spill]] }
 0xd43   : > { %s1856_s11 = scalar_lea.sflag [#allocation9], %s579_s24  ;;  %s2612_s16 = scalar_lea.vmem %s3304_s6, 128 }
 0xd44   : > { %p2613_p4 = scmp.ne.s32.totalorder %s3304_s6, %s2612_s16  ;;  %s2762_s17 = smov [#allocation16]  }
 0xd45   : > { %s2616_s18 = sshll.u32 %s2762_s17, 4  ;;  %s2617_s18 = int_to_ptr.vmem [resolvable:$false] %s2616_s18 }
 0xd46   : > { %p3432_p5 = scmp.ne.s32.totalorder %s3429_s21, 0  ;;  %s2618_s23 = scalar_lea.vmem %s2617_s18, 256 }
 0xd47   : > { %p2619_p10 = scmp.lt.s32.totalorder %s3304_s6, %s2617_s18  ;;  %p2620_p13 = scmp.lt.s32.totalorder %s2618_s23, %s2612_s16 }
 0xd48   : > { %s3431_s26 = smov %s3430_s19  ;;  %s1869_s12 = scalar_lea.hbm %s3430_s19, %s2091_s10 }
 0xd49   : > { %p2614_p7 = pnand %p2613_p4, %p3432_p5  ;;  %p2621_p0 = por %p2620_p13, %p2619_p10 }
 0xd4b   : > { %p2615_p9 = pneg %p2614_p7 }
 0xd4d   : > { %p2622_p6 = pnand %p2621_p0, %p2615_p9 }
 0xd4f   : > { %2625 = shalt.err (!%p2622_p6)
}
 0xd50   : > { %s2626_s29 = scalar_lea.hbm %s1869_s12, 128  ;;  %s2630_s20 = scalar_lea.hbm %s3431_s26, 512 }
 0xd51   : > { %p2627_p8 = scmp.ne.s32.totalorder %s1869_s12, %s2626_s29  ;;  %p2631_p11 = scmp.lt.u32.totalorder %s1869_s12, %s3431_s26 }
 0xd52   : > { %p2632_p12 = scmp.lt.u32.totalorder %s2630_s20, %s2626_s29  ;;  %p2634_p4 = scmp.lt.u32.totalorder %s2626_s29, %s1869_s12 }
 0xd53   : > { %p2628_p1 = pnand %p2627_p8, %p3432_p5 }
 0xd54   : > { %p2633_p2 = por %p2632_p12, %p2631_p11 }
 0xd55   : > { %p2629_p3 = pneg %p2628_p1 }
 0xd56   : > { %p2635_p7 = por %p2634_p4, %p2633_p2 }
 0xd58   : > { %p2636_p9 = pnand %p2635_p7, %p2629_p3 }
 0xd5a   : > { %2639 = shalt.err (!%p2636_p9)
}
 0xd5b   : > { %2279 = dma.vmem_to_hbm [thread:$0]  (%p3432_p5), %s3304_s6, 128, %s1869_s12, %s1856_s11  }
 0xd5c PF: > { %s3433_s15 = sld [smem:[#allocation26_spill]]  ;;  %s3434_s10 = sld [smem:[#allocation21_spill]] }
 0xd5d   : > { %s3435_s22 = sld [smem:[#allocation30_spill]] }
 0xd62   : > { %p2311_p10 = scmp.ge.s32.totalorder %s3433_s15, 2  ;;  %s1883_s28 = sand.u32 1, %s3434_s10  }
 0xd63   : > { %p3436_p13 = scmp.ne.s32.totalorder %s3435_s22, 0  ;;  %s1884_s19 = scalar_lea.sflag [#allocation9], %s1883_s28 }
 0xd65   : > { %p2298_p0 = pnand %p2311_p10, %p3436_p13 }
 0xd67   : > { %2693 = dma.done.wait (!%p2298_p0), %s1884_s19, 128  }
 0xd68   : > { %2695 = vsyncadd (!%p2298_p0), %s1884_s19, 4294967168  ;;  %s30_s22 = sadd.s32 1, %s3433_s15   ;;  %s3437_s16 = sld [smem:[#allocation22_spill]] }
 0xd69   : > { %p27_p6 = scmp.ge.s32.totalorder %s30_s22, 10   ;;  %s3438_s15 = sld [smem:[#allocation32_spill]] }
 0xd6a   : > { %s3439_s21 = sld [smem:[#allocation23_spill]]  ;;  %s3440_s17 = sld [smem:[#allocation24_spill]] }
 0xd6b   : > { %s3441_s18 = sld [smem:[#allocation25_spill]]  ;;  %s3442_s19 = sld [smem:[#allocation27_spill]] }
 0xd6c   : > { %s3443_s20 = sld [smem:[#allocation29_spill]]  ;;  %s3444_s6 = sld [smem:[#allocation31_spill]] }
 0xd6d   : > { %s3445_s29 = smov %s2702_s30  ;;  %29 = sbr.rel (!%p27_p6) target bundleno = 17 (0x11), region = 158 }
 0xd6e   : > { %s3446_s30 = smov %s3437_s16 }
 0xd70   : > { %s3447_s16 = smov %s3439_s21 }
 0xd72   : > { %s3448_s21 = smov %s3444_s6 }
 0xd74   :  { %1889 = vsyncpa [#allocation8], 1 }
 0xd75   :  { %1891 = vsyncpa [#allocation8 + $0x1], 1 }
 0xd76   :  { %1892 = vsyncpa [#allocation11], 1 }
 0xd77   :  { %1893 = vsyncpa [#allocation14], 1 }
 0xd78   :  { %1894 = vsyncpa [#allocation9], 1 }
 0xd79   :  { %1896 = vsyncpa [#allocation9 + $0x1], 1 }

</bundles_post_ra>
